<compile_context>
chip_gen: v7x
topology: tpu7x:2x2x1
jax: 0.10.0
libtpu: 0.0.40
codegen_flags: <defaults>
</compile_context>

<pallas_src>
import functools

import jax
import jax.numpy as jnp
from jax.experimental import pallas as pl
from jax.experimental.pallas import tpu as pltpu


def _attention_body(q, k, v, wo, bo, out_ref, *, bt, n, m, n_head, hd_pad,
                    compute_dtype, approx_recip):
    """q: (bt*n, n_head*hd_pad) f32; k/v: (bt*m, n_head*hd_pad) f32.

    Heads occupy 128-lane-aligned column groups (zero padded). Writes the
    (bt, n, dim) output projection into out_ref.
    """
    qc = q.astype(compute_dtype)
    kc = k.astype(compute_dtype)
    vc = v.astype(compute_dtype)
    head_outs = []
    # Only the head axis is a Python loop (small unroll); the packed batch
    # dimension is handled by 3-D batched matmuls.
    for h in range(n_head):
        lo = h * hd_pad
        hi = lo + hd_pad
        qh = qc[:, lo:hi].reshape(bt, n, hd_pad)     # 128-aligned lane slice
        kh = kc[:, lo:hi].reshape(bt, m, hd_pad)
        vh = vc[:, lo:hi].reshape(bt, m, hd_pad)
        s = jnp.einsum('bnd,bmd->bnm', qh, kh,
                       preferred_element_type=jnp.float32)           # (bt,n,m)
        s_max = jnp.max(s, axis=-1, keepdims=True)
        p = jnp.exp(s - s_max)                                        # f32
        denom = jnp.sum(p, axis=-1, keepdims=True)
        oh = jnp.einsum('bnm,bmd->bnd', p.astype(compute_dtype), vh,
                        preferred_element_type=jnp.float32)           # (bt,n,hd_pad)
        # Deferred softmax normalization on the (n, hd_pad) output.
        if approx_recip:
            oh = oh * pl.reciprocal(denom, approx=True)
        else:
            oh = oh / denom
        head_outs.append(oh.reshape(bt * n, hd_pad))
    o = head_outs[0] if n_head == 1 else jnp.concatenate(head_outs, axis=-1)
    y = jnp.dot(o.astype(compute_dtype), wo,
                preferred_element_type=jnp.float32) + bo              # (bt*n, dim)
    out_ref[...] = y.reshape(out_ref.shape).astype(out_ref.dtype)


def _cross_attn_kernel(fr_ref, to_ref, wq_ref, wkv_ref, wo_ref, bo_ref, out_ref,
                       *, n_head, hd_pad, compute_dtype, approx_recip):
    bt, n, dim = fr_ref.shape
    _, m, _ = to_ref.shape
    inner_pad = n_head * hd_pad

    x_fr = fr_ref[...].reshape(bt * n, dim)          # already compute_dtype
    x_to = to_ref[...].reshape(bt * m, dim)

    q = jnp.dot(x_fr, wq_ref[...], preferred_element_type=jnp.float32)
    kv = jnp.dot(x_to, wkv_ref[...], preferred_element_type=jnp.float32)
    k = kv[:, :inner_pad]
    v = kv[:, inner_pad:]
    _attention_body(q, k, v, wo_ref[...], bo_ref[...], out_ref,
                    bt=bt, n=n, m=m, n_head=n_head, hd_pad=hd_pad,
                    compute_dtype=compute_dtype, approx_recip=approx_recip)


def _self_attn_kernel(x_ref, wqkv_ref, wo_ref, bo_ref, out_ref, *,
                      n_head, hd_pad, compute_dtype, approx_recip):
    bt, n, dim = x_ref.shape
    inner_pad = n_head * hd_pad

    x = x_ref[...].reshape(bt * n, dim)
    qkv = jnp.dot(x, wqkv_ref[...], preferred_element_type=jnp.float32)
    q = qkv[:, :inner_pad]
    k = qkv[:, inner_pad:2 * inner_pad]
    v = qkv[:, 2 * inner_pad:]
    _attention_body(q, k, v, wo_ref[...], bo_ref[...], out_ref,
                    bt=bt, n=n, m=n, n_head=n_head, hd_pad=hd_pad,
                    compute_dtype=compute_dtype, approx_recip=approx_recip)


def _tpu_generation():
    """Returns (vmem_capacity_bytes, multi_tensorcore) with a conservative
    fallback (v7x-like: 64 MiB VMEM, 2 TensorCores)."""
    vmem_cap = 64 * 1024 * 1024
    multi_tc = True
    try:
        kind = jax.devices()[0].device_kind.lower()
    except Exception:
        kind = ""
    if ("v6" in kind) or ("v5 lite" in kind) or ("v5e" in kind) or ("v5lite" in kind):
        vmem_cap, multi_tc = 128 * 1024 * 1024, False    # v5e / v6e: 1 TC, 128 MiB
    elif ("v4" in kind) or ("v5p" in kind) or ("v5" in kind):
        vmem_cap, multi_tc = 128 * 1024 * 1024, True     # megacore 128 MiB parts
    return vmem_cap, multi_tc


def _pick_block_b(batch, n, m, dim, inner_pad, hd_pad, act_item, w_item,
                  out_item, *, max_rows, vmem_budget, min_grid_steps):
    """Largest divisor of batch packing bt*N rows per matmul under VMEM /
    row / grid-length constraints. Returns (bt, per-step byte estimate)."""
    def est(bt):
        blocks = (2 * bt * n * dim * act_item           # fr block (double-buffered)
                  + 2 * bt * m * dim * act_item         # to block
                  + 2 * bt * n * dim * out_item)        # output block
        weights = w_item * (3 * dim * inner_pad + inner_pad * dim) + 4 * dim
        inter = 4 * (bt * n * 3 * inner_pad             # q (+ head-concat output)
                     + bt * m * 2 * inner_pad           # k, v
                     + 2 * bt * n * m                   # logits / probs
                     + bt * n * hd_pad)                 # per-head output
        return blocks + weights + inter

    req_steps = min(min_grid_steps, batch)
    best = 1
    for bt in range(1, batch + 1):
        if batch % bt:
            continue
        if batch // bt < req_steps:
            continue
        if bt * max(n, m) > max_rows:
            continue
        if 2 * est(bt) > vmem_budget:
            continue
        best = bt
    return best, est(best)


def attention_pallas(fr, to, params, n_head, head_dim, *,
                     compute_dtype=jnp.bfloat16):
    """fr: (B, N, dim); to: (B, M, dim) or None (self-attention). -> (B, N, dim)."""
    B, N, dim = fr.shape
    inner = n_head * head_dim
    scale = head_dim ** (-0.5)
    self_attn = to is None
    M = N if self_attn else to.shape[1]
    out_dtype = fr.dtype

    # Pad head_dim up to a multiple of 128 so every per-head column group is a
    # 128-lane-aligned static slice inside the kernel.
    hd_pad = head_dim if head_dim % 128 == 0 else ((head_dim + 127) // 128) * 128
    inner_pad = n_head * hd_pad

    def pad_cols(w):     # (dim, nh*head_dim) -> (dim, nh*hd_pad), zero padded
        if hd_pad == head_dim:
            return w
        nh = w.shape[1] // head_dim
        w3 = w.reshape(w.shape[0], nh, head_dim)
        w3 = jnp.pad(w3, ((0, 0), (0, 0), (0, hd_pad - head_dim)))
        return w3.reshape(w.shape[0], nh * hd_pad)

    def pad_rows(w):     # (n_head*head_dim, dim) -> (n_head*hd_pad, dim)
        if hd_pad == head_dim:
            return w
        w3 = w.reshape(n_head, head_dim, w.shape[1])
        w3 = jnp.pad(w3, ((0, 0), (0, hd_pad - head_dim), (0, 0)))
        return w3.reshape(n_head * hd_pad, w.shape[1])

    # nn.Linear weight is (out, in); transpose to (in, out) and fold 1/sqrt(d)
    # into the query projection (host-side, before the compute-dtype cast).
    wq = pad_cols(params["to_q_w"].T * scale).astype(compute_dtype)      # (dim, inner_pad)
    wkv_t = params["to_kv_w"].T                                          # (dim, 2*inner)
    wk = pad_cols(wkv_t[:, :inner]).astype(compute_dtype)
    wv = pad_cols(wkv_t[:, inner:]).astype(compute_dtype)
    wkv = jnp.concatenate([wk, wv], axis=1)                              # (dim, 2*inner_pad)
    wo = pad_rows(params["to_out_w"].T).astype(compute_dtype)            # (inner_pad, dim)
    bo = params["to_out_b"].reshape(1, dim).astype(jnp.float32)          # (1, dim)

    # Cast activations on the host: halves HBM->VMEM DMA bytes when bf16.
    fr_in = fr.astype(compute_dtype)
    to_in = None if self_attn else to.astype(compute_dtype)

    act_item = jnp.dtype(compute_dtype).itemsize
    w_item = act_item
    out_item = jnp.dtype(out_dtype).itemsize

    vmem_cap, multi_tc = _tpu_generation()
    vmem_budget = vmem_cap - 16 * 1024 * 1024        # headroom for compiler scratch
    max_rows = 1024 if vmem_cap >= 128 * 1024 * 1024 else 512
    min_grid_steps = 2 if multi_tc else 1            # keep both TCs busy on v7x

    bt, est = _pick_block_b(B, N, M, dim, inner_pad, hd_pad, act_item, w_item,
                            out_item, max_rows=max_rows,
                            vmem_budget=vmem_budget,
                            min_grid_steps=min_grid_steps)
    grid = (B // bt,)
    vmem_limit = int(min(max(2 * est, 32 * 1024 * 1024), vmem_budget))

    approx_recip = (jnp.dtype(compute_dtype) == jnp.dtype(jnp.bfloat16))

    flops = int(2 * B * (N * dim * inner_pad + M * dim * 2 * inner_pad
                         + 2 * n_head * N * M * hd_pad + N * inner_pad * dim))
    transcendentals = int(B * n_head * N * (M + 1))
    out_shape = jax.ShapeDtypeStruct((B, N, dim), out_dtype)
    out_bytes = B * N * dim * out_item

    compiler_params = pltpu.CompilerParams(
        dimension_semantics=("parallel",),
        vmem_limit_bytes=vmem_limit)

    # Constant-index weight operands are fetched once: single-buffer them.
    def w_spec(shape):
        return pl.BlockSpec(shape, lambda b: (0, 0),
                            pipeline_mode=pl.Buffered(1))

    if self_attn:
        # Fuse q/k/v into one (dim, 3*inner_pad) projection when fr == to.
        wqkv = jnp.concatenate([wq, wkv], axis=1)
        bytes_accessed = int(fr_in.nbytes + wqkv.nbytes + wo.nbytes + bo.nbytes
                             + out_bytes)
        kernel = functools.partial(_self_attn_kernel, n_head=n_head,
                                   hd_pad=hd_pad, compute_dtype=compute_dtype,
                                   approx_recip=approx_recip)
        return pl.pallas_call(
            kernel,
            out_shape=out_shape,
            grid_spec=pltpu.PrefetchScalarGridSpec(
                num_scalar_prefetch=0,
                grid=grid,
                in_specs=[
                    pl.BlockSpec((bt, N, dim), lambda b: (b, 0, 0)),
                    w_spec((dim, 3 * inner_pad)),
                    w_spec((inner_pad, dim)),
                    w_spec((1, dim)),
                ],
                out_specs=pl.BlockSpec((bt, N, dim), lambda b: (b, 0, 0)),
            ),
            compiler_params=compiler_params,
            cost_estimate=pl.CostEstimate(
                flops=flops, transcendentals=transcendentals,
                bytes_accessed=bytes_accessed),
        )(fr_in, wqkv, wo, bo)

    bytes_accessed = int(fr_in.nbytes + to_in.nbytes + wq.nbytes + wkv.nbytes
                         + wo.nbytes + bo.nbytes + out_bytes)
    kernel = functools.partial(_cross_attn_kernel, n_head=n_head, hd_pad=hd_pad,
                               compute_dtype=compute_dtype,
                               approx_recip=approx_recip)
    return pl.pallas_call(
        kernel,
        out_shape=out_shape,
        grid_spec=pltpu.PrefetchScalarGridSpec(
            num_scalar_prefetch=0,
            grid=grid,
            in_specs=[
                pl.BlockSpec((bt, N, dim), lambda b: (b, 0, 0)),
                pl.BlockSpec((bt, M, dim), lambda b: (b, 0, 0)),
                w_spec((dim, inner_pad)),
                w_spec((dim, 2 * inner_pad)),
                w_spec((inner_pad, dim)),
                w_spec((1, dim)),
            ],
            out_specs=pl.BlockSpec((bt, N, dim), lambda b: (b, 0, 0)),
        ),
        compiler_params=compiler_params,
        cost_estimate=pl.CostEstimate(
            flops=flops, transcendentals=transcendentals,
            bytes_accessed=bytes_accessed),
    )(fr_in, to_in, wq, wkv, wo, bo)


def attention_ref(fr, to, params, n_head, head_dim):
    """Pure-JAX reference mirroring the PyTorch forward."""
    if to is None:
        to = fr
    inner = n_head * head_dim
    scale = head_dim ** (-0.5)
    q = fr @ params["to_q_w"].T
    kv = to @ params["to_kv_w"].T
    k, v = kv[..., :inner], kv[..., inner:]

    def split_heads(t):
        b, n, _ = t.shape
        return t.reshape(b, n, n_head, head_dim).transpose(0, 2, 1, 3)

    qh, kh, vh = map(split_heads, (q, k, v))
    dots = jnp.einsum('bhnd,bhmd->bhnm', qh, kh) * scale
    attn = jax.nn.softmax(dots, axis=-1)
    out = jnp.einsum('bhnm,bhmd->bhnd', attn, vh)
    b, h, n, d = out.shape
    out = out.transpose(0, 2, 1, 3).reshape(b, n, h * d)
    return out @ params["to_out_w"].T + params["to_out_b"]


if __name__ == "__main__":
    # Full-precision f32 matmuls for the reference and the f32 validation path.
    jax.config.update("jax_default_matmul_precision", "highest")

    batch, seq, dim = 2, 8, 32
    n_head, head_dim = 4, 8
    inner = n_head * head_dim

    key = jax.random.PRNGKey(0)
    k_fr, k_to, k_wq, k_wkv, k_wo, k_bo = jax.random.split(key, 6)

    fr = jax.random.normal(k_fr, (batch, seq, dim), dtype=jnp.float32)
    to = jax.random.normal(k_to, (batch, seq, dim), dtype=jnp.float32)

    # Deterministic parameter init (PyTorch Linear weight shape: (out, in)).
    params = {
        "to_q_w": 0.05 * jax.random.normal(k_wq, (inner, dim), jnp.float32),
        "to_kv_w": 0.05 * jax.random.normal(k_wkv, (2 * inner, dim), jnp.float32),
        "to_out_w": 0.05 * jax.random.normal(k_wo, (dim, inner), jnp.float32),
        "to_out_b": 0.05 * jax.random.normal(k_bo, (dim,), jnp.float32),
    }

    ref_cross = attention_ref(fr, to, params, n_head, head_dim)

    # Cross-attention, f32 MXU operands (exact softmax normalizer): tight tol.
    out_f32 = jax.block_until_ready(
        attention_pallas(fr, to, params, n_head, head_dim,
                         compute_dtype=jnp.float32))
    assert out_f32.shape == (batch, seq, dim)
    assert jnp.allclose(out_f32, ref_cross, rtol=2e-3, atol=2e-3), \
        "cross-attention (f32) mismatch vs reference"

    # Cross-attention, bf16 MXU operands with f32 accumulation: looser tol.
    out_bf16 = jax.block_until_ready(
        attention_pallas(fr, to, params, n_head, head_dim,
                         compute_dtype=jnp.bfloat16))
    assert jnp.allclose(out_bf16, ref_cross, rtol=3e-2, atol=3e-2), \
        "cross-attention (bf16) mismatch vs reference"

    # Self-attention (to=None): fused single q/k/v projection path.
    out_self = jax.block_until_ready(
        attention_pallas(fr, None, params, n_head, head_dim,
                         compute_dtype=jnp.float32))
    ref_self = attention_ref(fr, None, params, n_head, head_dim)
    assert jnp.allclose(out_self, ref_self, rtol=2e-3, atol=2e-3), \
        "self-attention (f32) mismatch vs reference"

    print("KERNEL_OK")
</pallas_src>

<mosaic_0001>
module attributes {stable_mosaic.version = 11 : i64} {
  func.func @_cross_attn_kernel(%arg0: i32, %arg1: memref<1x8x32xf32, #tpu.memory_space<vmem>>, %arg2: memref<1x8x32xf32, #tpu.memory_space<vmem>>, %arg3: memref<32x512xf32, #tpu.memory_space<vmem>>, %arg4: memref<32x1024xf32, #tpu.memory_space<vmem>>, %arg5: memref<512x32xf32, #tpu.memory_space<vmem>>, %arg6: memref<1x32xf32, #tpu.memory_space<vmem>>, %arg7: memref<1x8x32xf32, #tpu.memory_space<vmem>>) attributes {dimension_semantics = [#tpu.dimension_semantics<parallel>], iteration_bounds = array<i64: 2>, scalar_prefetch = 0 : i64, scratch_operands = 0 : i64, tpu.core_type = #tpu.core_type<tc>, window_params = [{transform_indices = @transform_0, window_bounds = array<i64: 1, 8, 32>}, {transform_indices = @transform_1, window_bounds = array<i64: 1, 8, 32>}, {pipeline_mode = #tpu.pipeline_mode<synchronous>, transform_indices = @transform_2, window_bounds = array<i64: 32, 512>}, {pipeline_mode = #tpu.pipeline_mode<synchronous>, transform_indices = @transform_3, window_bounds = array<i64: 32, 1024>}, {pipeline_mode = #tpu.pipeline_mode<synchronous>, transform_indices = @transform_4, window_bounds = array<i64: 512, 32>}, {pipeline_mode = #tpu.pipeline_mode<synchronous>, transform_indices = @transform_5, window_bounds = array<i64: 1, 32>}, {transform_indices = @transform_6, window_bounds = array<i64: 1, 8, 32>}]} {
    %c0 = arith.constant 0 : index
    %c0_0 = arith.constant 0 : index
    %c0_1 = arith.constant 0 : index
    %0 = vector.load %arg1[%c0, %c0_0, %c0_1] : memref<1x8x32xf32, #tpu.memory_space<vmem>>, vector<1x8x32xf32>
    %1 = vector.shape_cast %0 : vector<1x8x32xf32> to vector<8x32xf32>
    %c0_2 = arith.constant 0 : index
    %c0_3 = arith.constant 0 : index
    %c0_4 = arith.constant 0 : index
    %2 = vector.load %arg2[%c0_2, %c0_3, %c0_4] : memref<1x8x32xf32, #tpu.memory_space<vmem>>, vector<1x8x32xf32>
    %3 = vector.shape_cast %2 : vector<1x8x32xf32> to vector<8x32xf32>
    %c0_5 = arith.constant 0 : index
    %c0_6 = arith.constant 0 : index
    %4 = vector.load %arg3[%c0_5, %c0_6] : memref<32x512xf32, #tpu.memory_space<vmem>>, vector<32x512xf32>
    %cst = arith.constant dense<0.000000e+00> : vector<8x512xf32>
    %5 = tpu.matmul %1, %4, %cst {dimension_numbers = #tpu.dot_dimension_numbers<[1], [0], [0], [1], [0, 0, 1, 1], [], []>, precision = #tpu.contract_precision<fp32>} : vector<8x32xf32>, vector<32x512xf32>, vector<8x512xf32> -> vector<8x512xf32>
    %c0_7 = arith.constant 0 : index
    %c0_8 = arith.constant 0 : index
    %6 = vector.load %arg4[%c0_7, %c0_8] : memref<32x1024xf32, #tpu.memory_space<vmem>>, vector<32x1024xf32>
    %cst_9 = arith.constant dense<0.000000e+00> : vector<8x1024xf32>
    %7 = tpu.matmul %3, %6, %cst_9 {dimension_numbers = #tpu.dot_dimension_numbers<[1], [0], [0], [1], [0, 0, 1, 1], [], []>, precision = #tpu.contract_precision<fp32>} : vector<8x32xf32>, vector<32x1024xf32>, vector<8x1024xf32> -> vector<8x1024xf32>
    %8 = vector.extract_strided_slice %7 {offsets = [0, 0], sizes = [8, 512], strides = [1, 1]} : vector<8x1024xf32> to vector<8x512xf32>
    %9 = vector.extract_strided_slice %7 {offsets = [0, 512], sizes = [8, 512], strides = [1, 1]} : vector<8x1024xf32> to vector<8x512xf32>
    %c0_10 = arith.constant 0 : index
    %c0_11 = arith.constant 0 : index
    %10 = vector.load %arg5[%c0_10, %c0_11] : memref<512x32xf32, #tpu.memory_space<vmem>>, vector<512x32xf32>
    %c0_12 = arith.constant 0 : index
    %c0_13 = arith.constant 0 : index
    %11 = vector.load %arg6[%c0_12, %c0_13] : memref<1x32xf32, #tpu.memory_space<vmem>>, vector<1x32xf32>
    %12 = vector.extract_strided_slice %5 {offsets = [0, 0], sizes = [8, 128], strides = [1, 1]} : vector<8x512xf32> to vector<8x128xf32>
    %13 = vector.shape_cast %12 : vector<8x128xf32> to vector<1x8x128xf32>
    %14 = vector.extract_strided_slice %8 {offsets = [0, 0], sizes = [8, 128], strides = [1, 1]} : vector<8x512xf32> to vector<8x128xf32>
    %15 = vector.shape_cast %14 : vector<8x128xf32> to vector<1x8x128xf32>
    %16 = vector.extract_strided_slice %9 {offsets = [0, 0], sizes = [8, 128], strides = [1, 1]} : vector<8x512xf32> to vector<8x128xf32>
    %17 = vector.shape_cast %16 : vector<8x128xf32> to vector<1x8x128xf32>
    "tpu.trace_start"() <{level = 10 : i32, message = "bnd,bmd->bnm"}> : () -> ()
    %cst_14 = arith.constant dense<0.000000e+00> : vector<1x8x8xf32>
    %18 = tpu.matmul %13, %15, %cst_14 {dimension_numbers = #tpu.dot_dimension_numbers<[2], [2], [1], [1], [0, 0, 0, 1, 1, 1], [0], [0]>, precision = #tpu.contract_precision<fp32>} : vector<1x8x128xf32>, vector<1x8x128xf32>, vector<1x8x8xf32> -> vector<1x8x8xf32>
    "tpu.trace_stop"() : () -> ()
    %cst_15 = arith.constant dense<0xFF800000> : vector<1x8xf32>
    %19 = vector.multi_reduction <maximumf>, %18, %cst_15 [2] : vector<1x8x8xf32> to vector<1x8xf32>
    %20 = vector.shape_cast %19 : vector<1x8xf32> to vector<1x8x1xf32>
    %21 = vector.broadcast %20 : vector<1x8x1xf32> to vector<1x8x8xf32>
    %22 = arith.subf %18, %21 : vector<1x8x8xf32>
    %23 = math.exp %22 : vector<1x8x8xf32>
    %cst_16 = arith.constant dense<0.000000e+00> : vector<1x8xf32>
    %24 = vector.multi_reduction <add>, %23, %cst_16 [2] : vector<1x8x8xf32> to vector<1x8xf32>
    %25 = vector.shape_cast %24 : vector<1x8xf32> to vector<1x8x1xf32>
    "tpu.trace_start"() <{level = 10 : i32, message = "bnm,bmd->bnd"}> : () -> ()
    %cst_17 = arith.constant dense<0.000000e+00> : vector<1x8x128xf32>
    %26 = tpu.matmul %23, %17, %cst_17 {dimension_numbers = #tpu.dot_dimension_numbers<[2], [1], [1], [2], [0, 0, 0, 1, 1, 2], [0], [0]>, precision = #tpu.contract_precision<fp32>} : vector<1x8x8xf32>, vector<1x8x128xf32>, vector<1x8x128xf32> -> vector<1x8x128xf32>
    "tpu.trace_stop"() : () -> ()
    %27 = vector.broadcast %25 : vector<1x8x1xf32> to vector<1x8x128xf32>
    %28 = arith.divf %26, %27 : vector<1x8x128xf32>
    %29 = vector.shape_cast %28 : vector<1x8x128xf32> to vector<8x128xf32>
    %30 = vector.extract_strided_slice %5 {offsets = [0, 128], sizes = [8, 128], strides = [1, 1]} : vector<8x512xf32> to vector<8x128xf32>
    %31 = vector.shape_cast %30 : vector<8x128xf32> to vector<1x8x128xf32>
    %32 = vector.extract_strided_slice %8 {offsets = [0, 128], sizes = [8, 128], strides = [1, 1]} : vector<8x512xf32> to vector<8x128xf32>
    %33 = vector.shape_cast %32 : vector<8x128xf32> to vector<1x8x128xf32>
    %34 = vector.extract_strided_slice %9 {offsets = [0, 128], sizes = [8, 128], strides = [1, 1]} : vector<8x512xf32> to vector<8x128xf32>
    %35 = vector.shape_cast %34 : vector<8x128xf32> to vector<1x8x128xf32>
    "tpu.trace_start"() <{level = 10 : i32, message = "bnd,bmd->bnm"}> : () -> ()
    %cst_18 = arith.constant dense<0.000000e+00> : vector<1x8x8xf32>
    %36 = tpu.matmul %31, %33, %cst_18 {dimension_numbers = #tpu.dot_dimension_numbers<[2], [2], [1], [1], [0, 0, 0, 1, 1, 1], [0], [0]>, precision = #tpu.contract_precision<fp32>} : vector<1x8x128xf32>, vector<1x8x128xf32>, vector<1x8x8xf32> -> vector<1x8x8xf32>
    "tpu.trace_stop"() : () -> ()
    %cst_19 = arith.constant dense<0xFF800000> : vector<1x8xf32>
    %37 = vector.multi_reduction <maximumf>, %36, %cst_19 [2] : vector<1x8x8xf32> to vector<1x8xf32>
    %38 = vector.shape_cast %37 : vector<1x8xf32> to vector<1x8x1xf32>
    %39 = vector.broadcast %38 : vector<1x8x1xf32> to vector<1x8x8xf32>
    %40 = arith.subf %36, %39 : vector<1x8x8xf32>
    %41 = math.exp %40 : vector<1x8x8xf32>
    %cst_20 = arith.constant dense<0.000000e+00> : vector<1x8xf32>
    %42 = vector.multi_reduction <add>, %41, %cst_20 [2] : vector<1x8x8xf32> to vector<1x8xf32>
    %43 = vector.shape_cast %42 : vector<1x8xf32> to vector<1x8x1xf32>
    "tpu.trace_start"() <{level = 10 : i32, message = "bnm,bmd->bnd"}> : () -> ()
    %cst_21 = arith.constant dense<0.000000e+00> : vector<1x8x128xf32>
    %44 = tpu.matmul %41, %35, %cst_21 {dimension_numbers = #tpu.dot_dimension_numbers<[2], [1], [1], [2], [0, 0, 0, 1, 1, 2], [0], [0]>, precision = #tpu.contract_precision<fp32>} : vector<1x8x8xf32>, vector<1x8x128xf32>, vector<1x8x128xf32> -> vector<1x8x128xf32>
    "tpu.trace_stop"() : () -> ()
    %45 = vector.broadcast %43 : vector<1x8x1xf32> to vector<1x8x128xf32>
    %46 = arith.divf %44, %45 : vector<1x8x128xf32>
    %47 = vector.shape_cast %46 : vector<1x8x128xf32> to vector<8x128xf32>
    %48 = vector.extract_strided_slice %5 {offsets = [0, 256], sizes = [8, 128], strides = [1, 1]} : vector<8x512xf32> to vector<8x128xf32>
    %49 = vector.shape_cast %48 : vector<8x128xf32> to vector<1x8x128xf32>
    %50 = vector.extract_strided_slice %8 {offsets = [0, 256], sizes = [8, 128], strides = [1, 1]} : vector<8x512xf32> to vector<8x128xf32>
    %51 = vector.shape_cast %50 : vector<8x128xf32> to vector<1x8x128xf32>
    %52 = vector.extract_strided_slice %9 {offsets = [0, 256], sizes = [8, 128], strides = [1, 1]} : vector<8x512xf32> to vector<8x128xf32>
    %53 = vector.shape_cast %52 : vector<8x128xf32> to vector<1x8x128xf32>
    "tpu.trace_start"() <{level = 10 : i32, message = "bnd,bmd->bnm"}> : () -> ()
    %cst_22 = arith.constant dense<0.000000e+00> : vector<1x8x8xf32>
    %54 = tpu.matmul %49, %51, %cst_22 {dimension_numbers = #tpu.dot_dimension_numbers<[2], [2], [1], [1], [0, 0, 0, 1, 1, 1], [0], [0]>, precision = #tpu.contract_precision<fp32>} : vector<1x8x128xf32>, vector<1x8x128xf32>, vector<1x8x8xf32> -> vector<1x8x8xf32>
    "tpu.trace_stop"() : () -> ()
    %cst_23 = arith.constant dense<0xFF800000> : vector<1x8xf32>
    %55 = vector.multi_reduction <maximumf>, %54, %cst_23 [2] : vector<1x8x8xf32> to vector<1x8xf32>
    %56 = vector.shape_cast %55 : vector<1x8xf32> to vector<1x8x1xf32>
    %57 = vector.broadcast %56 : vector<1x8x1xf32> to vector<1x8x8xf32>
    %58 = arith.subf %54, %57 : vector<1x8x8xf32>
    %59 = math.exp %58 : vector<1x8x8xf32>
    %cst_24 = arith.constant dense<0.000000e+00> : vector<1x8xf32>
    %60 = vector.multi_reduction <add>, %59, %cst_24 [2] : vector<1x8x8xf32> to vector<1x8xf32>
    %61 = vector.shape_cast %60 : vector<1x8xf32> to vector<1x8x1xf32>
    "tpu.trace_start"() <{level = 10 : i32, message = "bnm,bmd->bnd"}> : () -> ()
    %cst_25 = arith.constant dense<0.000000e+00> : vector<1x8x128xf32>
    %62 = tpu.matmul %59, %53, %cst_25 {dimension_numbers = #tpu.dot_dimension_numbers<[2], [1], [1], [2], [0, 0, 0, 1, 1, 2], [0], [0]>, precision = #tpu.contract_precision<fp32>} : vector<1x8x8xf32>, vector<1x8x128xf32>, vector<1x8x128xf32> -> vector<1x8x128xf32>
    "tpu.trace_stop"() : () -> ()
    %63 = vector.broadcast %61 : vector<1x8x1xf32> to vector<1x8x128xf32>
    %64 = arith.divf %62, %63 : vector<1x8x128xf32>
    %65 = vector.shape_cast %64 : vector<1x8x128xf32> to vector<8x128xf32>
    %66 = vector.extract_strided_slice %5 {offsets = [0, 384], sizes = [8, 128], strides = [1, 1]} : vector<8x512xf32> to vector<8x128xf32>
    %67 = vector.shape_cast %66 : vector<8x128xf32> to vector<1x8x128xf32>
    %68 = vector.extract_strided_slice %8 {offsets = [0, 384], sizes = [8, 128], strides = [1, 1]} : vector<8x512xf32> to vector<8x128xf32>
    %69 = vector.shape_cast %68 : vector<8x128xf32> to vector<1x8x128xf32>
    %70 = vector.extract_strided_slice %9 {offsets = [0, 384], sizes = [8, 128], strides = [1, 1]} : vector<8x512xf32> to vector<8x128xf32>
    %71 = vector.shape_cast %70 : vector<8x128xf32> to vector<1x8x128xf32>
    "tpu.trace_start"() <{level = 10 : i32, message = "bnd,bmd->bnm"}> : () -> ()
    %cst_26 = arith.constant dense<0.000000e+00> : vector<1x8x8xf32>
    %72 = tpu.matmul %67, %69, %cst_26 {dimension_numbers = #tpu.dot_dimension_numbers<[2], [2], [1], [1], [0, 0, 0, 1, 1, 1], [0], [0]>, precision = #tpu.contract_precision<fp32>} : vector<1x8x128xf32>, vector<1x8x128xf32>, vector<1x8x8xf32> -> vector<1x8x8xf32>
    "tpu.trace_stop"() : () -> ()
    %cst_27 = arith.constant dense<0xFF800000> : vector<1x8xf32>
    %73 = vector.multi_reduction <maximumf>, %72, %cst_27 [2] : vector<1x8x8xf32> to vector<1x8xf32>
    %74 = vector.shape_cast %73 : vector<1x8xf32> to vector<1x8x1xf32>
    %75 = vector.broadcast %74 : vector<1x8x1xf32> to vector<1x8x8xf32>
    %76 = arith.subf %72, %75 : vector<1x8x8xf32>
    %77 = math.exp %76 : vector<1x8x8xf32>
    %cst_28 = arith.constant dense<0.000000e+00> : vector<1x8xf32>
    %78 = vector.multi_reduction <add>, %77, %cst_28 [2] : vector<1x8x8xf32> to vector<1x8xf32>
    %79 = vector.shape_cast %78 : vector<1x8xf32> to vector<1x8x1xf32>
    "tpu.trace_start"() <{level = 10 : i32, message = "bnm,bmd->bnd"}> : () -> ()
    %cst_29 = arith.constant dense<0.000000e+00> : vector<1x8x128xf32>
    %80 = tpu.matmul %77, %71, %cst_29 {dimension_numbers = #tpu.dot_dimension_numbers<[2], [1], [1], [2], [0, 0, 0, 1, 1, 2], [0], [0]>, precision = #tpu.contract_precision<fp32>} : vector<1x8x8xf32>, vector<1x8x128xf32>, vector<1x8x128xf32> -> vector<1x8x128xf32>
    "tpu.trace_stop"() : () -> ()
    %81 = vector.broadcast %79 : vector<1x8x1xf32> to vector<1x8x128xf32>
    %82 = arith.divf %80, %81 : vector<1x8x128xf32>
    %83 = vector.shape_cast %82 : vector<1x8x128xf32> to vector<8x128xf32>
    %84 = tpu.concatenate %29, %47, %65, %83 in 1 : vector<8x128xf32>, vector<8x128xf32>, vector<8x128xf32>, vector<8x128xf32> -> vector<8x512xf32>
    %cst_30 = arith.constant dense<0.000000e+00> : vector<8x32xf32>
    %85 = tpu.matmul %84, %10, %cst_30 {dimension_numbers = #tpu.dot_dimension_numbers<[1], [0], [0], [1], [0, 0, 1, 1], [], []>, precision = #tpu.contract_precision<fp32>} : vector<8x512xf32>, vector<512x32xf32>, vector<8x32xf32> -> vector<8x32xf32>
    %86 = vector.broadcast %11 : vector<1x32xf32> to vector<8x32xf32>
    %87 = arith.addf %85, %86 : vector<8x32xf32>
    %88 = vector.shape_cast %87 : vector<8x32xf32> to vector<1x8x32xf32>
    %c0_31 = arith.constant 0 : index
    %c0_32 = arith.constant 0 : index
    %c0_33 = arith.constant 0 : index
    %89 = vector.load %arg7[%c0_31, %c0_32, %c0_33] : memref<1x8x32xf32, #tpu.memory_space<vmem>>, vector<1x8x32xf32>
    tpu.vector_store %arg7[%c0_31, %c0_32, %c0_33], %88 {strides = array<i32>} : memref<1x8x32xf32, #tpu.memory_space<vmem>>, vector<1x8x32xf32>,
    return
  }
  func.func @transform_0(%arg0: i32) -> (i32, i32, i32) {
    %c0_i32 = arith.constant 0 : i32
    %c0_i32_0 = arith.constant 0 : i32
    %c0_i32_1 = arith.constant 0 : i32
    return %arg0, %c0_i32, %c0_i32_0 : i32, i32, i32
  }
  func.func @transform_1(%arg0: i32) -> (i32, i32, i32) {
    %c0_i32 = arith.constant 0 : i32
    %c0_i32_0 = arith.constant 0 : i32
    %c0_i32_1 = arith.constant 0 : i32
    return %arg0, %c0_i32, %c0_i32_0 : i32, i32, i32
  }
  func.func @transform_2(%arg0: i32) -> (i32, i32) {
    %c0_i32 = arith.constant 0 : i32
    %c0_i32_0 = arith.constant 0 : i32
    %c0_i32_1 = arith.constant 0 : i32
    return %c0_i32, %c0_i32_0 : i32, i32
  }
  func.func @transform_3(%arg0: i32) -> (i32, i32) {
    %c0_i32 = arith.constant 0 : i32
    %c0_i32_0 = arith.constant 0 : i32
    %c0_i32_1 = arith.constant 0 : i32
    return %c0_i32, %c0_i32_0 : i32, i32
  }
  func.func @transform_4(%arg0: i32) -> (i32, i32) {
    %c0_i32 = arith.constant 0 : i32
    %c0_i32_0 = arith.constant 0 : i32
    %c0_i32_1 = arith.constant 0 : i32
    return %c0_i32, %c0_i32_0 : i32, i32
  }
  func.func @transform_5(%arg0: i32) -> (i32, i32) {
    %c0_i32 = arith.constant 0 : i32
    %c0_i32_0 = arith.constant 0 : i32
    %c0_i32_1 = arith.constant 0 : i32
    return %c0_i32, %c0_i32_0 : i32, i32
  }
  func.func @transform_6(%arg0: i32) -> (i32, i32, i32) {
    %c0_i32 = arith.constant 0 : i32
    %c0_i32_0 = arith.constant 0 : i32
    %c0_i32_1 = arith.constant 0 : i32
    return %arg0, %c0_i32, %c0_i32_0 : i32, i32, i32
  }
}

</mosaic_0001>

<bundles_post_ra>
// kernel: tpu_custom_call.1
= control target key start
LH: loop header
LB: loop body
LE: loop exit
PB: predicated region body
PF: predicated region fallthrough
CT: control target
= control target key end

     0   :  { %11 = vsyncpa [#allocation3], 0  ;;  %s13331_s0 = inlined_call_operand.vmem [shape: f32[2,8,32], index: 0, kind: input, shape index: {}]   ;;  %s13332_s1 = inlined_call_operand.vmem [shape: f32[2,8,32], index: 1, kind: input, shape index: {}]   ;;  %s13333_s2 = inlined_call_operand.vmem [shape: f32[32,512], index: 2, kind: input, shape index: {}]   ;;  %s13334_s3 = inlined_call_operand.vmem [shape: f32[32,1024], index: 3, kind: input, shape index: {}]   ;;  %s13335_s4 = inlined_call_operand.vmem [shape: f32[512,32], index: 4, kind: input, shape index: {}]   ;;  %s13336_s5 = inlined_call_operand.vmem [shape: f32[1,32], index: 5, kind: input, shape index: {}]   ;;  %s13337_s6 = inlined_call_operand.hbm [shape: f32[2,8,32], index: 6, kind: output, shape index: {}]  }
   0x1   :  { %13 = vsyncpa [#allocation3 + $0x1], 0  ;;  %s10824_s21 = smov 0   ;;  %s10826_s22 = smov 0  }
   0x2   :  { %s10828_s23 = smov 0   ;;  %s10830_s24 = smov 0  }
   0x3 LB: > { %s10845_s25 = sadd.s32 4294967295, %s10784_s24   ;;  %s9085_s26 = sadd.s32 4294967294, %s10784_s24   ;;  %s10784_s24 = sphi %s10830_s24, %s13692_s24   ;;  %s10780_s23 = sphi %s10828_s23, %s13691_s23   ;;  %s10776_s22 = sphi %s10826_s22, %s13690_s22   ;;  %s10772_s21 = sphi %s10824_s21, %s13689_s21  }
   0x4   : > { %s10849_s27 = sadd.s32 1, %s10784_s24   ;;  %s162_s28 = sadd.s32 1, %s10780_s23 }
   0x5   : > { %s159_s29 = ssub.s32 %s10784_s24, %s10849_s27  ;;  %p172_p0 = scmp.ne.s32.totalorder %s10780_s23, %s10776_s22 }
   0x6   : > { %p160_p1 = scmp.eq.s32.totalorder %s159_s29, 0  ;;  %p173_p2 = scmp.eq.s32.totalorder %s10845_s25, 1 }
   0x7   : > { %p178_p3 = scmp.ne.s32.totalorder %s10776_s22, %s10772_s21  ;;  %p179_p4 = scmp.eq.s32.totalorder %s9085_s26, 1 }
   0x8   : > { %s10860_s30 = scalar_select %p160_p1, %s10780_s23, %s162_s28  }
   0x9   : > { %p10862_p5 = por %p173_p2, %p172_p0  ;;  %p10866_p6 = por %p179_p4, %p178_p3 }
   0xa   : > { %p9088_p7 = scmp.ge.s32.totalorder %s10784_s24, 1  ;;  %p223_p8 = scmp.lt.s32.totalorder %s10784_s24, 3 }
   0xc   : > { %p224_p9 = pnand %p9088_p7, %p223_p8 }
   0xe   : > { %227 = sbr.rel (%p224_p9) target bundleno = 1473 (0x5c1), region = 44 }
  0x15   : > { %v267_v0 = vld [vmem:[%s13333_s2 + $0x8] sm:$0xff]  ;;  %v266_v2 = vld [vmem:[%s13333_s2] sm:$0xff]  ;;  %p256_p10 = scmp.lt.s32.totalorder %s10845_s25, 1  ;;  %vm282_vm0 = vcmask 261120   ;;  %v10786_v9 = vmov 0.0   ;;  %v269_v58 = vld [vmem:[%s13333_s2 + $0x18] sm:$0xff] }
  0x16   : > { %v271_v1 = vld [vmem:[%s13333_s2 + $0x28] sm:$0xff]  ;;  %v286_v3 = vand.u32 4294901760, %v267_v0  ;;  %v270_v5 = vld [vmem:[%s13333_s2 + $0x20] sm:$0xff]  ;;  %v288_v6 = vand.u32 4294901760, %v266_v2  ;;  %358 = vmatprep.mubr.f32.mxu0 %v10786_v9  ;;  %901 = vmatprep.mubr.f32.mxu1 %v10786_v9  ;;  %v273_v62 = vld [vmem:[%s13333_s2 + $0x38] sm:$0xff]  ;;  %vm10787_vm1 = vmmov 0  }
  0x17   : > { %v290_v4 = vand.u32 4294901760, %v271_v1  ;;  %v275_v7 = vld [vmem:[%s13333_s2 + $0x48] sm:$0xff]  ;;  %v292_v10 = vand.u32 4294901760, %v270_v5  ;;  %v274_v13 = vld [vmem:[%s13333_s2 + $0x40] sm:$0xff]  ;;  %s10902_s10 = scalar_select %p256_p10, %s10845_s25, 1  ;;  %vm4090_vm2 = vcmask 64512  }
  0x18   : > { %v279_v8 = vld [vmem:[%s13333_s2 + $0x68] sm:$0xff]  ;;  %v294_v11 = vand.u32 4294901760, %v275_v7  ;;  %v278_v14 = vld [vmem:[%s13333_s2 + $0x60] sm:$0xff]  ;;  %v10906_v16 = vsub.f32 %v267_v0, %v286_v3  ;;  %v10910_v18 = vsub.f32 %v266_v2, %v288_v6  ;;  %v296_v24 = vand.u32 4294901760, %v274_v13  ;;  %s9094_s28 = sshll.u32 %s10845_s25, 7  ;;  %s10788_s25 = smov [#allocation2]  }
  0x19   : > { %v298_v12 = vand.u32 4294901760, %v279_v8  ;;  %v10904_v15 = vpack.c.bf16 %v290_v4, %v286_v3  ;;  %v10908_v17 = vsub.f32 %v271_v1, %v290_v4  ;;  %v10912_v19 = vpack.c.bf16 %v292_v10, %v288_v6  ;;  %s9090_s11 = sshll.u32 %s10902_s10, 3  ;;  %v268_v1 = vld [vmem:[%s13333_s2 + $0x10] sm:$0xff]  ;;  %s13288_s12 = scalar_lea.hbm %s13337_s6, %s9094_s28 }
  0x1a   : > { %v10914_v20 = vsub.f32 %v270_v5, %v292_v10  ;;  %v10918_v22 = vsub.f32 %v275_v7, %v294_v11  ;;  %v300_v25 = vand.u32 4294901760, %v278_v14  ;;  %v372_v26 = vand.u32 4294901760, %v10906_v16  ;;  %s259_s14 = scalar_lea.vmem %s13331_s0, %s9090_s11  ;;  %v272_v3 = vld [vmem:[%s13333_s2 + $0x30] sm:$0xff]  ;;  %v277_v7 = vld [vmem:[%s13333_s2 + $0x58] sm:$0xff]  ;;  %s263_s20 = scalar_lea.vmem %s13332_s1, %s9090_s11 }
  0x1b   : > { %v10916_v21 = vpack.c.bf16 %v298_v12, %v294_v11  ;;  %9854 = vmatprep.subr.bf16.mxu0 %v10904_v15  ;;  %v10922_v23 = vsub.f32 %v279_v8, %v298_v12  ;;  %v384_v27 = vand.u32 4294901760, %v10908_v17  ;;  %v264_v28 = vld [vmem:[%s259_s14] sm:$0xff]  ;;  %v378_v29 = vand.u32 4294901760, %v10910_v18  ;;  %v281_v12 = vld [vmem:[%s13333_s2 + $0x78] sm:$0xff]  ;;  %s10726_s15 = sshll.u32 %s10788_s25, 4  ;;  %s10727_s15 = int_to_ptr.vmem [resolvable:$false] %s10726_s15 }
  0x1c   : > { %9856 = vmatpush1.bf16.msra.mxu0 %v10912_v19  ;;  %v390_v30 = vand.u32 4294901760, %v10914_v20  ;;  %v396_v31 = vand.u32 4294901760, %v10918_v22  ;;  %v10936_v32 = vpack.c.bf16 %v300_v25, %v296_v24  ;;  %v10938_v33 = vsub.f32 %v274_v13, %v296_v24  ;;  %v276_v24 = vld [vmem:[%s13333_s2 + $0x50] sm:$0xff]  ;;  %s10728_s16 = scalar_lea.vmem %s10727_s15, 256 }
  0x1d   : > { %9858 = vmatprep.subr.bf16.mxu0 %v10916_v21  ;;  %v373_v34 = vsub.f32 %v10906_v16, %v372_v26  ;;  %v10943_v35 = vsub.f32 %v278_v14, %v300_v25  ;;  %v385_v36 = vsub.f32 %v10908_v17, %v384_v27  ;;  %v284_v37 = vsel %vm282_vm0, %v264_v28, 0  ;;  %v280_v25 = vld [vmem:[%s13333_s2 + $0x70] sm:$0xff] }
  0x1e   : > { %v379_v38 = vsub.f32 %v10910_v18, %v378_v29  ;;  %v10952_v40 = vand.u32 4294901760, %v284_v37  ;;  %v391_v41 = vsub.f32 %v10914_v20, %v390_v30  ;;  %v397_v43 = vsub.f32 %v10918_v22, %v396_v31 }
  0x1f   : > { %v374_v39 = vand.u32 4294901760, %v373_v34  ;;  %v386_v42 = vand.u32 4294901760, %v385_v36  ;;  %v408_v44 = vand.u32 4294901760, %v10922_v23  ;;  %v402_v47 = vand.u32 4294901760, %v10938_v33 }
  0x20   : > { %9860 = vmatpush1.bf16.msra.mxu0 %v10936_v32  ;;  %v10963_v45 = vsub.f32 %v284_v37, %v10952_v40  ;;  %v380_v46 = vand.u32 4294901760, %v379_v38  ;;  %v392_v49 = vand.u32 4294901760, %v391_v41  ;;  %v414_v51 = vand.u32 4294901760, %v10943_v35 }
  0x21   : > { %v9861_v48 = vpack.c.bf16 %v386_v42, %v374_v39  ;;  %v409_v50 = vsub.f32 %v10922_v23, %v408_v44  ;;  %v398_v53 = vand.u32 4294901760, %v397_v43  ;;  %v403_v54 = vsub.f32 %v10938_v33, %v402_v47 }
  0x22   : > { %v10971_v52 = vand.u32 4294901760, %v10963_v45  ;;  %v415_v56 = vsub.f32 %v10943_v35, %v414_v51  ;;  %v9863_v59 = vpack.c.bf16 %v392_v49, %v380_v46  ;;  %v829_v2 = vand.u32 4294901760, %v269_v58 }
  0x23   : > { %9862 = vmatprep.subr.bf16.mxu0 %v9861_v48  ;;  %v410_v55 = vand.u32 4294901760, %v409_v50  ;;  %v404_v60 = vand.u32 4294901760, %v403_v54  ;;  %v833_v4 = vand.u32 4294901760, %v273_v62  ;;  %v831_v6 = vand.u32 4294901760, %v268_v1 }
  0x24   : > { %v362_v57 = vsub.f32 %v10963_v45, %v10971_v52  ;;  %v416_v61 = vand.u32 4294901760, %v415_v56  ;;  %v9869_v8 = vpack.c.bf16 %v10908_v17, %v10906_v16  ;;  %v835_v11 = vand.u32 4294901760, %v272_v3 }
  0x25   : > { %v9865_v0 = vpack.c.bf16 %v410_v55, %v398_v53  ;;  %v10999_v10 = vpack.c.bf16 %v833_v4, %v829_v2  ;;  %v837_v14 = vand.u32 4294901760, %v277_v7  ;;  %v9871_v28 = vpack.c.bf16 %v10914_v20, %v10910_v18  ;;  %v265_v18 = vld [vmem:[%s263_s20] sm:$0xff]  ;;  %s253_s20 = sand.u32 1, %s10776_s22  }
  0x26   : > { %v363_v63 = vand.u32 4294901760, %v362_v57  ;;  %v9867_v5 = vpack.c.bf16 %v416_v61, %v404_v60  ;;  %v11005_v13 = vpack.c.bf16 %v835_v11, %v831_v6  ;;  %v9873_v34 = vpack.c.bf16 %v10922_v23, %v10918_v22  ;;  %v1397_v22 = vld [vmem:[%s13334_s3 + $0xc8] sm:$0xff]  ;;  %s9089_s26 = sshll.u32 %s253_s20, 3  ;;  %s9001_s13 = scalar_lea.sflag [#allocation3], %s253_s20 }
  0x27   : > { %9902 = vmatprep.subr.bf16.mxu1 %v10999_v10  ;;  %v11017_v36 = vsub.f32 %v269_v58, %v829_v2  ;;  %v841_v37 = vand.u32 4294901760, %v281_v12  ;;  %v11020_v38 = vsub.f32 %v273_v62, %v833_v4  ;;  %v11022_v39 = vsub.f32 %v268_v1, %v831_v6  ;;  %s255_s29 = scalar_lea.vmem [#allocation2], %s9089_s26 }
  0x28   : > { %364 = vmatmul.mubr.f32.vlgmr.msra.gmra.mrb[0].mxu0 %v363_v63  ;;  %9904 = vmatpush1.bf16.msra.mxu1 %v11005_v13  ;;  %v839_v41 = vand.u32 4294901760, %v276_v24  ;;  %v843_v42 = vand.u32 4294901760, %v280_v25  ;;  %v9875_v46 = vpack.c.bf16 %v10943_v35, %v10938_v33  ;;  %v11032_v49 = vsub.f32 %v272_v3, %v835_v11  ;;  %v11085_v11 = vld [vmem:[%s13334_s3 + $0x48] sm:$0xff]  ;;  %v1388_v33 = vld [vmem:[%s13334_s3 + $0x80] sm:$0xff]  ;;  %s9014_s9 = sshll.u32 %s255_s29, 4  ;;  %s13290_s9 = int_to_ptr.vmem [resolvable:$true] %s9014_s9 }
  0x29   : > { %9864 = vmatpush1.bf16.msra.mxu0 %v9863_v59  ;;  %474 = vmatprep.mubr.f32.mxu0 %v10786_v9  ;;  %v11025_v43 = vpack.c.bf16 %v841_v37, %v837_v14  ;;  %v915_v50 = vand.u32 4294901760, %v11017_v36  ;;  %v927_v53 = vand.u32 4294901760, %v11020_v38  ;;  %v921_v54 = vand.u32 4294901760, %v11022_v39  ;;  %v1396_v35 = vld [vmem:[%s13334_s3 + $0xc0] sm:$0xff]  ;;  %s10722_s14 = scalar_lea.vmem %s13290_s9, 128  ;;  %p10729_p0 = scmp.lt.s32.totalorder %s13290_s9, %s10727_s15 }
  0x2a   : > { %9866 = vmatprep.subr.bf16.mxu0 %v9865_v0  ;;  %v11030_v48 = vpack.c.bf16 %v843_v42, %v839_v41  ;;  %v11042_v56 = vsub.f32 %v277_v7, %v837_v14  ;;  %v11044_v57 = vsub.f32 %v281_v12, %v841_v37  ;;  %v933_v61 = vand.u32 4294901760, %v11032_v49  ;;  %p10723_p11 = scmp.ne.s32.totalorder %s13290_s9, %s10722_s14  ;;  %p10730_p1 = scmp.lt.s32.totalorder %s10728_s16, %s10722_s14 }
  0x2b   : > { %9906 = vmatprep.subr.bf16.mxu1 %v11025_v43  ;;  %v916_v55 = vsub.f32 %v11017_v36, %v915_v50  ;;  %v928_v58 = vsub.f32 %v11020_v38, %v927_v53  ;;  %v922_v59 = vsub.f32 %v11022_v39, %v921_v54  ;;  %v11054_v62 = vsub.f32 %v276_v24, %v839_v41  ;;  %v11103_v24 = vld [vmem:[%s13334_s3] sm:$0xff]  ;;  %v11122_v41 = vld [vmem:[%s13334_s3 + $0x88] sm:$0xff] }
  0x2c   : > { %9908 = vmatpush1.bf16.msra.mxu1 %v11030_v48  ;;  %v11058_v1 = vsub.f32 %v280_v25, %v843_v42  ;;  %v934_v3 = vsub.f32 %v11032_v49, %v933_v61  ;;  %v939_v4 = vand.u32 4294901760, %v11042_v56  ;;  %v9885_v6 = vpack.c.bf16 %v384_v27, %v372_v26  ;;  %v11108_v25 = vld [vmem:[%s13334_s3 + $0x40] sm:$0xff]  ;;  %p10724_p12 = pnand %p10723_p11, %p10862_p5  ;;  %p10731_p2 = por %p10730_p1, %p10729_p0 }
  0x2d   : > { %9868 = vmatpush1.bf16.msra.mxu0 %v9867_v5  ;;  %v917_v60 = vand.u32 4294901760, %v916_v55  ;;  %v929_v0 = vand.u32 4294901760, %v928_v58  ;;  %v923_v2 = vand.u32 4294901760, %v922_v59  ;;  %v951_v5 = vand.u32 4294901760, %v11044_v57 }
  0x2e   : > { %9870 = vmatprep.subr.bf16.mxu0 %v9869_v8  ;;  %v935_v7 = vand.u32 4294901760, %v934_v3  ;;  %v11080_v8 = vld [vmem:[%s13334_s3 + $0x8] sm:$0xff]  ;;  %v940_v16 = vsub.f32 %v11042_v56, %v939_v4  ;;  %v945_v26 = vand.u32 4294901760, %v11054_v62  ;;  %v957_v12 = vand.u32 4294901760, %v11058_v1  ;;  %p10725_p13 = pneg %p10724_p12 }
  0x2f   : > { %907 = vmatmul.mubr.f32.vlgmr.msra.gmra.mrb[0].mxu1 %v363_v63  ;;  %v9909_v63 = vpack.c.bf16 %v929_v0, %v917_v60  ;;  %v952_v17 = vsub.f32 %v11044_v57, %v951_v5  ;;  %v9887_v14 = vpack.c.bf16 %v390_v30, %v378_v29  ;;  %v9889_v20 = vpack.c.bf16 %v408_v44, %v396_v31 }
  0x30   : > { %476 = vmatmul.mubr.f32.vlgmr.msra.gmra.mrb[0].mxu0 %v10952_v40  ;;  %1017 = vmatprep.mubr.f32.mxu1 %v10786_v9  ;;  %v9911_v27 = vpack.c.bf16 %v935_v7, %v923_v2  ;;  %v946_v37 = vsub.f32 %v11054_v62, %v945_v26  ;;  %v1407_v29 = vand.u32 4294901760, %v11080_v8  ;;  %v1411_v30 = vand.u32 4294901760, %v11085_v11  ;;  %p10732_p3 = pnand %p10731_p2, %p10725_p13 }
  0x31   : > { %9872 = vmatpush1.bf16.msra.mxu0 %v9871_v28  ;;  %562 = vmatprep.mubr.f32.mxu0 %v10786_v9  ;;  %v941_v28 = vand.u32 4294901760, %v940_v16  ;;  %v958_v42 = vsub.f32 %v11058_v1, %v957_v12  ;;  %v1409_v44 = vand.u32 4294901760, %v11103_v24  ;;  %v1405_v58 = vsel %vm282_vm0, %v265_v18, 0 }
  0x32   : > { %9874 = vmatprep.subr.bf16.mxu0 %v9873_v34  ;;  %9910 = vmatprep.subr.bf16.mxu1 %v9909_v63  ;;  %v953_v34 = vand.u32 4294901760, %v952_v17  ;;  %v947_v31 = vand.u32 4294901760, %v946_v37  ;;  %v9891_v59 = vpack.c.bf16 %v414_v51, %v402_v47  ;;  %v1415_v60 = vand.u32 4294901760, %v11122_v41 }
  0x33   : > { %9912 = vmatpush1.bf16.msra.mxu1 %v9911_v27  ;;  %v959_v55 = vand.u32 4294901760, %v958_v42  ;;  %v9917_v0 = vpack.c.bf16 %v11020_v38, %v11017_v36  ;;  %v11143_v2 = vsub.f32 %v11080_v8, %v1407_v29  ;;  %v11146_v3 = vsub.f32 %v11085_v11, %v1411_v30 }
  0x34   : > { %v9913_v23 = vpack.c.bf16 %v953_v34, %v941_v28  ;;  %v1419_v63 = vand.u32 4294901760, %v1397_v22  ;;  %v11154_v51 = vand.u32 4294901760, %v1405_v58  ;;  %v9919_v8 = vpack.c.bf16 %v11032_v49, %v11022_v39  ;;  %v1382_v39 = vld [vmem:[%s13334_s3 + $0x50] sm:$0xff] }
  0x35   : > { %9876 = vmatpush1.bf16.msra.mxu0 %v9875_v46  ;;  %v1413_v46 = vand.u32 4294901760, %v11108_v25  ;;  %v9915_v47 = vpack.c.bf16 %v959_v55, %v947_v31  ;;  %v11165_v11 = vsub.f32 %v11122_v41, %v1415_v60  ;;  %v1417_v16 = vand.u32 4294901760, %v1388_v33 }
  0x36   : > { %9878 = vmatprep.subr.bf16.mxu0 %v10904_v15  ;;  %9914 = vmatprep.subr.bf16.mxu1 %v9913_v23  ;;  %v1421_v17 = vand.u32 4294901760, %v1396_v35  ;;  %v11168_v27 = vsub.f32 %v1397_v22, %v1419_v63  ;;  %v11176_v28 = vsub.f32 %v1405_v58, %v11154_v51  ;;  %v9923_v37 = vpack.c.bf16 %v11058_v1, %v11054_v62  ;;  %v1398_v62 = vld [vmem:[%s13334_s3 + $0xd0] sm:$0xff] }
  0x37   : > { %v11160_v7 = vsub.f32 %v11108_v25, %v1413_v46  ;;  %9916 = vmatpush1.bf16.msra.mxu1 %v9915_v47  ;;  %v9921_v25 = vpack.c.bf16 %v11044_v57, %v11042_v56  ;;  %v11185_v18 = vpack.c.bf16 %v1411_v30, %v1407_v29  ;;  %v11211_v31 = vpack.c.bf16 %v1413_v46, %v1409_v44 }
  0x38   : > { %565 = vmatmul.mubr.f32.vlgmr.msra.gmra.mrb[0].mxu0 %v10963_v45  ;;  %9918 = vmatprep.subr.bf16.mxu1 %v9917_v0  ;;  %v11189_v41 = vsub.f32 %v1396_v35, %v1421_v17  ;;  %v1529_v23 = vand.u32 4294901760, %v11168_v27  ;;  %v11202_v29 = vand.u32 4294901760, %v11176_v28  ;;  %v11213_v55 = vpack.c.bf16 %v1419_v63, %v1415_v60 }
  0x39   : > { %9880 = vmatpush1.bf16.msra.mxu0 %v10912_v19  ;;  %643 = vmatprep.mubr.f32.mxu0 %v10786_v9  ;;  %v9939_v56 = vpack.c.bf16 %v957_v12, %v945_v26  ;;  %v9965_v1 = vpack.c.bf16 %v11146_v3, %v11143_v2 }
  0x3a   : > { %9882 = vmatprep.subr.bf16.mxu0 %v10916_v21  ;;  %1019 = vmatmul.mubr.f32.vlgmr.msra.gmra.mrb[0].mxu1 %v10952_v40  ;;  %v1483_v46 = vsub.f32 %v11176_v28, %v11202_v29 }
  0x3b   : > { %9920 = vmatpush1.bf16.msra.mxu1 %v9919_v8  ;;  %1105 = vmatprep.mubr.f32.mxu1 %v10786_v9  ;;  %v9933_v8 = vpack.c.bf16 %v927_v53, %v915_v50  ;;  %v9935_v50 = vpack.c.bf16 %v933_v61, %v921_v54  ;;  %v9937_v54 = vpack.c.bf16 %v951_v5, %v939_v4  ;;  %v11281_v61 = vld [vmem:[%s13334_s3 + $0x98] sm:$0xff] }
  0x3c   : > { %9922 = vmatprep.subr.bf16.mxu1 %v9921_v25  ;;  %v11257_v36 = vand.u32 4294901760, %v1483_v46  ;;  %v1958_v26 = vand.u32 4294901760, %v11281_v61 }
  0x3d   : > { %9884 = vmatpush1.bf16.msra.mxu0 %v10936_v32 }
  0x3e   : > { %9886 = vmatprep.subr.bf16.mxu0 %v9885_v6  ;;  %v11157_v6 = vsub.f32 %v11103_v24, %v1409_v44  ;;  %v1505_v24 = vand.u32 4294901760, %v11146_v3  ;;  %v11227_v44 = vpack.c.bf16 %v1421_v17, %v1417_v16 }
  0x3f   : > { %9924 = vmatpush1.bf16.msra.mxu1 %v9923_v37  ;;  %v11249_v37 = vld [vmem:[%s13334_s3 + $0x18] sm:$0xff] }
  0x40   : > { %647 = vmatmul.mubr.f32.vlgmr.msra.gmra.mrb[0].mxu0 %v10971_v52  ;;  %v1499_v34 = vand.u32 4294901760, %v11157_v6  ;;  %v1506_v22 = vsub.f32 %v11146_v3, %v1505_v24  ;;  %9926 = vmatprep.subr.bf16.mxu1 %v10999_v10 }
  0x41   : > { %9888 = vmatpush1.bf16.msra.mxu0 %v9887_v14  ;;  %741 = vmatprep.mubr.f32.mxu0 %v10786_v9  ;;  %v1493_v14 = vand.u32 4294901760, %v11143_v2 }
  0x42   : > { %9890 = vmatprep.subr.bf16.mxu0 %v9889_v20  ;;  %v11187_v20 = vsub.f32 %v1388_v33, %v1417_v16  ;;  %v1507_v33 = vand.u32 4294901760, %v1506_v22  ;;  %1108 = vmatmul.mubr.f32.vlgmr.msra.gmra.mrb[0].mxu1 %v10963_v45 }
  0x43   : > { %v1494_v42 = vsub.f32 %v11143_v2, %v1493_v14  ;;  %9928 = vmatpush1.bf16.msra.mxu1 %v11005_v13  ;;  %1186 = vmatprep.mubr.f32.mxu1 %v10786_v9  ;;  %v1385_v2 = vld [vmem:[%s13334_s3 + $0x68] sm:$0xff] }
  0x44   : > { %v1523_v58 = vand.u32 4294901760, %v11187_v20  ;;  %9930 = vmatprep.subr.bf16.mxu1 %v11025_v43 }
  0x45   : > { %9892 = vmatpush1.bf16.msra.mxu0 %v9891_v59  ;;  %v1535_v59 = vand.u32 4294901760, %v11189_v41  ;;  %v1495_v0 = vand.u32 4294901760, %v1494_v42  ;;  %v11254_v42 = vld [vmem:[%s13334_s3 + $0x58] sm:$0xff] }
  0x46   : > { %9894 = vmatprep.subr.bf16.mxu0 %v10904_v15  ;;  %v1511_v15 = vand.u32 4294901760, %v11160_v7  ;;  %v1524_v47 = vsub.f32 %v11187_v20, %v1523_v58 }
  0x47   : > { %v1536_v45 = vsub.f32 %v11189_v41, %v1535_v59  ;;  %v9957_v16 = vpack.c.bf16 %v1507_v33, %v1495_v0  ;;  %9932 = vmatpush1.bf16.msra.mxu1 %v11030_v48  ;;  %v1374_v0 = vld [vmem:[%s13334_s3 + $0x10] sm:$0xff]  ;;  %v11286_v33 = vld [vmem:[%s13334_s3 + $0xd8] sm:$0xff] }
  0x48   : > { %743 = vmatmul.mubr.f32.vlgmr.msra.gmra.mrb[0].mxu0 %v10952_v40  ;;  %v1512_v30 = vsub.f32 %v11160_v7, %v1511_v15  ;;  %v1525_v53 = vand.u32 4294901760, %v1524_v47  ;;  %9934 = vmatprep.subr.bf16.mxu1 %v9933_v8  ;;  %v1952_v57 = vand.u32 4294901760, %v1374_v0  ;;  %v1962_v12 = vand.u32 4294901760, %v11286_v33 }
  0x49   : > { %9896 = vmatpush1.bf16.msra.mxu0 %v10912_v19  ;;  %821 = vmatprep.mubr.f32.mxu0 %v10786_v9  ;;  %v1517_v19 = vand.u32 4294901760, %v11165_v11  ;;  %v1537_v22 = vand.u32 4294901760, %v1536_v45  ;;  %v1964_v47 = vand.u32 4294901760, %v1398_v62  ;;  %v9967_v45 = vpack.c.bf16 %v11160_v7, %v11157_v6 }
  0x4a   : > { %9898 = vmatprep.subr.bf16.mxu0 %v10916_v21  ;;  %v1500_v21 = vsub.f32 %v11157_v6, %v1499_v34  ;;  %v1513_v63 = vand.u32 4294901760, %v1512_v30  ;;  %v1954_v30 = vand.u32 4294901760, %v11254_v42  ;;  %1190 = vmatmul.mubr.f32.vlgmr.msra.gmra.mrb[0].mxu1 %v10971_v52  ;;  %v1956_v52 = vand.u32 4294901760, %v1382_v39  ;;  %v1384_v6 = vld [vmem:[%s13334_s3 + $0x60] sm:$0xff] }
  0x4b   : > { %v1518_v35 = vsub.f32 %v11165_v11, %v1517_v19  ;;  %9936 = vmatpush1.bf16.msra.mxu1 %v9935_v50  ;;  %v9963_v4 = vpack.c.bf16 %v1537_v22, %v1525_v53  ;;  %1284 = vmatprep.mubr.f32.mxu1 %v10786_v9  ;;  %v11311_v46 = vsub.f32 %v1374_v0, %v1952_v57 }
  0x4c   : > { %v1501_v60 = vand.u32 4294901760, %v1500_v21  ;;  %v1950_v21 = vand.u32 4294901760, %v11249_v37  ;;  %9938 = vmatprep.subr.bf16.mxu1 %v9937_v54  ;;  %v11352_v54 = vpack.c.bf16 %v1956_v52, %v1952_v57  ;;  %v9983_v3 = vpack.c.bf16 %v1511_v15, %v1499_v34 }
  0x4d   : > { %9900 = vmatpush1.bf16.msra.mxu0 %v10936_v32  ;;  %v1530_v32 = vsub.f32 %v11168_v27, %v1529_v23  ;;  %v1519_v17 = vand.u32 4294901760, %v1518_v35  ;;  %v11298_v35 = vsub.f32 %v11254_v42, %v1954_v30  ;;  %v9971_v42 = vpack.c.bf16 %v11189_v41, %v11187_v20  ;;  %v1392_v41 = vld [vmem:[%s13334_s3 + $0xa0] sm:$0xff] }
  0x4e   : > { %9950 = vmatprep.subr.bf16.mxu0 %v11185_v18  ;;  %v9959_v38 = vpack.c.bf16 %v1513_v63, %v1501_v60  ;;  %v11295_v5 = vsub.f32 %v11249_v37, %v1950_v21  ;;  %v11313_v60 = vsub.f32 %v1382_v39, %v1956_v52  ;;  %v11326_v37 = vsub.f32 %v11286_v33, %v1962_v12 }
  0x4f   : > { %v1531_v25 = vand.u32 4294901760, %v1530_v32  ;;  %v1390_v32 = vld [vmem:[%s13334_s3 + $0x90] sm:$0xff]  ;;  %9940 = vmatpush1.bf16.msra.mxu1 %v9939_v56  ;;  %v2042_v50 = vand.u32 4294901760, %v11311_v46  ;;  %v11340_v22 = vpack.c.bf16 %v1954_v30, %v1950_v21  ;;  %v9987_v34 = vpack.c.bf16 %v1535_v59, %v1523_v58  ;;  %v1400_v58 = vld [vmem:[%s13334_s3 + $0xe0] sm:$0xff] }
  0x50   : > { %823 = vmatmul.mubr.f32.vlgmr.msra.gmra.mrb[0].mxu0 %v10952_v40  ;;  %v1960_v63 = vand.u32 4294901760, %v1390_v32  ;;  %9942 = vmatprep.subr.bf16.mxu1 %v10999_v10  ;;  %v2036_v8 = vand.u32 4294901760, %v11295_v5  ;;  %v2054_v53 = vand.u32 4294901760, %v11313_v60  ;;  %v10013_v15 = vpack.c.bf16 %v11298_v35, %v11295_v5 }
  0x51   : > { %9952 = vmatpush1.bf16.msra.mxu0 %v11211_v31  ;;  %1479 = vmatprep.mubr.f32.mxu0 %v10786_v9  ;;  %v9961_v49 = vpack.c.bf16 %v1531_v25, %v1519_v17  ;;  %v9969_v17 = vpack.c.bf16 %v11168_v27, %v11165_v11  ;;  %v11323_v25 = vsub.f32 %v11281_v61, %v1958_v26  ;;  %v1393_v11 = vld [vmem:[%s13334_s3 + $0xa8] sm:$0xff] }
  0x52   : > { %9954 = vmatprep.subr.bf16.mxu0 %v11213_v55  ;;  %1286 = vmatmul.mubr.f32.vlgmr.msra.gmra.mrb[0].mxu1 %v10952_v40  ;;  %v11333_v10 = vsub.f32 %v1390_v32, %v1960_v63  ;;  %v2037_v0 = vsub.f32 %v11295_v5, %v2036_v8  ;;  %v2043_v21 = vsub.f32 %v11311_v46, %v2042_v50  ;;  %v1401_v27 = vld [vmem:[%s13334_s3 + $0xe8] sm:$0xff] }
  0x53   : > { %9944 = vmatpush1.bf16.msra.mxu1 %v11005_v13  ;;  %v2060_v39 = vand.u32 4294901760, %v11323_v25  ;;  %1364 = vmatprep.mubr.f32.mxu1 %v10786_v9  ;;  %v2055_v30 = vsub.f32 %v11313_v60, %v2054_v53  ;;  %v2505_v20 = vand.u32 4294901760, %v1401_v27  ;;  %v10015_v59 = vpack.c.bf16 %v11313_v60, %v11311_v46 }
  0x54   : > { %9946 = vmatprep.subr.bf16.mxu1 %v11025_v43  ;;  %v2066_v43 = vand.u32 4294901760, %v11333_v10  ;;  %v2038_v33 = vand.u32 4294901760, %v2037_v0  ;;  %v2044_v32 = vand.u32 4294901760, %v2043_v21  ;;  %v1377_v0 = vld [vmem:[%s13334_s3 + $0x28] sm:$0xff]  ;;  %v2497_v21 = vand.u32 4294901760, %v1385_v2 }
  0x55   : > { %9956 = vmatpush1.bf16.msra.mxu0 %v11227_v44  ;;  %v2061_v57 = vsub.f32 %v11323_v25, %v2060_v39 }
  0x56   : > { %9958 = vmatprep.subr.bf16.mxu0 %v9957_v16  ;;  %v2048_v16 = vand.u32 4294901760, %v11298_v35 }
  0x57   : > { %9948 = vmatpush1.bf16.msra.mxu1 %v11030_v48  ;;  %v11365_v48 = vpack.c.bf16 %v1962_v12, %v1958_v26  ;;  %v9981_v12 = vpack.c.bf16 %v1505_v24, %v1493_v14  ;;  %v9985_v14 = vpack.c.bf16 %v1529_v23, %v1517_v19  ;;  %v2499_v23 = vand.u32 4294901760, %v1384_v6 }
  0x58   : > { %1485 = vmatmul.mubr.f32.vlgmr.msra.gmra.mrb[2].mxu0 %v11257_v36  ;;  %v2049_v13 = vsub.f32 %v11298_v35, %v2048_v16  ;;  %9998 = vmatprep.subr.bf16.mxu1 %v11340_v22 }
  0x59   : > { %9960 = vmatpush1.bf16.msra.mxu0 %v9959_v38  ;;  %1595 = vmatprep.mubr.f32.mxu0 %v10786_v9  ;;  %v11335_v38 = vsub.f32 %v1398_v62, %v1964_v47  ;;  %v2056_v62 = vand.u32 4294901760, %v2055_v30  ;;  %v1376_v30 = vld [vmem:[%s13334_s3 + $0x20] sm:$0xff] }
  0x5a   : > { %9962 = vmatprep.subr.bf16.mxu0 %v9961_v49  ;;  %v2072_v49 = vand.u32 4294901760, %v11326_v37  ;;  %v2050_v56 = vand.u32 4294901760, %v2049_v13  ;;  %1366 = vmatmul.mubr.f32.vlgmr.msra.gmra.mrb[0].mxu1 %v10952_v40  ;;  %v2493_v13 = vand.u32 4294901760, %v1377_v0  ;;  %v2495_v19 = vand.u32 4294901760, %v1376_v30 }
  0x5b   : > { %v2078_v61 = vand.u32 4294901760, %v11335_v38  ;;  %10000 = vmatpush1.bf16.msra.mxu1 %v11352_v54  ;;  %2022 = vmatprep.mubr.f32.mxu1 %v10786_v9 }
  0x5c   : > { %v2073_v52 = vsub.f32 %v11326_v37, %v2072_v49  ;;  %v10005_v40 = vpack.c.bf16 %v2050_v56, %v2038_v33  ;;  %10002 = vmatprep.subr.bf16.mxu1 %v11365_v48  ;;  %v11431_v33 = vsub.f32 %v1377_v0, %v2493_v13  ;;  %v11433_v56 = vsub.f32 %v1385_v2, %v2497_v21 }
  0x5d   : > { %9964 = vmatpush1.bf16.msra.mxu0 %v9963_v4  ;;  %v11374_v4 = vpack.c.bf16 %v1964_v47, %v1960_v63  ;;  %v2079_v26 = vsub.f32 %v11335_v38, %v2078_v61  ;;  %v2062_v63 = vand.u32 4294901760, %v2061_v57  ;;  %v2501_v57 = vand.u32 4294901760, %v1393_v11 }
  0x5e   : > { %9966 = vmatprep.subr.bf16.mxu0 %v9965_v1  ;;  %v2067_v1 = vsub.f32 %v11333_v10, %v2066_v43  ;;  %v2074_v47 = vand.u32 4294901760, %v2073_v52  ;;  %v10017_v52 = vpack.c.bf16 %v11326_v37, %v11323_v25  ;;  %v10035_v46 = vpack.c.bf16 %v2078_v61, %v2066_v43 }
  0x5f   : > { %10004 = vmatpush1.bf16.msra.mxu1 %v11374_v4  ;;  %v10061_v25 = vpack.c.bf16 %v11433_v56, %v11431_v33 }
  0x60   : > { %1597 = vmatmul.mubr.f32.vlgmr.msra.gmra.mrb[2].mxu0 %v11154_v51  ;;  %10006 = vmatprep.subr.bf16.mxu1 %v10005_v40  ;;  %v10009_v24 = vpack.c.bf16 %v2074_v47, %v2062_v63  ;;  %v11451_v40 = vsub.f32 %v1393_v11, %v2501_v57  ;;  %v2579_v63 = vand.u32 4294901760, %v11431_v33  ;;  %v2591_v47 = vand.u32 4294901760, %v11433_v56 }
  0x61   : > { %9968 = vmatpush1.bf16.msra.mxu0 %v9967_v45  ;;  %1683 = vmatprep.mubr.f32.mxu0 %v10786_v9  ;;  %v10007_v45 = vpack.c.bf16 %v2056_v62, %v2044_v32  ;;  %v11446_v32 = vsub.f32 %v1376_v30, %v2495_v19  ;;  %v11448_v62 = vsub.f32 %v1384_v6, %v2499_v23 }
  0x62   : > { %9970 = vmatprep.subr.bf16.mxu0 %v9969_v17  ;;  %v2068_v17 = vand.u32 4294901760, %v2067_v1  ;;  %2028 = vmatmul.mubr.f32.vlgmr.msra.gmra.mrb[2].mxu1 %v11257_v36  ;;  %v2503_v1 = vand.u32 4294901760, %v1392_v41 }
  0x63   : > { %10008 = vmatpush1.bf16.msra.mxu1 %v10007_v45  ;;  %2138 = vmatprep.mubr.f32.mxu1 %v10786_v9  ;;  %v11462_v45 = vpack.c.bf16 %v2497_v21, %v2493_v13  ;;  %v2585_v0 = vand.u32 4294901760, %v11446_v32  ;;  %v2597_v2 = vand.u32 4294901760, %v11448_v62  ;;  %v11484_v13 = vpack.c.bf16 %v2505_v20, %v2501_v57 }
  0x64   : > { %10010 = vmatprep.subr.bf16.mxu1 %v10009_v24  ;;  %v11482_v24 = vpack.c.bf16 %v2499_v23, %v2495_v19  ;;  %v10063_v37 = vpack.c.bf16 %v11448_v62, %v11446_v32 }
  0x65   : > { %9972 = vmatpush1.bf16.msra.mxu0 %v9971_v42  ;;  %v2080_v42 = vand.u32 4294901760, %v2079_v26  ;;  %v2507_v26 = vand.u32 4294901760, %v1400_v58  ;;  %v2586_v21 = vsub.f32 %v11446_v32, %v2585_v0  ;;  %v2598_v30 = vsub.f32 %v11448_v62, %v2597_v2  ;;  %v1387_v32 = vld [vmem:[%s13334_s3 + $0x78] sm:$0xff] }
  0x66   : > { %9974 = vmatprep.subr.bf16.mxu0 %v11185_v18 }
  0x67   : > { %v10011_v7 = vpack.c.bf16 %v2080_v42, %v2068_v17  ;;  %v11465_v17 = vsub.f32 %v1392_v41, %v2503_v1  ;;  %v11467_v42 = vsub.f32 %v1400_v58, %v2507_v26  ;;  %v11510_v19 = vpack.c.bf16 %v2507_v26, %v2503_v1 }
  0x68   : > { %1686 = vmatmul.mubr.f32.vlgmr.msra.gmra.mrb[2].mxu0 %v11176_v28  ;;  %v2587_v23 = vand.u32 4294901760, %v2586_v21  ;;  %v2599_v57 = vand.u32 4294901760, %v2598_v30  ;;  %v10033_v58 = vpack.c.bf16 %v2072_v49, %v2060_v39  ;;  %v1394_v21 = vld [vmem:[%s13334_s3 + $0xb0] sm:$0xff] }
  0x69   : > { %9976 = vmatpush1.bf16.msra.mxu0 %v11211_v31  ;;  %1764 = vmatprep.mubr.f32.mxu0 %v10786_v9  ;;  %v2609_v6 = vand.u32 4294901760, %v11465_v17  ;;  %v1402_v30 = vld [vmem:[%s13334_s3 + $0xf0] sm:$0xff] }
  0x6a   : > { %9978 = vmatprep.subr.bf16.mxu0 %v11213_v55  ;;  %10012 = vmatpush1.bf16.msra.mxu1 %v10011_v7 }
  0x6b   : > { %10014 = vmatprep.subr.bf16.mxu1 %v10013_v15  ;;  %v10029_v15 = vpack.c.bf16 %v2048_v16, %v2036_v8  ;;  %v10031_v16 = vpack.c.bf16 %v2054_v53, %v2042_v50  ;;  %v10077_v50 = vpack.c.bf16 %v2591_v47, %v2579_v63  ;;  %v10079_v53 = vpack.c.bf16 %v2597_v2, %v2585_v0 }
  0x6d   : > { %9980 = vmatpush1.bf16.msra.mxu0 %v11227_v44  ;;  %2140 = vmatmul.mubr.f32.vlgmr.msra.gmra.mrb[2].mxu1 %v11154_v51 }
  0x6e   : > { %9982 = vmatprep.subr.bf16.mxu0 %v9981_v12  ;;  %v11453_v12 = vsub.f32 %v1401_v27, %v2505_v20  ;;  %10016 = vmatpush1.bf16.msra.mxu1 %v10015_v59  ;;  %v2610_v20 = vsub.f32 %v11465_v17, %v2609_v6  ;;  %v10055_v59 = vpack.c.bf16 %v2599_v57, %v2587_v23 }
  0x6f   : > { %10018 = vmatprep.subr.bf16.mxu1 %v10017_v52  ;;  %2226 = vmatprep.mubr.f32.mxu1 %v10786_v9 }
  0x70   : > { %1768 = vmatmul.mubr.f32.vlgmr.msra.gmra.mrb[2].mxu0 %v11202_v29  ;;  %v2611_v52 = vand.u32 4294901760, %v2610_v20 }
  0x71   : > { %9984 = vmatpush1.bf16.msra.mxu0 %v9983_v3  ;;  %1862 = vmatprep.mubr.f32.mxu0 %v10786_v9  ;;  %v2592_v3 = vsub.f32 %v11433_v56, %v2591_v47  ;;  %v1379_v56 = vld [vmem:[%s13334_s3 + $0x38] sm:$0xff] }
  0x72   : > { %9986 = vmatprep.subr.bf16.mxu0 %v9985_v14  ;;  %v2615_v14 = vand.u32 4294901760, %v11453_v12  ;;  %v3036_v62 = vand.u32 4294901760, %v1379_v56 }
  0x73   : > { %v2593_v11 = vand.u32 4294901760, %v2592_v3 }
  0x75   : > { %9988 = vmatpush1.bf16.msra.mxu0 %v9987_v34  ;;  %v2616_v34 = vsub.f32 %v11453_v12, %v2615_v14 }
  0x76   : > { %9990 = vmatprep.subr.bf16.mxu0 %v11185_v18  ;;  %v10019_v18 = vpack.c.bf16 %v11335_v38, %v11333_v10  ;;  %v10065_v10 = vpack.c.bf16 %v11453_v12, %v11451_v40  ;;  %v10067_v38 = vpack.c.bf16 %v11467_v42, %v11465_v17  ;;  %v1378_v12 = vld [vmem:[%s13334_s3 + $0x30] sm:$0xff]  ;;  %v11617_v17 = vsub.f32 %v1379_v56, %v3036_v62 }
  0x77   : > { %v2617_v8 = vand.u32 4294901760, %v2616_v34  ;;  %v3038_v47 = vand.u32 4294901760, %v1378_v12 }
  0x78   : > { %1864 = vmatmul.mubr.f32.vlgmr.msra.gmra.mrb[2].mxu0 %v11154_v51  ;;  %10020 = vmatpush1.bf16.msra.mxu1 %v10019_v18 }
  0x79   : > { %9992 = vmatpush1.bf16.msra.mxu0 %v11211_v31  ;;  %1942 = vmatprep.mubr.f32.mxu0 %v10786_v9  ;;  %v2580_v31 = vsub.f32 %v11431_v33, %v2579_v63  ;;  %v1386_v63 = vld [vmem:[%s13334_s3 + $0x70] sm:$0xff] }
  0x7a   : > { %9994 = vmatprep.subr.bf16.mxu0 %v11213_v55  ;;  %v2603_v55 = vand.u32 4294901760, %v11451_v40  ;;  %10022 = vmatprep.subr.bf16.mxu1 %v11340_v22  ;;  %v3042_v18 = vand.u32 4294901760, %v1386_v63 }
  0x7b   : > { %2229 = vmatmul.mubr.f32.vlgmr.msra.gmra.mrb[2].mxu1 %v11176_v28  ;;  %v2581_v7 = vand.u32 4294901760, %v2580_v31  ;;  %v11626_v31 = vsub.f32 %v1378_v12, %v3038_v47 }
  0x7c   : > { %v2604_v27 = vsub.f32 %v11451_v40, %v2603_v55  ;;  %10024 = vmatpush1.bf16.msra.mxu1 %v11352_v54  ;;  %2307 = vmatprep.mubr.f32.mxu1 %v10786_v9  ;;  %v3040_v40 = vand.u32 4294901760, %v1387_v32  ;;  %v11624_v2 = vpack.c.bf16 %v3042_v18, %v3038_v47  ;;  %v11628_v3 = vsub.f32 %v1386_v63, %v3042_v18 }
  0x7d   : > { %9996 = vmatpush1.bf16.msra.mxu0 %v11227_v44  ;;  %v2621_v44 = vand.u32 4294901760, %v11467_v42  ;;  %10026 = vmatprep.subr.bf16.mxu1 %v11365_v48  ;;  %v10053_v5 = vpack.c.bf16 %v2593_v11, %v2581_v7  ;;  %v3046_v7 = vand.u32 4294901760, %v1394_v21  ;;  %v3050_v11 = vand.u32 4294901760, %v1402_v30 }
  0x7e   : > { %10046 = vmatprep.subr.bf16.mxu0 %v11462_v45  ;;  %v2605_v35 = vand.u32 4294901760, %v2604_v27  ;;  %v3128_v27 = vand.u32 4294901760, %v11626_v31  ;;  %v3140_v34 = vand.u32 4294901760, %v11628_v3 }
  0x7f   : > { %v2622_v41 = vsub.f32 %v11467_v42, %v2621_v44  ;;  %v10083_v39 = vpack.c.bf16 %v2621_v44, %v2609_v6  ;;  %v11619_v42 = vsub.f32 %v1387_v32, %v3040_v40  ;;  %v3122_v6 = vand.u32 4294901760, %v11617_v17 }
  0x80   : > { %1944 = vmatmul.mubr.f32.vlgmr.msra.gmra.mrb[2].mxu0 %v11154_v51  ;;  %10028 = vmatpush1.bf16.msra.mxu1 %v11374_v4  ;;  %v10057_v26 = vpack.c.bf16 %v2617_v8, %v2605_v35  ;;  %v11657_v20 = vpack.c.bf16 %v3050_v11, %v3046_v7 }
  0x81   : > { %10048 = vmatpush1.bf16.msra.mxu0 %v11482_v24  ;;  %2565 = vmatprep.mubr.f32.mxu0 %v10786_v9  ;;  %v2623_v1 = vand.u32 4294901760, %v2622_v41  ;;  %v3134_v44 = vand.u32 4294901760, %v11619_v42  ;;  %v3123_v57 = vsub.f32 %v11617_v17, %v3122_v6  ;;  %v11659_v41 = vsub.f32 %v1394_v21, %v3046_v7 }
  0x82   : > { %10050 = vmatprep.subr.bf16.mxu0 %v11484_v13  ;;  %10030 = vmatprep.subr.bf16.mxu1 %v10029_v15 }
  0x83   : > { %2311 = vmatmul.mubr.f32.vlgmr.msra.gmra.mrb[2].mxu1 %v11202_v29  ;;  %v10059_v60 = vpack.c.bf16 %v2623_v1, %v2611_v52  ;;  %v3135_v35 = vsub.f32 %v11619_v42, %v3134_v44 }
  0x84   : > { %10032 = vmatpush1.bf16.msra.mxu1 %v10031_v16  ;;  %2405 = vmatprep.mubr.f32.mxu1 %v10786_v9  ;;  %v3124_v16 = vand.u32 4294901760, %v3123_v57  ;;  %v10125_v57 = vpack.c.bf16 %v3134_v44, %v3122_v6 }
  0x85   : > { %10052 = vmatpush1.bf16.msra.mxu0 %v11510_v19  ;;  %10034 = vmatprep.subr.bf16.mxu1 %v10033_v58  ;;  %v3129_v58 = vsub.f32 %v11626_v31, %v3128_v27 }
  0x86   : > { %10054 = vmatprep.subr.bf16.mxu0 %v10053_v5  ;;  %v11661_v5 = vsub.f32 %v1402_v30, %v3050_v11 }
  0x88   : > { %2571 = vmatmul.mubr.f32.vlgmr.msra.gmra.mrb[4].mxu0 %v11257_v36  ;;  %10036 = vmatpush1.bf16.msra.mxu1 %v10035_v46  ;;  %v3136_v46 = vand.u32 4294901760, %v3135_v35  ;;  %v10115_v30 = vpack.c.bf16 %v11661_v5, %v11659_v41 }
  0x89   : > { %10056 = vmatpush1.bf16.msra.mxu0 %v10055_v59  ;;  %2681 = vmatprep.mubr.f32.mxu0 %v10786_v9  ;;  %v3141_v59 = vsub.f32 %v11628_v3, %v3140_v34 }
  0x8a   : > { %10058 = vmatprep.subr.bf16.mxu0 %v10057_v26  ;;  %10038 = vmatprep.subr.bf16.mxu1 %v11340_v22  ;;  %v10081_v22 = vpack.c.bf16 %v2615_v14, %v2603_v55  ;;  %v1395_v55 = vld [vmem:[%s13334_s3 + $0xb8] sm:$0xff] }
  0x8b   : > { %2407 = vmatmul.mubr.f32.vlgmr.msra.gmra.mrb[2].mxu1 %v11154_v51  ;;  %v1403_v14 = vld [vmem:[%s13334_s3 + $0xf8] sm:$0xff] }
  0x8c   : > { %10040 = vmatpush1.bf16.msra.mxu1 %v11352_v54  ;;  %2485 = vmatprep.mubr.f32.mxu1 %v10786_v9 }
  0x8d   : > { %10060 = vmatpush1.bf16.msra.mxu0 %v10059_v60  ;;  %10042 = vmatprep.subr.bf16.mxu1 %v11365_v48 }
  0x8e   : > { %10062 = vmatprep.subr.bf16.mxu0 %v10061_v25  ;;  %v3152_v25 = vand.u32 4294901760, %v11659_v41 }
  0x90   : > { %2683 = vmatmul.mubr.f32.vlgmr.msra.gmra.mrb[4].mxu0 %v11154_v51  ;;  %10044 = vmatpush1.bf16.msra.mxu1 %v11374_v4 }
  0x91   : > { %10064 = vmatpush1.bf16.msra.mxu0 %v10063_v37  ;;  %2769 = vmatprep.mubr.f32.mxu0 %v10786_v9  ;;  %v3130_v37 = vand.u32 4294901760, %v3129_v58 }
  0x92   : > { %10066 = vmatprep.subr.bf16.mxu0 %v10065_v10  ;;  %v3142_v10 = vand.u32 4294901760, %v3141_v59 }
  0x93   : > { %2487 = vmatmul.mubr.f32.vlgmr.msra.gmra.mrb[2].mxu1 %v11154_v51 }
  0x94   : > { %3108 = vmatprep.mubr.f32.mxu1 %v10786_v9  ;;  %v10103_v56 = vpack.c.bf16 %v3142_v10, %v3130_v37 }
  0x95   : > { %10068 = vmatpush1.bf16.msra.mxu0 %v10067_v38 }
  0x96   : > { %10070 = vmatprep.subr.bf16.mxu0 %v11462_v45 }
  0x98   : > { %2772 = vmatmul.mubr.f32.vlgmr.msra.gmra.mrb[4].mxu0 %v11176_v28 }
  0x99   : > { %10072 = vmatpush1.bf16.msra.mxu0 %v11482_v24  ;;  %2850 = vmatprep.mubr.f32.mxu0 %v10786_v9 }
  0x9a   : > { %10074 = vmatprep.subr.bf16.mxu0 %v11484_v13 }
  0x9d   : > { %10076 = vmatpush1.bf16.msra.mxu0 %v11510_v19 }
  0x9e   : > { %10078 = vmatprep.subr.bf16.mxu0 %v10077_v50 }
  0xa0   : > { %2854 = vmatmul.mubr.f32.vlgmr.msra.gmra.mrb[4].mxu0 %v11202_v29 }
  0xa1   : > { %10080 = vmatpush1.bf16.msra.mxu0 %v10079_v53  ;;  %2948 = vmatprep.mubr.f32.mxu0 %v10786_v9  ;;  %v10101_v53 = vpack.c.bf16 %v3136_v46, %v3124_v16 }
  0xa2   : > { %10082 = vmatprep.subr.bf16.mxu0 %v10081_v22 }
  0xa5   : > { %10084 = vmatpush1.bf16.msra.mxu0 %v10083_v39  ;;  %v3153_v39 = vsub.f32 %v11659_v41, %v3152_v25 }
  0xa6   : > { %10086 = vmatprep.subr.bf16.mxu0 %v11462_v45  ;;  %v11615_v45 = vpack.c.bf16 %v3040_v40, %v3036_v62  ;;  %v3164_v62 = vand.u32 4294901760, %v11661_v5 }
  0xa7   : > { %v3154_v63 = vand.u32 4294901760, %v3153_v39 }
  0xa8   : > { %2950 = vmatmul.mubr.f32.vlgmr.msra.gmra.mrb[4].mxu0 %v11154_v51  ;;  %10094 = vmatprep.subr.bf16.mxu1 %v11615_v45  ;;  %v3165_v47 = vsub.f32 %v11661_v5, %v3164_v62  ;;  %v10127_v5 = vpack.c.bf16 %v3140_v34, %v3128_v27 }
  0xa9   : > { %10088 = vmatpush1.bf16.msra.mxu0 %v11482_v24  ;;  %3028 = vmatprep.mubr.f32.mxu0 %v10786_v9  ;;  %v3044_v24 = vand.u32 4294901760, %v1395_v55 }
  0xaa   : > { %10090 = vmatprep.subr.bf16.mxu0 %v11484_v13  ;;  %v3048_v13 = vand.u32 4294901760, %v1403_v14  ;;  %10096 = vmatpush1.bf16.msra.mxu1 %v11624_v2 }
  0xac   : > { %v11648_v15 = vpack.c.bf16 %v3048_v13, %v3044_v24  ;;  %v11652_v23 = vsub.f32 %v1403_v14, %v3048_v13  ;;  %v10111_v13 = vpack.c.bf16 %v11628_v3, %v11626_v31 }
  0xad   : > { %10092 = vmatpush1.bf16.msra.mxu0 %v11510_v19  ;;  %v11650_v19 = vsub.f32 %v1395_v55, %v3044_v24  ;;  %v10109_v24 = vpack.c.bf16 %v11619_v42, %v11617_v17 }
  0xae   : > { %9613 = vmatprep.subr.mxu0 %v10786_v9  ;;  %10098 = vmatprep.subr.bf16.mxu1 %v11648_v15  ;;  %v3158_v60 = vand.u32 4294901760, %v11652_v23 }
  0xaf   : > { %v3146_v52 = vand.u32 4294901760, %v11650_v19  ;;  %10100 = vmatpush1.bf16.msra.mxu1 %v11657_v20  ;;  %v10113_v21 = vpack.c.bf16 %v11652_v23, %v11650_v19 }
  0xb0   : > { %3030 = vmatmul.mubr.f32.vlgmr.msra.gmra.mrb[4].mxu0 %v11154_v51  ;;  %v3159_v22 = vsub.f32 %v11652_v23, %v3158_v60  ;;  %10102 = vmatprep.subr.bf16.mxu1 %v10101_v53 }
  0xb1   : > { %9615 = vmatprep.mubr.msk.f32.mxu0 %vm10787_vm1, %v10786_v9  ;;  %v3147_v38 = vsub.f32 %v11650_v19, %v3146_v52 }
  0xb2   : > { %3114 = vmatmul.mubr.f32.vlgmr.msra.gmra.mrb[4].mxu1 %v11257_v36  ;;  %v3160_v12 = vand.u32 4294901760, %v3159_v22  ;;  %v3166_v36 = vand.u32 4294901760, %v3165_v47 }
  0xb3   : > { %v3148_v32 = vand.u32 4294901760, %v3147_v38  ;;  %3224 = vmatprep.mubr.f32.mxu1 %v10786_v9  ;;  %10104 = vmatpush1.bf16.msra.mxu1 %v10103_v56 }
  0xb4   : > { %v10107_v14 = vpack.c.bf16 %v3166_v36, %v3154_v63 }
 0x123   : > { %v824_v49 = vpop.f32.mrb[0].mxu0 }
 0x124   : > { %v11591_v54 = vpop.f32.mrb[1].mxu0  ;;  %v11597_v48 = vand.u32 4294901760, %v824_v49 }
 0x125   : > { %v11746_v17 = vand.u32 4294901760, %v11591_v54 }
 0x126   : > { %v11600_v4 = vsub.f32 %v824_v49, %v11597_v48 }
 0x127   : > { %v4618_v42 = vsub.f32 %v11591_v54, %v11746_v17 }
 0x128   : > { %v3712_v33 = vand.u32 4294901760, %v11600_v4 }
 0x12a   : > { %v3713_v0 = vsub.f32 %v11600_v4, %v3712_v33 }
 0x12c   : > { %v3714_v49 = vand.u32 4294901760, %v3713_v0  ;;  %v10105_v0 = vpack.c.bf16 %v3160_v12, %v3148_v32 }
 0x12d   : > { %v11593_v43 = vpop.f32.mrb[0].mxu1 }
 0x12e   : > { %v11595_v61 = vpop.f32.mrb[1].mxu1  ;;  %10106 = vmatprep.subr.bf16.mxu1 %v10105_v0 }
 0x12f   : > { %10108 = vmatpush1.bf16.msra.mxu1 %v10107_v14  ;;  %v6429_v16 = vand.u32 4294901760, %v11595_v61 }
 0x130   : > { %10110 = vmatprep.subr.bf16.mxu1 %v10109_v24 }
 0x131   : > { %v6430_v59 = vsub.f32 %v11595_v61, %v6429_v16 }
 0x132   : > { %3226 = vmatmul.mubr.f32.vlgmr.msra.gmra.mrb[4].mxu1 %v11154_v51 }
 0x133   : > { %10112 = vmatpush1.bf16.msra.mxu1 %v10111_v13  ;;  %3312 = vmatprep.mubr.f32.mxu1 %v10786_v9 }
 0x134   : > { %10114 = vmatprep.subr.bf16.mxu1 %v10113_v21 }
 0x137   : > { %10116 = vmatpush1.bf16.msra.mxu1 %v10115_v30 }
 0x138   : > { %10118 = vmatprep.subr.bf16.mxu1 %v11615_v45 }
 0x13a   : > { %3315 = vmatmul.mubr.f32.vlgmr.msra.gmra.mrb[4].mxu1 %v11176_v28  ;;  %v10129_v28 = vpack.c.bf16 %v3158_v60, %v3146_v52 }
 0x13b   : > { %10120 = vmatpush1.bf16.msra.mxu1 %v11624_v2  ;;  %3393 = vmatprep.mubr.f32.mxu1 %v10786_v9 }
 0x13c   : > { %10122 = vmatprep.subr.bf16.mxu1 %v11648_v15 }
 0x13f   : > { %10124 = vmatpush1.bf16.msra.mxu1 %v11657_v20 }
 0x140   : > { %10126 = vmatprep.subr.bf16.mxu1 %v10125_v57 }
 0x142   : > { %3397 = vmatmul.mubr.f32.vlgmr.msra.gmra.mrb[4].mxu1 %v11202_v29  ;;  %v4619_v29 = vand.u32 4294901760, %v4618_v42 }
 0x143   : > { %10128 = vmatpush1.bf16.msra.mxu1 %v10127_v5  ;;  %3491 = vmatprep.mubr.f32.mxu1 %v10786_v9 }
 0x144   : > { %10130 = vmatprep.subr.bf16.mxu1 %v10129_v28  ;;  %v4620_v54 = vsub.f32 %v4618_v42, %v4619_v29 }
 0x153   : > { %v1945_v8 = vpop.f32.mrb[2].mxu0 }
 0x154   : > { %v11674_v1 = vand.u32 4294901760, %v1945_v8  ;;  %v11676_v26 = vpop.f32.mrb[3].mxu0 }
 0x156   : > { %v3722_v50 = vsub.f32 %v1945_v8, %v11674_v1  ;;  %9614 = vmatpush3.xpose.msra.mxu0 %v11674_v1 }
 0x157   : > { %9618 = vmatprep.subr.mxu0 %v10786_v9 }
 0x158   : > { %v3723_v40 = vand.u32 4294901760, %v3722_v50 }
 0x159   : > { %9616 = vmatmul.mubr.f32.vlgmr.msra.gmra.mrb[6].mxu0 %v3714_v49 }
 0x15a   : > { %v3724_v18 = vsub.f32 %v3722_v50, %v3723_v40  ;;  %9620 = vmatprep.mubr.msk.f32.mxu0 %vm10787_vm1, %v10786_v9 }
 0x15c   : > { %v3725_v55 = vand.u32 4294901760, %v3724_v18 }
 0x15e   : > { %9619 = vmatpush3.xpose.msra.mxu0 %v3725_v55 }
 0x15f   : > { %9623 = vmatprep.subr.mxu0 %v10786_v9 }
 0x161   : > { %9621 = vmatmul.mubr.f32.vlgmr.msra.gmra.mrb[6].mxu0 %v11597_v48 }
 0x162   : > { %9624 = vmatpush3.xpose.msra.mxu0 %v3722_v50  ;;  %9625 = vmatprep.mubr.msk.f32.mxu0 %vm10787_vm1, %v10786_v9 }
 0x163   : > { %9628 = vmatprep.subr.mxu0 %v10786_v9 }
 0x166   : > { %v11719_v7 = vpop.f32.mrb[2].mxu1 }
 0x167   : > { %v11722_v11 = vpop.f32.mrb[3].mxu1  ;;  %v5458_v34 = vand.u32 4294901760, %v11719_v7 }
 0x168   : > { %v6364_v58 = vand.u32 4294901760, %v11722_v11 }
 0x169   : > { %9626 = vmatmul.mubr.f32.vlgmr.msra.gmra.mrb[6].mxu0 %v11600_v4  ;;  %v4552_v4 = vand.u32 4294901760, %v11676_v26  ;;  %v5535_v19 = vsub.f32 %v11719_v7, %v5458_v34 }
 0x16a   : > { %9629 = vmatpush3.xpose.msra.mxu0 %v11674_v1  ;;  %9630 = vmatprep.mubr.msk.f32.mxu0 %vm10787_vm1, %v10786_v9  ;;  %v6441_v52 = vsub.f32 %v11722_v11, %v6364_v58 }
 0x16b   : > { %9633 = vmatprep.subr.mxu0 %v10786_v9  ;;  %v4629_v31 = vsub.f32 %v11676_v26, %v4552_v4 }
 0x16c   : > { %v6442_v26 = vand.u32 4294901760, %v6441_v52 }
 0x16d   : > { %v4630_v3 = vand.u32 4294901760, %v4629_v31 }
 0x16e   : > { %v6443_v60 = vsub.f32 %v6441_v52, %v6442_v26 }
 0x16f   : > { %v4631_v6 = vsub.f32 %v4629_v31, %v4630_v3 }
 0x170   : > { %v6444_v61 = vand.u32 4294901760, %v6443_v60 }
 0x171   : > { %9631 = vmatmul.mubr.f32.vlgmr.msra.gmra.mrb[6].mxu0 %v3712_v33  ;;  %v10131_v33 = vpack.c.bf16 %v3164_v62, %v3152_v25 }
 0x172   : > { %9634 = vmatpush3.xpose.msra.mxu0 %v3723_v40  ;;  %9635 = vmatprep.mubr.msk.f32.mxu0 %vm10787_vm1, %v10786_v9 }
 0x173   : > { %9638 = vmatprep.subr.mxu0 %v10786_v9  ;;  %10132 = vmatpush1.bf16.msra.mxu1 %v10131_v33 }
 0x174   : > { %10134 = vmatprep.subr.bf16.mxu1 %v11615_v45  ;;  %v4621_v45 = vand.u32 4294901760, %v4620_v54 }
 0x176   : > { %3493 = vmatmul.mubr.f32.vlgmr.msra.gmra.mrb[4].mxu1 %v11154_v51 }
 0x177   : > { %10136 = vmatpush1.bf16.msra.mxu1 %v11624_v2  ;;  %3571 = vmatprep.mubr.f32.mxu1 %v10786_v9  ;;  %v4632_v2 = vand.u32 4294901760, %v4631_v6 }
 0x178   : > { %10138 = vmatprep.subr.bf16.mxu1 %v11648_v15 }
 0x179   : > { %9636 = vmatmul.mubr.f32.vlgmr.msra.gmra.mrb[6].mxu0 %v11597_v48 }
 0x17a   : > { %9639 = vmatpush3.xpose.msra.mxu0 %v11674_v1  ;;  %9640 = vmatprep.mubr.msk.f32.mxu0 %vm10787_vm1, %v10786_v9  ;;  %v6431_v1 = vand.u32 4294901760, %v6430_v59 }
 0x17b   : > { %9673 = vmatprep.subr.mxu0 %v10786_v9  ;;  %10140 = vmatpush1.bf16.msra.mxu1 %v11657_v20  ;;  %v5536_v20 = vand.u32 4294901760, %v5535_v19 }
 0x17c   : > { %9643 = vmatprep.subr.mxu1 %v10786_v9  ;;  %v6432_v46 = vsub.f32 %v6430_v59, %v6431_v1 }
 0x17d   : > { %v5537_v35 = vsub.f32 %v5535_v19, %v5536_v20 }
 0x17e   : > { %3573 = vmatmul.mubr.f32.vlgmr.msra.gmra.mrb[4].mxu1 %v11154_v51  ;;  %v5523_v51 = vand.u32 4294901760, %v11593_v43  ;;  %v6433_v25 = vand.u32 4294901760, %v6432_v46 }
 0x17f   : > { %9645 = vmatprep.mubr.msk.f32.mxu1 %vm10787_vm1, %v10786_v9  ;;  %v5538_v8 = vand.u32 4294901760, %v5537_v35 }
 0x180   : > { %v5524_v15 = vsub.f32 %v11593_v43, %v5523_v51 }
 0x181   : > { %9641 = vmatmul.mubr.f32.vlgmr.msra.gmra.mrb[6].mxu0 %v11597_v48 }
 0x182   : > { %9674 = vmatpush3.xpose.msra.mxu0 %v4552_v4  ;;  %9675 = vmatprep.mubr.msk.f32.mxu0 %vm10787_vm1, %v10786_v9  ;;  %v5525_v23 = vand.u32 4294901760, %v5524_v15 }
 0x183   : > { %9678 = vmatprep.subr.mxu0 %v10786_v9  ;;  %v11774_v44 = vpop.f32.mrb[4].mxu0 }
 0x184   : > { %v11779_v48 = vand.u32 4294901760, %v11774_v44  ;;  %v11781_v27 = vpop.f32.mrb[5].mxu0  ;;  %v5526_v41 = vsub.f32 %v5524_v15, %v5525_v23 }
 0x185   : > { %9676 = vmatmul.mubr.f32.vlgmr.msra.gmra.mrb[8].mxu0 %v4621_v45 }
 0x186   : > { %9679 = vmatpush3.xpose.msra.mxu0 %v4632_v2  ;;  %9680 = vmatprep.mubr.msk.f32.mxu0 %vm10787_vm1, %v10786_v9  ;;  %v5527_v43 = vand.u32 4294901760, %v5526_v41  ;;  %v4181_v36 = vsub.f32 %v11774_v44, %v11779_v48 }
 0x187   : > { %9683 = vmatprep.subr.mxu0 %v10786_v9  ;;  %9644 = vmatpush3.msra.mxu1 %v11779_v48 }
 0x188   : > { %9648 = vmatprep.subr.mxu1 %v10786_v9  ;;  %v4182_v21 = vand.u32 4294901760, %v4181_v36 }
 0x18a   : > { %v4183_v11 = vsub.f32 %v4181_v36, %v4182_v21 }
 0x18c   : > { %v4184_v28 = vand.u32 4294901760, %v4183_v11  ;;  %v3581_v11 = vld [vmem:[%s13335_s4 + $0x10] sm:$0xff] }
 0x18d   : > { %9681 = vmatmul.mubr.f32.vlgmr.msra.gmra.mrb[8].mxu0 %v11746_v17 }
 0x18e   : > { %9684 = vmatpush3.xpose.msra.mxu0 %v4629_v31  ;;  %9685 = vmatprep.mubr.msk.f32.mxu0 %vm10787_vm1, %v10786_v9 }
 0x18f   : > { %9688 = vmatprep.subr.mxu0 %v10786_v9 }
 0x195   : > { %9686 = vmatmul.mubr.f32.vlgmr.msra.gmra.mrb[8].mxu0 %v4618_v42  ;;  %v5010_v42 = vand.u32 4294901760, %v11781_v27 }
 0x196   : > { %9689 = vmatpush3.xpose.msra.mxu0 %v4552_v4  ;;  %9690 = vmatprep.mubr.msk.f32.mxu0 %vm10787_vm1, %v10786_v9 }
 0x197   : > { %9693 = vmatprep.subr.mxu0 %v10786_v9  ;;  %v5087_v31 = vsub.f32 %v11781_v27, %v5010_v42 }
 0x199   : > { %v5088_v45 = vand.u32 4294901760, %v5087_v31 }
 0x19d   : > { %9691 = vmatmul.mubr.f32.vlgmr.msra.gmra.mrb[8].mxu0 %v4619_v29 }
 0x19e   : > { %9694 = vmatpush3.xpose.msra.mxu0 %v4630_v3  ;;  %9695 = vmatprep.mubr.msk.f32.mxu0 %vm10787_vm1, %v10786_v9 }
 0x19f   : > { %9698 = vmatprep.subr.mxu0 %v10786_v9 }
 0x1a5   : > { %9696 = vmatmul.mubr.f32.vlgmr.msra.gmra.mrb[8].mxu0 %v11746_v17 }
 0x1a6   : > { %9699 = vmatpush3.xpose.msra.mxu0 %v4552_v4  ;;  %9700 = vmatprep.mubr.msk.f32.mxu0 %vm10787_vm1, %v10786_v9 }
 0x1a7   : > { %9733 = vmatprep.subr.mxu0 %v10786_v9 }
 0x1ad   : > { %9701 = vmatmul.mubr.f32.vlgmr.msra.gmra.mrb[8].mxu0 %v11746_v17 }
 0x1ae   : > { %9734 = vmatpush3.xpose.msra.mxu0 %v5458_v34  ;;  %9735 = vmatprep.mubr.msk.f32.mxu0 %vm10787_vm1, %v10786_v9 }
 0x1af   : > { %9738 = vmatprep.subr.mxu0 %v10786_v9 }
 0x1b1   : > { %9736 = vmatmul.mubr.f32.vlgmr.msra.gmra.mrb[10].mxu0 %v5527_v43 }
 0x1b2   : > { %9739 = vmatpush3.xpose.msra.mxu0 %v5538_v8  ;;  %9740 = vmatprep.mubr.msk.f32.mxu0 %vm10787_vm1, %v10786_v9 }
 0x1b3   : > { %9743 = vmatprep.subr.mxu0 %v10786_v9 }
 0x1b9   : > { %9741 = vmatmul.mubr.f32.vlgmr.msra.gmra.mrb[10].mxu0 %v5523_v51 }
 0x1ba   : > { %9744 = vmatpush3.xpose.msra.mxu0 %v5535_v19  ;;  %9745 = vmatprep.mubr.msk.f32.mxu0 %vm10787_vm1, %v10786_v9 }
 0x1bb   : > { %9748 = vmatprep.subr.mxu0 %v10786_v9 }
 0x1c1   : > { %9746 = vmatmul.mubr.f32.vlgmr.msra.gmra.mrb[10].mxu0 %v5524_v15 }
 0x1c2   : > { %9749 = vmatpush3.xpose.msra.mxu0 %v5458_v34  ;;  %9750 = vmatprep.mubr.msk.f32.mxu0 %vm10787_vm1, %v10786_v9 }
 0x1c3   : > { %9753 = vmatprep.subr.mxu0 %v10786_v9 }
 0x1c9   : > { %9751 = vmatmul.mubr.f32.vlgmr.msra.gmra.mrb[10].mxu0 %v5525_v23 }
 0x1ca   : > { %9754 = vmatpush3.xpose.msra.mxu0 %v5536_v20  ;;  %9755 = vmatprep.mubr.msk.f32.mxu0 %vm10787_vm1, %v10786_v9 }
 0x1cb   : > { %9758 = vmatprep.subr.mxu0 %v10786_v9 }
 0x1d1   : > { %9756 = vmatmul.mubr.f32.vlgmr.msra.gmra.mrb[10].mxu0 %v5523_v51 }
 0x1d2   : > { %9759 = vmatpush3.xpose.msra.mxu0 %v5458_v34  ;;  %9760 = vmatprep.mubr.msk.f32.mxu0 %vm10787_vm1, %v10786_v9 }
 0x1d3   : > { %9793 = vmatprep.subr.mxu0 %v10786_v9 }
 0x1d9   : > { %9761 = vmatmul.mubr.f32.vlgmr.msra.gmra.mrb[10].mxu0 %v5523_v51  ;;  %v5089_v51 = vsub.f32 %v5087_v31, %v5088_v45 }
 0x1da   : > { %9794 = vmatpush3.xpose.msra.mxu0 %v6364_v58  ;;  %9795 = vmatprep.mubr.msk.f32.mxu0 %vm10787_vm1, %v10786_v9 }
 0x1db   : > { %9798 = vmatprep.subr.mxu0 %v10786_v9  ;;  %v5090_v34 = vand.u32 4294901760, %v5089_v51 }
 0x1dd   : > { %9796 = vmatmul.mubr.f32.vlgmr.msra.gmra.mrb[12].mxu0 %v6433_v25 }
 0x1de   : > { %9799 = vmatpush3.xpose.msra.mxu0 %v6444_v61  ;;  %9800 = vmatprep.mubr.msk.f32.mxu0 %vm10787_vm1, %v10786_v9 }
 0x1df   : > { %9803 = vmatprep.subr.mxu0 %v10786_v9 }
 0x1e5   : > { %9801 = vmatmul.mubr.f32.vlgmr.msra.gmra.mrb[12].mxu0 %v6429_v16 }
 0x1e6   : > { %9804 = vmatpush3.xpose.msra.mxu0 %v6441_v52  ;;  %9805 = vmatprep.mubr.msk.f32.mxu0 %vm10787_vm1, %v10786_v9 }
 0x1e7   : > { %9808 = vmatprep.subr.mxu0 %v10786_v9 }
 0x1ed   : > { %9806 = vmatmul.mubr.f32.vlgmr.msra.gmra.mrb[12].mxu0 %v6430_v59 }
 0x1ee   : > { %9809 = vmatpush3.xpose.msra.mxu0 %v6364_v58  ;;  %9810 = vmatprep.mubr.msk.f32.mxu0 %vm10787_vm1, %v10786_v9 }
 0x1ef   : > { %9813 = vmatprep.subr.mxu0 %v10786_v9 }
 0x1f5   : > { %9811 = vmatmul.mubr.f32.vlgmr.msra.gmra.mrb[12].mxu0 %v6431_v1 }
 0x1f6   : > { %9814 = vmatpush3.xpose.msra.mxu0 %v6442_v26  ;;  %9815 = vmatprep.mubr.msk.f32.mxu0 %vm10787_vm1, %v10786_v9 }
 0x1f7   : > { %9818 = vmatprep.subr.mxu0 %v10786_v9 }
 0x1fd   : > { %9816 = vmatmul.mubr.f32.vlgmr.msra.gmra.mrb[12].mxu0 %v6429_v16 }
 0x1fe   : > { %9819 = vmatpush3.xpose.msra.mxu0 %v6364_v58  ;;  %9820 = vmatprep.mubr.msk.f32.mxu0 %vm10787_vm1, %v10786_v9 }
 0x205   : > { %9821 = vmatmul.mubr.f32.vlgmr.msra.gmra.mrb[12].mxu0 %v6429_v16 }
 0x251   : > { %v11848_v39 = vpop.f32.mrb[4].mxu1 }
 0x252   : > { %v11852_v56 = vpop.f32.mrb[5].mxu1  ;;  %v5916_v20 = vand.u32 4294901760, %v11848_v39 }
 0x254   : > { %v4086_v37 = vpop.f32.mrb[6].mxu0  ;;  %v5993_v41 = vsub.f32 %v11848_v39, %v5916_v20 }
 0x255   : > { %v9642_v10 = vpop.f32.mrb[7].mxu0  ;;  %v4091_v38 = vsel %vm4090_vm2, %v4086_v37, -inf }
 0x256   : > { %4092 = vmax.xlane.f32.xlu0 %v4091_v38  ;;  %v5994_v58 = vand.u32 4294901760, %v5993_v41  ;;  %v11925_v10 = vand.u32 4294901760, %v11852_v56 }
 0x258   : > { %v5995_v1 = vsub.f32 %v5993_v41, %v5994_v58  ;;  %v11929_v38 = vsub.f32 %v11852_v56, %v11925_v10 }
 0x25a   : > { %v5996_v60 = vand.u32 4294901760, %v5995_v1  ;;  %v3585_v1 = vld [vmem:[%s13335_s4 + $0x30] sm:$0xff] }
 0x280   : > { %v4993_v50 = vpop.f32.mrb[8].mxu0 }
 0x281   : > { %v9702_v53 = vpop.f32.mrb[9].mxu0  ;;  %v4997_v22 = vsel %vm4090_vm2, %v4993_v50, -inf }
 0x282   : > { %4998 = vmax.xlane.f32.xlu0 %v4997_v22 }
 0x2ac   : > { %v11850_v49 = vpop.f32.mrb[10].mxu0 }
 0x2ad   : > { %v9762_v32 = vpop.f32.mrb[11].mxu0  ;;  %v5903_v62 = vsel %vm4090_vm2, %v11850_v49, -inf }
 0x2ae   : > { %5904 = vmax.xlane.f32.xlu1 %v5903_v62 }
 0x2d8   : > { %v11856_v40 = vpop.f32.mrb[12].mxu0 }
 0x2d9   : > { %v9822_v12 = vpop.f32.mrb[13].mxu0  ;;  %v6809_v63 = vsel %vm4090_vm2, %v11856_v40, -inf }
 0x2da   : > { %6810 = vmax.xlane.f32.xlu1 %v6809_v63  ;;  %v3595_v12 = vld [vmem:[%s13335_s4 + $0x80] sm:$0xff] }
 0x2e3   : > { %v4093_v47 = vpop.xlane.xlu0 %4092 }
 0x2e4   : > { %v4094_v18 = vsub.f32 %v4086_v37, %v4093_v47 }
 0x2e6   : > { %v4095_v0 = vmul.f32 1.442695, %v4094_v18  ;;  %v3596_v18 = vld [vmem:[%s13335_s4 + $0x88] sm:$0xff] }
 0x2e8   : > { %10706 = vpow2.f32 %v4095_v0  ;;  %v7324_v0 = vand.u32 4294901760, %v3595_v12 }
 0x2f2   : > { %v10707_v55 = vpop.eup %10706 }
 0x2f3   : > { %v4101_v14 = vsel %vm4090_vm2, %v10707_v55, 0  ;;  %v4097_v24 = vsel %vm4090_vm2, %v10707_v55, 0.0  ;;  %v3580_v55 = vld [vmem:[%s13335_s4 + $0x8] sm:$0xff] }
 0x2f4   : > { %v4169_v13 = vand.u32 4294901760, %v4101_v14  ;;  %4098 = vadd.xlane.f32.xlu1 %v4097_v24 }
 0x2f6   : > { %v4170_v30 = vsub.f32 %v4101_v14, %v4169_v13  ;;  %v7327_v14 = vand.u32 4294901760, %v3596_v18 }
 0x2f8   : > { %v4171_v7 = vand.u32 4294901760, %v4170_v30 }
 0x2fa   : > { %v4172_v57 = vsub.f32 %v4170_v30, %v4171_v7 }
 0x2fc   : > { %v4173_v5 = vand.u32 4294901760, %v4172_v57  ;;  %v11979_v57 = vsub.f32 %v3596_v18, %v7327_v14 }
 0x2fe   : > { %9646 = vmatmul.mubr.f32.vlgmr.msra.gmra.mrb[6].mxu1 %v4173_v5 }
 0x2ff   : > { %9649 = vmatpush3.msra.mxu1 %v4184_v28  ;;  %9650 = vmatprep.mubr.msk.f32.mxu1 %vm10787_vm1, %v10786_v9  ;;  %v3582_v28 = vld [vmem:[%s13335_s4 + $0x18] sm:$0xff] }
 0x300   : > { %9653 = vmatprep.subr.mxu1 %v10786_v9 }
 0x306   : > { %9651 = vmatmul.mubr.f32.vlgmr.msra.gmra.mrb[6].mxu1 %v4169_v13 }
 0x307   : > { %9654 = vmatpush3.msra.mxu1 %v4181_v36  ;;  %9655 = vmatprep.mubr.msk.f32.mxu1 %vm10787_vm1, %v10786_v9  ;;  %v3579_v36 = vld [vmem:[%s13335_s4] sm:$0xff] }
 0x308   : > { %9658 = vmatprep.subr.mxu1 %v10786_v9  ;;  %v7276_v24 = vand.u32 4294901760, %v3579_v36 }
 0x30a   : > { %v11981_v5 = vsub.f32 %v3579_v36, %v7276_v24 }
 0x30e   : > { %9656 = vmatmul.mubr.f32.vlgmr.msra.gmra.mrb[6].mxu1 %v4170_v30  ;;  %v3597_v30 = vld [vmem:[%s13335_s4 + $0x90] sm:$0xff] }
 0x30f   : > { %9659 = vmatpush3.msra.mxu1 %v11779_v48  ;;  %v4999_v17 = vpop.xlane.xlu0 %4998  ;;  %9660 = vmatprep.mubr.msk.f32.mxu1 %vm10787_vm1, %v10786_v9 }
 0x310   : > { %v5000_v4 = vsub.f32 %v4993_v50, %v4999_v17  ;;  %9663 = vmatprep.subr.mxu1 %v10786_v9  ;;  %v11986_v17 = vpack.c.bf16 %v7327_v14, %v7324_v0 }
 0x312   : > { %v5001_v33 = vmul.f32 1.442695, %v5000_v4  ;;  %10142 = vmatprep.subr.bf16.mxu0 %v11986_v17 }
 0x314   : > { %10708 = vpow2.f32 %v5001_v33 }
 0x316   : > { %9661 = vmatmul.mubr.f32.vlgmr.msra.gmra.mrb[6].mxu1 %v4171_v7  ;;  %v3598_v7 = vld [vmem:[%s13335_s4 + $0x98] sm:$0xff] }
 0x317   : > { %9664 = vmatpush3.msra.mxu1 %v4182_v21  ;;  %9665 = vmatprep.mubr.msk.f32.mxu1 %vm10787_vm1, %v10786_v9  ;;  %v7279_v21 = vand.u32 4294901760, %v3580_v55 }
 0x318   : > { %9668 = vmatprep.subr.mxu1 %v10786_v9 }
 0x319   : > { %v11990_v33 = vsub.f32 %v3580_v55, %v7279_v21 }
 0x31b   : > { %v13347_v51 = vand.u32 4294901760, %v11990_v33 }
 0x31e   : > { %v10709_v29 = vpop.eup %10708  ;;  %9666 = vmatmul.mubr.f32.vlgmr.msra.gmra.mrb[6].mxu1 %v4169_v13 }
 0x31f   : > { %v5007_v3 = vsel %vm4090_vm2, %v10709_v29, 0  ;;  %9669 = vmatpush3.msra.mxu1 %v11779_v48  ;;  %v5003_v54 = vsel %vm4090_vm2, %v10709_v29, 0.0  ;;  %9670 = vmatprep.mubr.msk.f32.mxu1 %vm10787_vm1, %v10786_v9  ;;  %v7282_v29 = vand.u32 4294901760, %v3581_v11 }
 0x320   : > { %v5075_v6 = vand.u32 4294901760, %v5007_v3  ;;  %5004 = vadd.xlane.f32.xlu0 %v5003_v54  ;;  %9703 = vmatprep.subr.mxu1 %v10786_v9  ;;  %v7285_v54 = vand.u32 4294901760, %v3582_v28 }
 0x322   : > { %v5076_v2 = vsub.f32 %v5007_v3, %v5075_v6  ;;  %v11995_v3 = vpack.c.bf16 %v7279_v21, %v7276_v24 }
 0x324   : > { %v5077_v44 = vand.u32 4294901760, %v5076_v2  ;;  %10144 = vmatpush3.bf16.msra.mxu0 %v11995_v3 }
 0x326   : > { %9671 = vmatmul.mubr.f32.vlgmr.msra.gmra.mrb[6].mxu1 %v4169_v13  ;;  %v5078_v27 = vsub.f32 %v5076_v2, %v5077_v44  ;;  %v11968_v13 = vsub.f32 %v3595_v12, %v7324_v0  ;;  %v7294_v12 = vand.u32 4294901760, %v3585_v1 }
 0x327   : > { %9704 = vmatpush3.msra.mxu1 %v5010_v42  ;;  %9705 = vmatprep.mubr.msk.f32.mxu1 %vm10787_vm1, %v10786_v9 }
 0x328   : > { %9708 = vmatprep.subr.mxu1 %v10786_v9  ;;  %v5079_v48 = vand.u32 4294901760, %v5078_v27  ;;  %v13353_v4 = vand.u32 4294901760, %v11968_v13 }
 0x32a   : > { %9706 = vmatmul.mubr.f32.vlgmr.msra.gmra.mrb[8].mxu1 %v5079_v48  ;;  %v3599_v48 = vld [vmem:[%s13335_s4 + $0xa0] sm:$0xff] }
 0x32b   : > { %9709 = vmatpush3.msra.mxu1 %v5090_v34  ;;  %9710 = vmatprep.mubr.msk.f32.mxu1 %vm10787_vm1, %v10786_v9  ;;  %v3600_v34 = vld [vmem:[%s13335_s4 + $0xa8] sm:$0xff] }
 0x32c   : > { %9713 = vmatprep.subr.mxu1 %v10786_v9 }
 0x332   : > { %9711 = vmatmul.mubr.f32.vlgmr.msra.gmra.mrb[8].mxu1 %v5075_v6 }
 0x333   : > { %9714 = vmatpush3.msra.mxu1 %v5087_v31  ;;  %9715 = vmatprep.mubr.msk.f32.mxu1 %vm10787_vm1, %v10786_v9  ;;  %v7333_v31 = vand.u32 4294901760, %v3598_v7 }
 0x334   : > { %9718 = vmatprep.subr.mxu1 %v10786_v9 }
 0x33a   : > { %9716 = vmatmul.mubr.f32.vlgmr.msra.gmra.mrb[8].mxu1 %v5076_v2 }
 0x33b   : > { %9719 = vmatpush3.msra.mxu1 %v5010_v42  ;;  %v5905_v15 = vpop.xlane.xlu1 %5904  ;;  %9720 = vmatprep.mubr.msk.f32.mxu1 %vm10787_vm1, %v10786_v9 }
 0x33c   : > { %v5906_v19 = vsub.f32 %v11850_v49, %v5905_v15  ;;  %9723 = vmatprep.subr.mxu1 %v10786_v9  ;;  %v6900_v49 = vand.u32 4294901760, %v11929_v38  ;;  %v12016_v15 = vsub.f32 %v3598_v7, %v7333_v31 }
 0x33e   : > { %v5907_v23 = vmul.f32 1.442695, %v5906_v19  ;;  %v6901_v62 = vsub.f32 %v11929_v38, %v6900_v49  ;;  %v12018_v19 = vsub.f32 %v3581_v11, %v7282_v29 }
 0x340   : > { %10710 = vpow2.f32 %v5907_v23  ;;  %v6902_v47 = vand.u32 4294901760, %v6901_v62  ;;  %v3583_v23 = vld [vmem:[%s13335_s4 + $0x20] sm:$0xff] }
 0x342   : > { %9721 = vmatmul.mubr.f32.vlgmr.msra.gmra.mrb[8].mxu1 %v5077_v44  ;;  %v7503_v44 = vsub.f32 %v11968_v13, %v13353_v4 }
 0x343   : > { %9724 = vmatpush3.msra.mxu1 %v5088_v45  ;;  %9725 = vmatprep.mubr.msk.f32.mxu1 %vm10787_vm1, %v10786_v9  ;;  %v13349_v45 = vand.u32 4294901760, %v11981_v5 }
 0x344   : > { %9728 = vmatprep.subr.mxu1 %v10786_v9 }
 0x34a   : > { %v10711_v35 = vpop.eup %10710  ;;  %9726 = vmatmul.mubr.f32.vlgmr.msra.gmra.mrb[8].mxu1 %v5075_v6 }
 0x34b   : > { %v5913_v43 = vsel %vm4090_vm2, %v10711_v35, 0  ;;  %9729 = vmatpush3.msra.mxu1 %v5010_v42  ;;  %v5909_v8 = vsel %vm4090_vm2, %v10711_v35, 0.0  ;;  %9730 = vmatprep.mubr.msk.f32.mxu1 %vm10787_vm1, %v10786_v9  ;;  %v7330_v42 = vand.u32 4294901760, %v3597_v30  ;;  %v3584_v35 = vld [vmem:[%s13335_s4 + $0x28] sm:$0xff] }
 0x34c   : > { %v5981_v16 = vand.u32 4294901760, %v5913_v43  ;;  %5910 = vadd.xlane.f32.xlu1 %v5909_v8  ;;  %9763 = vmatprep.subr.mxu1 %v10786_v9 }
 0x34d   : > { %v12002_v2 = vpack.c.bf16 %v7333_v31, %v7330_v42  ;;  %v12008_v27 = vsub.f32 %v3597_v30, %v7330_v42 }
 0x34e   : > { %v5982_v59 = vsub.f32 %v5913_v43, %v5981_v16  ;;  %v3601_v43 = vld [vmem:[%s13335_s4 + $0xb0] sm:$0xff] }
 0x34f   : > { %10146 = vmatprep.subr.bf16.mxu0 %v12002_v2 }
 0x350   : > { %v5983_v52 = vand.u32 4294901760, %v5982_v59 }
 0x352   : > { %9731 = vmatmul.mubr.f32.vlgmr.msra.gmra.mrb[8].mxu1 %v5075_v6  ;;  %v5984_v26 = vsub.f32 %v5982_v59, %v5983_v52  ;;  %v13352_v6 = vand.u32 4294901760, %v11979_v57 }
 0x353   : > { %9764 = vmatpush3.msra.mxu1 %v5916_v20  ;;  %9765 = vmatprep.mubr.msk.f32.mxu1 %vm10787_vm1, %v10786_v9 }
 0x354   : > { %9768 = vmatprep.subr.mxu1 %v10786_v9  ;;  %v5985_v46 = vand.u32 4294901760, %v5984_v26  ;;  %v7510_v8 = vsub.f32 %v11979_v57, %v13352_v6  ;;  %v7504_v26 = vand.u32 4294901760, %v7503_v44  ;;  %v12098_v44 = vsub.f32 %v3585_v1, %v7294_v12 }
 0x356   : > { %9766 = vmatmul.mubr.f32.vlgmr.msra.gmra.mrb[10].mxu1 %v5985_v46  ;;  %v7398_v46 = vsub.f32 %v11990_v33, %v13347_v51 }
 0x357   : > { %9769 = vmatpush3.msra.mxu1 %v5996_v60  ;;  %9770 = vmatprep.mubr.msk.f32.mxu1 %vm10787_vm1, %v10786_v9  ;;  %v13345_v60 = vand.u32 4294901760, %v12008_v27 }
 0x358   : > { %9773 = vmatprep.subr.mxu1 %v10786_v9  ;;  %v7399_v14 = vand.u32 4294901760, %v7398_v46 }
 0x359   : > { %v7517_v24 = vsub.f32 %v12008_v27, %v13345_v60 }
 0x35e   : > { %9771 = vmatmul.mubr.f32.vlgmr.msra.gmra.mrb[10].mxu1 %v5981_v16 }
 0x35f   : > { %9774 = vmatpush3.msra.mxu1 %v5993_v41  ;;  %9775 = vmatprep.mubr.msk.f32.mxu1 %vm10787_vm1, %v10786_v9  ;;  %v12026_v41 = vsub.f32 %v3582_v28, %v7285_v54  ;;  %v3603_v28 = vld [vmem:[%s13335_s4 + $0xc0] sm:$0xff] }
 0x360   : > { %9778 = vmatprep.subr.mxu1 %v10786_v9 }
 0x361   : > { %v13340_v62 = vand.u32 4294901760, %v12026_v41 }
 0x366   : > { %9776 = vmatmul.mubr.f32.vlgmr.msra.gmra.mrb[10].mxu1 %v5982_v59  ;;  %v7339_v59 = vand.u32 4294901760, %v3600_v34 }
 0x367   : > { %9779 = vmatpush3.msra.mxu1 %v5916_v20  ;;  %v6811_v25 = vpop.xlane.xlu1 %6810  ;;  %9780 = vmatprep.mubr.msk.f32.mxu1 %vm10787_vm1, %v10786_v9 }
 0x368   : > { %v6812_v61 = vsub.f32 %v11856_v40, %v6811_v25  ;;  %9783 = vmatprep.subr.mxu1 %v10786_v9  ;;  %v7288_v25 = vand.u32 4294901760, %v3583_v23  ;;  %v12066_v0 = vsub.f32 %v3600_v34, %v7339_v59 }
 0x36a   : > { %v6813_v37 = vmul.f32 1.442695, %v6812_v61  ;;  %v3586_v61 = vld [vmem:[%s13335_s4 + $0x38] sm:$0xff]  ;;  %v12071_v21 = vsub.f32 %v3583_v23, %v7288_v25  ;;  %v13338_v34 = vand.u32 4294901760, %v12066_v0 }
 0x36b   : > { %v7297_v36 = vand.u32 4294901760, %v3586_v61 }
 0x36c   : > { %10712 = vpow2.f32 %v6813_v37  ;;  %v13343_v37 = vand.u32 4294901760, %v12016_v15 }
 0x36d   : > { %v12102_v23 = vsub.f32 %v3586_v61, %v7297_v36  ;;  %v3588_v61 = vld [vmem:[%s13335_s4 + $0x48] sm:$0xff] }
 0x36e   : > { %9781 = vmatmul.mubr.f32.vlgmr.msra.gmra.mrb[10].mxu1 %v5983_v52  ;;  %v3602_v52 = vld [vmem:[%s13335_s4 + $0xb8] sm:$0xff]  ;;  %v7524_v30 = vsub.f32 %v12016_v15, %v13343_v37 }
 0x36f   : > { %9784 = vmatpush3.msra.mxu1 %v5994_v58  ;;  %9785 = vmatprep.mubr.msk.f32.mxu1 %vm10787_vm1, %v10786_v9  ;;  %v7336_v58 = vand.u32 4294901760, %v3599_v48 }
 0x370   : > { %9788 = vmatprep.subr.mxu1 %v10786_v9 }
 0x371   : > { %v12064_v18 = vsub.f32 %v3599_v48, %v7336_v58 }
 0x373   : > { %v13339_v48 = vand.u32 4294901760, %v12064_v18 }
 0x376   : > { %v10713_v50 = vpop.eup %10712  ;;  %9786 = vmatmul.mubr.f32.vlgmr.msra.gmra.mrb[10].mxu1 %v5981_v16 }
 0x377   : > { %v6819_v53 = vsel %vm4090_vm2, %v10713_v50, 0  ;;  %9789 = vmatpush3.msra.mxu1 %v5916_v20  ;;  %v6815_v22 = vsel %vm4090_vm2, %v10713_v50, 0.0  ;;  %9790 = vmatprep.mubr.msk.f32.mxu1 %vm10787_vm1, %v10786_v9  ;;  %v12024_v20 = vpack.c.bf16 %v7285_v54, %v7282_v29  ;;  %v13342_v50 = vand.u32 4294901760, %v12018_v19 }
 0x378   : > { %v11935_v39 = vand.u32 4294901760, %v6819_v53  ;;  %6816 = vadd.xlane.f32.xlu0 %v6815_v22  ;;  %9823 = vmatprep.subr.mxu1 %v10786_v9  ;;  %v7342_v22 = vand.u32 4294901760, %v3601_v43  ;;  %v12094_v29 = vsub.f32 %v12026_v41, %v13340_v62 }
 0x379   : > { %13435 = vst [vmem:[#allocation5_spill] sm:$0xff] %v12024_v20  ;;  %10148 = vmatpush3.bf16.msra.mxu0 %v12024_v20  ;;  %v12089_v31 = vsub.f32 %v12018_v19, %v13342_v50 }
 0x37a   : > { %v11940_v56 = vsub.f32 %v6819_v53, %v11935_v39  ;;  %v7291_v53 = vand.u32 4294901760, %v3584_v35  ;;  %v12079_v11 = vsub.f32 %v3601_v43, %v7342_v22 }
 0x37c   : > { %v6889_v32 = vand.u32 4294901760, %v11940_v56  ;;  %v12077_v7 = vsub.f32 %v3584_v35, %v7291_v53  ;;  %v12084_v42 = vpack.c.bf16 %v7291_v53, %v7288_v25  ;;  %v13346_v1 = vand.u32 4294901760, %v12079_v11  ;;  %v3605_v53 = vld [vmem:[%s13335_s4 + $0xd0] sm:$0xff] }
 0x37d   : > { %v13351_v25 = vand.u32 4294901760, %v12098_v44 }
 0x37e   : > { %9791 = vmatmul.mubr.f32.vlgmr.msra.gmra.mrb[10].mxu1 %v5981_v16  ;;  %v6890_v40 = vsub.f32 %v11940_v56, %v6889_v32  ;;  %v7391_v16 = vsub.f32 %v11981_v5, %v13349_v45  ;;  %13437 = vst [vmem:[#allocation7_spill] sm:$0xff] %v12084_v42 }
 0x37f   : > { %9824 = vmatpush3.msra.mxu1 %v11925_v10  ;;  %9825 = vmatprep.mubr.msk.f32.mxu1 %vm10787_vm1, %v10786_v9 }
 0x380   : > { %9828 = vmatprep.subr.mxu1 %v10786_v9  ;;  %v6891_v63 = vand.u32 4294901760, %v6890_v40  ;;  %v7345_v40 = vand.u32 4294901760, %v3602_v52  ;;  %v7392_v55 = vand.u32 4294901760, %v7391_v16  ;;  %v13341_v16 = vand.u32 4294901760, %v12071_v21 }
 0x382   : > { %9826 = vmatmul.mubr.f32.vlgmr.msra.gmra.mrb[12].mxu1 %v6891_v63  ;;  %v12062_v63 = vpack.c.bf16 %v7339_v59, %v7336_v58  ;;  %v12096_v54 = vsub.f32 %v3602_v52, %v7345_v40  ;;  %v12105_v35 = vpack.c.bf16 %v7345_v40, %v7342_v22  ;;  %v7348_v58 = vand.u32 4294901760, %v3603_v28 }
 0x383   : > { %9829 = vmatpush3.msra.mxu1 %v6902_v47  ;;  %9830 = vmatprep.mubr.msk.f32.mxu1 %vm10787_vm1, %v10786_v9  ;;  %v7511_v47 = vand.u32 4294901760, %v7510_v8  ;;  %v12109_v8 = vpack.c.bf16 %v7399_v14, %v7392_v55  ;;  %v7518_v59 = vand.u32 4294901760, %v7517_v24  ;;  %v13344_v52 = vand.u32 4294901760, %v12077_v7 }
 0x384   : > { %9833 = vmatprep.subr.mxu1 %v10786_v9  ;;  %13436 = vst [vmem:[#allocation6_spill] sm:$0xff] %v12062_v63  ;;  %10150 = vmatprep.subr.bf16.mxu0 %v12062_v63  ;;  %13438 = vst [vmem:[#allocation8_spill] sm:$0xff] %v12105_v35  ;;  %v13348_v46 = vand.u32 4294901760, %v12096_v54  ;;  %v7413_v22 = vand.u32 4294901760, %v12094_v29  ;;  %v7531_v40 = vsub.f32 %v12064_v18, %v13339_v48  ;;  %v7354_v48 = vand.u32 4294901760, %v3605_v53 }
 0x385   : > { %10152 = vmatpush3.bf16.msra.mxu0 %v12084_v42  ;;  %v10173_v43 = vpack.c.bf16 %v7511_v47, %v7504_v26  ;;  %v12124_v26 = vpack.c.bf16 %v7297_v36, %v7294_v12  ;;  %v7538_v12 = vsub.f32 %v12066_v0, %v13338_v34  ;;  %v13350_v47 = vand.u32 4294901760, %v12102_v23  ;;  %v3606_v36 = vld [vmem:[%s13335_s4 + $0xd8] sm:$0xff] }
 0x386   : > { %10154 = vmatprep.subr.bf16.mxu0 %v12105_v35  ;;  %v7419_v55 = vsub.f32 %v12071_v21, %v13341_v16  ;;  %v12152_v24 = vsub.f32 %v3603_v28, %v7348_v58  ;;  %v7545_v29 = vsub.f32 %v12079_v11, %v13346_v1  ;;  %v7303_v34 = vand.u32 4294901760, %v3588_v61 }
 0x387   : > { %13439 = vst [vmem:[#allocation9_spill] sm:$0xff] %v12124_v26  ;;  %v7552_v62 = vsub.f32 %v12096_v54, %v13348_v46  ;;  %v7433_v28 = vsub.f32 %v12098_v44, %v13351_v25  ;;  %v7357_v16 = vand.u32 4294901760, %v3606_v36  ;;  %v7539_v60 = vand.u32 4294901760, %v7538_v12 }
 0x388   : > { %v7440_v1 = vsub.f32 %v12102_v23, %v13350_v47  ;;  %v12194_v12 = vsub.f32 %v3588_v61, %v7303_v34  ;;  %v7546_v47 = vand.u32 4294901760, %v7545_v29  ;;  %v13444_v61 = vand.u32 4294901760, %v12152_v24 }
 0x389   : > { %10156 = vmatpush3.bf16.msra.mxu0 %v12124_v26  ;;  %v7553_v25 = vand.u32 4294901760, %v7552_v62  ;;  %v7434_v6 = vand.u32 4294901760, %v7433_v28  ;;  %v12198_v4 = vsub.f32 %v3606_v36, %v7357_v16 }
 0x38a   : > { %9831 = vmatmul.mubr.f32.vlgmr.msra.gmra.mrb[12].mxu1 %v11935_v39 }
 0x38b   : > { %9834 = vmatpush3.msra.mxu1 %v11929_v38  ;;  %9835 = vmatprep.mubr.msk.f32.mxu1 %vm10787_vm1, %v10786_v9  ;;  %v7525_v38 = vand.u32 4294901760, %v7524_v30 }
 0x38c   : > { %9838 = vmatprep.subr.mxu1 %v10786_v9 }
 0x38d   : > { %v12168_v37 = vpack.c.bf16 %v7525_v38, %v7518_v59  ;;  %v3590_v59 = vld [vmem:[%s13335_s4 + $0x58] sm:$0xff]  ;;  %v3607_v38 = vld [vmem:[%s13335_s4 + $0xe0] sm:$0xff] }
 0x38e   : > { %v7309_v51 = vand.u32 4294901760, %v3590_v59 }
 0x390   : > { %v12227_v29 = vsub.f32 %v3590_v59, %v7309_v51 }
 0x392   : > { %9836 = vmatmul.mubr.f32.vlgmr.msra.gmra.mrb[12].mxu1 %v11940_v56  ;;  %v3604_v56 = vld [vmem:[%s13335_s4 + $0xc8] sm:$0xff] }
 0x393   : > { %9839 = vmatpush3.msra.mxu1 %v11925_v10  ;;  %9840 = vmatprep.mubr.msk.f32.mxu1 %vm10787_vm1, %v10786_v9  ;;  %v7351_v14 = vand.u32 4294901760, %v3604_v56 }
 0x394   : > { %9843 = vmatprep.subr.mxu1 %v10786_v9 }
 0x395   : > { %v12166_v50 = vpack.c.bf16 %v7351_v14, %v7348_v58  ;;  %v12175_v46 = vsub.f32 %v3604_v56, %v7351_v14  ;;  %v3589_v58 = vld [vmem:[%s13335_s4 + $0x50] sm:$0xff]  ;;  %v7420_v56 = vand.u32 4294901760, %v7419_v55  ;;  %v12196_v14 = vsub.f32 %v3605_v53, %v7354_v48 }
 0x396   : > { %v12204_v55 = vpack.c.bf16 %v7357_v16, %v7354_v48 }
 0x397   : > { %13440 = vst [vmem:[#allocation10_spill] sm:$0xff] %v12166_v50  ;;  %13441 = vst [vmem:[#allocation11_spill] sm:$0xff] %v12175_v46  ;;  %10158 = vmatprep.subr.bf16.mxu0 %v12166_v50  ;;  %v13356_v62 = vand.u32 4294901760, %v12175_v46 }
 0x398   : > { %13443 = vst [vmem:[#allocation13_spill] sm:$0xff] %v12204_v55 }
 0x39a   : > { %9841 = vmatmul.mubr.f32.vlgmr.msra.gmra.mrb[12].mxu1 %v6889_v32  ;;  %v3587_v32 = vld [vmem:[%s13335_s4 + $0x40] sm:$0xff] }
 0x39b   : > { %9844 = vmatpush3.msra.mxu1 %v6900_v49  ;;  %9845 = vmatprep.mubr.msk.f32.mxu1 %vm10787_vm1, %v10786_v9  ;;  %v7406_v49 = vand.u32 4294901760, %v12089_v31  ;;  %v7300_v30 = vand.u32 4294901760, %v3587_v32  ;;  %v7426_v31 = vsub.f32 %v12077_v7, %v13344_v52  ;;  %v7532_v52 = vand.u32 4294901760, %v7531_v40 }
 0x39c   : > { %9848 = vmatprep.subr.mxu1 %v10786_v9 }
 0x39d   : > { %v12177_v45 = vsub.f32 %v3587_v32, %v7300_v30  ;;  %v12189_v40 = vpack.c.bf16 %v7303_v34, %v7300_v30  ;;  %v7427_v32 = vand.u32 4294901760, %v7426_v31  ;;  %v7306_v30 = vand.u32 4294901760, %v3589_v58 }
 0x39e   : > { %v7441_v34 = vand.u32 4294901760, %v7440_v1  ;;  %v10179_v36 = vpack.c.bf16 %v7413_v22, %v7406_v49  ;;  %v10181_v48 = vpack.c.bf16 %v7539_v60, %v7532_v52  ;;  %v10185_v1 = vpack.c.bf16 %v7553_v25, %v7546_v47  ;;  %v3592_v49 = vld [vmem:[%s13335_s4 + $0x68] sm:$0xff]  ;;  %v3609_v60 = vld [vmem:[%s13335_s4 + $0xf0] sm:$0xff]  ;;  %v3610_v52 = vld [vmem:[%s13335_s4 + $0xf8] sm:$0xff] }
 0x39f   : > { %13442 = vst [vmem:[#allocation12_spill] sm:$0xff] %v12189_v40  ;;  %10160 = vmatpush3.bf16.msra.mxu0 %v12189_v40  ;;  %v12216_v28 = vpack.c.bf16 %v7309_v51, %v7306_v30  ;;  %v10183_v16 = vpack.c.bf16 %v7427_v32, %v7420_v56  ;;  %v13369_v22 = vand.u32 4294901760, %v12198_v4  ;;  %v12225_v31 = vsub.f32 %v3589_v58, %v7306_v30 }
 0x3a0   : > { %10162 = vmatprep.subr.bf16.mxu0 %v12204_v55  ;;  %v12239_v25 = vpack.c.bf16 %v7441_v34, %v7434_v6  ;;  %v7566_v51 = vsub.f32 %v12175_v46, %v13356_v62  ;;  %v13446_v58 = vand.u32 4294901760, %v12177_v45  ;;  %v7315_v30 = vand.u32 4294901760, %v3592_v49  ;;  %v3593_v34 = vld [vmem:[%s13335_s4 + $0x70] sm:$0xff] }
 0x3a1   : > { %13445 = vst [vmem:[#allocation14_spill] sm:$0xff] %v12216_v28  ;;  %v7318_v26 = vand.u32 4294901760, %v3593_v34 }
 0x3a2   : > { %9846 = vmatmul.mubr.f32.vlgmr.msra.gmra.mrb[12].mxu1 %v11935_v39  ;;  %v7447_v59 = vsub.f32 %v12177_v45, %v13446_v58  ;;  %v7366_v58 = vand.u32 4294901760, %v3609_v60 }
 0x3a3   : > { %9849 = vmatpush3.msra.mxu1 %v11925_v10  ;;  %9850 = vmatprep.mubr.msk.f32.mxu1 %vm10787_vm1, %v10786_v9  ;;  %v3608_v9 = vld [vmem:[%s13335_s4 + $0xe8] sm:$0xff]  ;;  %v7360_v10 = vand.u32 4294901760, %v3607_v38 }
 0x3a4   : > { %10174 = vmatprep.subr.bf16.mxu1 %v10173_v43  ;;  %v12209_v43 = vsub.f32 %v12152_v24, %v13444_v61  ;;  %v7363_v40 = vand.u32 4294901760, %v3608_v9  ;;  %v3591_v61 = vld [vmem:[%s13335_s4 + $0x60] sm:$0xff]  ;;  %10164 = vmatpush3.bf16.msra.mxu0 %v12216_v28  ;;  %v12282_v28 = vsub.f32 %v3609_v60, %v7366_v58  ;;  %v13451_v60 = vand.u32 4294901760, %v12227_v29 }
 0x3a5   : > { %v12229_v53 = vsub.f32 %v3607_v38, %v7360_v10  ;;  %v13447_v38 = vand.u32 4294901760, %v12194_v12  ;;  %v7312_v32 = vand.u32 4294901760, %v3591_v61 }
 0x3a6   : > { %v7560_v47 = vand.u32 4294901760, %v12209_v43  ;;  %v3594_v43 = vld [vmem:[%s13335_s4 + $0x78] sm:$0xff]  ;;  %v12264_v62 = vpack.c.bf16 %v7363_v40, %v7360_v10  ;;  %v7448_v10 = vand.u32 4294901760, %v7447_v59 }
 0x3a7   : > { %v7454_v56 = vsub.f32 %v12194_v12, %v13447_v38  ;;  %v7369_v38 = vand.u32 4294901760, %v3610_v52  ;;  %v7321_v35 = vand.u32 4294901760, %v3594_v43  ;;  %v12277_v42 = vsub.f32 %v3591_v61, %v7312_v32 }
 0x3a8   : > { %13449 = vst [vmem:[#allocation15_spill] sm:$0xff] %v12264_v62  ;;  %10166 = vmatprep.subr.bf16.mxu0 %v12264_v62  ;;  %v10205_v61 = vpack.c.bf16 %v11979_v57, %v11968_v13 }
 0x3a9   : > { %v12284_v50 = vsub.f32 %v3610_v52, %v7369_v38  ;;  %v12287_v62 = vpack.c.bf16 %v7321_v35, %v7318_v26  ;;  %v7455_v63 = vand.u32 4294901760, %v7454_v56  ;;  %v7468_v52 = vsub.f32 %v12227_v29, %v13451_v60 }
 0x3aa   : > { %9851 = vmatmul.mubr.f32.vlgmr.msra.gmra.mrb[12].mxu1 %v11935_v39  ;;  %v13448_v39 = vand.u32 4294901760, %v12196_v14  ;;  %v10207_v56 = vpack.c.bf16 %v11990_v33, %v11981_v5 }
 0x3ab   : > { %10176 = vmatpush3.bf16.msra.mxu1 %v12109_v8  ;;  %v12262_v8 = vsub.f32 %v3608_v9, %v7363_v40  ;;  %v12275_v9 = vpack.c.bf16 %v7369_v38, %v7366_v58  ;;  %v7567_v40 = vand.u32 4294901760, %v7566_v51  ;;  %v13452_v51 = vand.u32 4294901760, %v12229_v53 }
 0x3ac   : > { %v7573_v6 = vsub.f32 %v12196_v14, %v13448_v39  ;;  %10178 = vmatprep.subr.bf16.mxu1 %v12168_v37  ;;  %v7580_v39 = vsub.f32 %v12198_v4, %v13369_v22  ;;  %v12273_v37 = vpack.c.bf16 %v7315_v30, %v7312_v32  ;;  %v12279_v22 = vsub.f32 %v3592_v49, %v7315_v30 }
 0x3ad   : > { %v13378_v55 = vand.u32 4294901760, %v12262_v8  ;;  %v7587_v59 = vsub.f32 %v12229_v53, %v13452_v51  ;;  %v12305_v30 = vsub.f32 %v3593_v34, %v7318_v26  ;;  %v12307_v58 = vsub.f32 %v3594_v43, %v7321_v35 }
 0x3ae   : > { %10168 = vmatpush3.bf16.msra.mxu0 %v12273_v37  ;;  %v7574_v20 = vand.u32 4294901760, %v7573_v6  ;;  %v13377_v6 = vand.u32 4294901760, %v12277_v42  ;;  %v13376_v32 = vand.u32 4294901760, %v12279_v22  ;;  %v10189_v38 = vpack.c.bf16 %v7567_v40, %v7560_v47 }
 0x3af   : > { %10180 = vmatpush3.bf16.msra.mxu1 %v10179_v36  ;;  %v7581_v36 = vand.u32 4294901760, %v7580_v39  ;;  %10170 = vmatprep.subr.bf16.mxu0 %v12275_v9  ;;  %v7594_v39 = vsub.f32 %v12262_v8, %v13378_v55  ;;  %v7607_v60 = vand.u32 4294901760, %v12284_v50  ;;  %v7469_v34 = vand.u32 4294901760, %v7468_v52 }
 0x3b0   : > { %10182 = vmatprep.subr.bf16.mxu1 %v10181_v48  ;;  %v13450_v48 = vand.u32 4294901760, %v12225_v31  ;;  %v7475_v43 = vsub.f32 %v12277_v42, %v13377_v6  ;;  %v7495_v40 = vand.u32 4294901760, %v12307_v58  ;;  %v10217_v26 = vpack.c.bf16 %v12096_v54, %v12079_v11 }
 0x3b1   : > { %v10193_v51 = vpack.c.bf16 %v7581_v36, %v7574_v20  ;;  %v7482_v20 = vsub.f32 %v12279_v22, %v13376_v32 }
 0x3b2   : > { %v7461_v49 = vsub.f32 %v12225_v31, %v13450_v48  ;;  %v7600_v48 = vand.u32 4294901760, %v12282_v28  ;;  %10172 = vmatpush3.bf16.msra.mxu0 %v12287_v62  ;;  %v7496_v55 = vsub.f32 %v12307_v58, %v7495_v40 }
 0x3b3   : > { %10184 = vmatpush3.bf16.msra.mxu1 %v10183_v16  ;;  %v10191_v16 = vpack.c.bf16 %v7455_v63, %v7448_v10  ;;  %10206 = vmatprep.subr.bf16.mxu0 %v10205_v61  ;;  %v7488_v63 = vand.u32 4294901760, %v12305_v30  ;;  %v7595_v10 = vand.u32 4294901760, %v7594_v39  ;;  %v7608_v61 = vsub.f32 %v12284_v50, %v7607_v60 }
 0x3b4   : > { %10186 = vmatprep.subr.bf16.mxu1 %v10185_v1  ;;  %v7462_v35 = vand.u32 4294901760, %v7461_v49  ;;  %v7588_v1 = vand.u32 4294901760, %v7587_v59  ;;  %v7601_v36 = vsub.f32 %v12282_v28, %v7600_v48  ;;  %v7476_v59 = vand.u32 4294901760, %v7475_v43  ;;  %v12445_v43 = vld [vmem:[%s13335_s4 + $0x1f8] sm:$0xff] }
 0x3b5   : > { %v7483_v32 = vand.u32 4294901760, %v7482_v20  ;;  %v7489_v6 = vsub.f32 %v12305_v30, %v7488_v63  ;;  %v7609_v47 = vand.u32 4294901760, %v7608_v61  ;;  %v12359_v61 = vpack.c.bf16 %v7495_v40, %v7488_v63  ;;  %13475 = vst [vmem:[#allocation21_spill] sm:$0xff] %v12445_v43 }
 0x3b6   : > { %v10195_v52 = vpack.c.bf16 %v7469_v34, %v7462_v35  ;;  %v7602_v39 = vand.u32 4294901760, %v7601_v36  ;;  %v12357_v36 = vpack.c.bf16 %v7607_v60, %v7600_v48 }
 0x3b7   : > { %10188 = vmatpush3.bf16.msra.mxu1 %v12239_v25  ;;  %v10219_v25 = vpack.c.bf16 %v12102_v23, %v12098_v44  ;;  %v10199_v49 = vpack.c.bf16 %v7483_v32, %v7476_v59  ;;  %v7490_v35 = vand.u32 4294901760, %v7489_v6  ;;  %13454 = vst [vmem:[#allocation17_spill] sm:$0xff] %v12359_v61  ;;  %v4099_v59 = vpop.xlane.xlu1 %4098  ;;  %v12414_v6 = vld [vmem:[%s13335_s4 + $0x1e0] sm:$0xff] }
 0x3b8   : > { %10190 = vmatprep.subr.bf16.mxu1 %v10189_v38  ;;  %v10197_v38 = vpack.c.bf16 %v7595_v10, %v7588_v1  ;;  %v10201_v34 = vpack.c.bf16 %v7609_v47, %v7602_v39  ;;  %13453 = vst [vmem:[#allocation16_spill] sm:$0xff] %v12357_v36  ;;  %10714 = vrcp.f32 %v4099_v59  ;;  %v13456_v59 = vld [vmem:[#allocation5_spill] sm:$0xff]  ;;  %v12433_v10 = vld [vmem:[%s13335_s4 + $0x168] sm:$0xff] }
 0x3b9   : > { %13473 = vst [vmem:[#allocation19_spill] sm:$0xff] %v12433_v10  ;;  %v12464_v36 = vld [vmem:[%s13335_s4 + $0x170] sm:$0xff] }
 0x3ba   : > { %13480 = vst [vmem:[#allocation24_spill] sm:$0xff] %v12464_v36 }
 0x3bb   : > { %10192 = vmatpush3.bf16.msra.mxu1 %v10191_v16  ;;  %v7497_v16 = vand.u32 4294901760, %v7496_v55  ;;  %v12428_v55 = vld [vmem:[%s13335_s4 + $0x160] sm:$0xff] }
 0x3bc   : > { %10194 = vmatprep.subr.bf16.mxu1 %v10193_v51 }
 0x3bd   : > { %v10203_v1 = vpack.c.bf16 %v7497_v16, %v7490_v35 }
 0x3bf   : > { %10196 = vmatpush3.bf16.msra.mxu1 %v10195_v52 }
 0x3c0   : > { %10198 = vmatprep.subr.bf16.mxu1 %v10197_v38  ;;  %v5005_v38 = vpop.xlane.xlu0 %5004 }
 0x3c1   : > { %10716 = vrcp.f32 %v5005_v38 }
 0x3c2   : > { %v10715_v39 = vpop.eup %10714 }
 0x3c3   : > { %10200 = vmatpush3.bf16.msra.mxu1 %v10199_v49 }
 0x3c4   : > { %10202 = vmatprep.subr.bf16.mxu1 %v10201_v34 }
 0x3c7   : > { %10204 = vmatpush3.bf16.msra.mxu1 %v10203_v1 }
 0x3c8   : > { %10238 = vmatprep.subr.bf16.mxu1 %v11986_v17 }
 0x3cb   : > { %v10717_v34 = vpop.eup %10716 }
 0x3f9   : > { %v4545_v49 = vpop.f32.mrb[6].mxu1 }
 0x3fa   : > { %v9672_v52 = vpop.f32.mrb[7].mxu1  ;;  %v4550_v35 = vmul.f32 %v10715_v39, %v4545_v49  ;;  %v13457_v39 = vld [vmem:[#allocation6_spill] sm:$0xff] }
 0x3fc   : > { %v12361_v16 = vand.u32 4294901760, %v4550_v35 }
 0x3fe   : > { %13455 = vst [vmem:[#allocation18_spill] sm:$0xff] %v12361_v16  ;;  %v12364_v1 = vsub.f32 %v4550_v35, %v12361_v16  ;;  %v13458_v35 = vld [vmem:[#allocation7_spill] sm:$0xff] }
 0x3ff   : > { %13469 = vst [vmem:[#allocation7_spill] sm:$0xff] %v12414_v6 }
 0x400   : > { %v13379_v63 = vand.u32 4294901760, %v12364_v1 }
 0x402   : > { %v7380_v52 = vsub.f32 %v12364_v1, %v13379_v63  ;;  %v12419_v63 = vld [vmem:[%s13335_s4 + $0x1e8] sm:$0xff] }
 0x425   : > { %v5451_v32 = vpop.f32.mrb[8].mxu1 }
 0x426   : > { %v5456_v47 = vmul.f32 %v10717_v34, %v5451_v32  ;;  %v9732_v48 = vpop.f32.mrb[9].mxu1  ;;  %v13459_v34 = vpack.c.bf16 %v12016_v15, %v12008_v27 }
 0x427   : > { %v13460_v48 = vld [vmem:[#allocation8_spill] sm:$0xff] }
 0x428   : > { %v12366_v60 = vand.u32 4294901760, %v5456_v47  ;;  %13470 = vst [vmem:[#allocation8_spill] sm:$0xff] %v12419_v63 }
 0x42a   : > { %v7372_v40 = vsub.f32 %v5456_v47, %v12366_v60  ;;  %7612 = vmatprep.mubr.f32.mxu1 %v12366_v60  ;;  %v7381_v47 = vand.u32 4294901760, %v7380_v52  ;;  %v13462_v52 = vld [vmem:[#allocation9_spill] sm:$0xff] }
 0x42b   : > { %7614 = vmatmul.mubr.f32.vlgmr.msra.gmra.mrb[14].mxu1 %v12361_v16  ;;  %13472 = vst [vmem:[#allocation9_spill] sm:$0xff] %v12428_v55  ;;  %v13482_v16 = vpack.c.bf16 %v12175_v46, %v12152_v24 }
 0x42c   : > { %10240 = vmatpush3.bf16.msra.mxu1 %v11995_v3  ;;  %v7373_v49 = vand.u32 4294901760, %v7372_v40 }
 0x42d   : > { %10242 = vmatprep.subr.bf16.mxu1 %v12002_v2 }
 0x42e   : > { %7856 = vmatprep.mubr.f32.mxu1 %v7373_v49  ;;  %v7374_v32 = vsub.f32 %v7372_v40, %v7373_v49  ;;  %v13461_v49 = vpack.c.bf16 %v12026_v41, %v12018_v19 }
 0x430   : > { %10244 = vmatpush3.bf16.msra.mxu1 %v13456_v59  ;;  %v7375_v38 = vand.u32 4294901760, %v7374_v32  ;;  %v13463_v32 = vpack.c.bf16 %v12066_v0, %v12064_v18 }
 0x431   : > { %10246 = vmatprep.subr.bf16.mxu1 %v13457_v39 }
 0x432   : > { %7376 = vmatprep.mubr.f32.mxu0 %v7375_v38  ;;  %v12403_v38 = vld [vmem:[%s13335_s4 + $0x158] sm:$0xff] }
 0x433   : > { %7382 = vmatmul.mubr.f32.vlgmr.msra.gmra.mrb[14].mxu0 %v7381_v47  ;;  %13466 = vst [vmem:[#allocation6_spill] sm:$0xff] %v12403_v38  ;;  %v13467_v47 = vpack.c.bf16 %v12077_v7, %v12071_v21  ;;  %v13478_v20 = vand.u32 4294901760, %v12403_v38 }
 0x434   : > { %10208 = vmatpush3.bf16.msra.mxu0 %v10207_v56  ;;  %10248 = vmatpush3.bf16.msra.mxu1 %v13458_v35  ;;  %v13464_v56 = vld [vmem:[#allocation10_spill] sm:$0xff] }
 0x435   : > { %7749 = vmatprep.mubr.f32.mxu0 %v7372_v40  ;;  %10210 = vmatprep.subr.bf16.mxu0 %v13459_v34  ;;  %v12398_v40 = vld [vmem:[%s13335_s4 + $0x150] sm:$0xff]  ;;  %v13468_v34 = vld [vmem:[#allocation12_spill] sm:$0xff]  ;;  %v12459_v61 = vsub.f32 %v12403_v38, %v13478_v20  ;;  %v13487_v20 = vpack.c.bf16 %v12194_v12, %v12177_v45  ;;  %v13488_v38 = vpack.c.bf16 %v12198_v4, %v12196_v14 }
 0x436   : > { %10250 = vmatprep.subr.bf16.mxu1 %v13460_v48  ;;  %13465 = vst [vmem:[#allocation5_spill] sm:$0xff] %v12398_v40 }
 0x437   : > { %13479 = vst [vmem:[#allocation23_spill] sm:$0xff] %v12459_v61 }
 0x438   : > { %10212 = vmatpush3.bf16.msra.mxu0 %v13461_v49  ;;  %10252 = vmatpush3.bf16.msra.mxu1 %v13462_v52  ;;  %v13382_v49 = vand.u32 4294901760, %v12398_v40 }
 0x439   : > { %10214 = vmatprep.subr.bf16.mxu0 %v13463_v32  ;;  %10254 = vmatprep.subr.bf16.mxu1 %v13464_v56  ;;  %v13476_v32 = vld [vmem:[#allocation14_spill] sm:$0xff]  ;;  %v13485_v56 = vand.u32 4294901760, %v12419_v63 }
 0x43a   : > { %v12454_v51 = vsub.f32 %v12398_v40, %v13382_v49  ;;  %v13483_v49 = vld [vmem:[#allocation15_spill] sm:$0xff] }
 0x43b   : > { %v12487_v46 = vsub.f32 %v12419_v63, %v13485_v56  ;;  %v13489_v56 = vand.u32 4294901760, %v12428_v55  ;;  %v13492_v63 = vand.u32 4294901760, %v12445_v43 }
 0x43c   : > { %10216 = vmatpush3.bf16.msra.mxu0 %v13467_v47  ;;  %10256 = vmatpush3.bf16.msra.mxu1 %v13468_v34  ;;  %v13471_v47 = vld [vmem:[#allocation13_spill] sm:$0xff]  ;;  %13477 = vst [vmem:[#allocation22_spill] sm:$0xff] %v12454_v51 }
 0x43d   : > { %10218 = vmatprep.subr.bf16.mxu0 %v10217_v26  ;;  %10258 = vmatprep.subr.bf16.mxu1 %v13471_v47  ;;  %v12440_v26 = vld [vmem:[%s13335_s4 + $0x1f0] sm:$0xff]  ;;  %v13484_v47 = vand.u32 4294901760, %v12414_v6  ;;  %13486 = vst [vmem:[#allocation15_spill] sm:$0xff] %v12487_v46  ;;  %v12504_v40 = vsub.f32 %v12428_v55, %v13489_v56  ;;  %v13495_v56 = vand.u32 4294901760, %v12459_v61 }
 0x43e   : > { %13474 = vst [vmem:[#allocation20_spill] sm:$0xff] %v12440_v26 }
 0x43f   : > { %v12482_v34 = vsub.f32 %v12414_v6, %v13484_v47  ;;  %v13494_v6 = vand.u32 4294901760, %v12454_v51 }
 0x440   : > { %10220 = vmatpush3.bf16.msra.mxu0 %v10219_v25  ;;  %10260 = vmatpush3.bf16.msra.mxu1 %v13476_v32  ;;  %v12469_v25 = vld [vmem:[%s13335_s4 + $0x178] sm:$0xff]  ;;  %v13491_v32 = vand.u32 4294901760, %v12440_v26 }
 0x441   : > { %13481 = vst [vmem:[#allocation25_spill] sm:$0xff] %v12469_v25  ;;  %10222 = vmatprep.subr.bf16.mxu0 %v13482_v16  ;;  %10262 = vmatprep.subr.bf16.mxu1 %v13483_v49  ;;  %v13490_v16 = vand.u32 4294901760, %v12433_v10  ;;  %v12525_v55 = vpack.c.bf16 %v13495_v56, %v13494_v6  ;;  %v13498_v6 = vand.u32 4294901760, %v12469_v25 }
 0x442   : > { %v12514_v47 = vsub.f32 %v12440_v26, %v13491_v32  ;;  %v12535_v32 = vld [vmem:[%s13335_s4 + $0x188] sm:$0xff]  ;;  %v13500_v26 = vpack.c.bf16 %v12262_v8, %v12229_v53 }
 0x443   : > { %13496 = vst [vmem:[#allocation27_spill] sm:$0xff] %v12525_v55  ;;  %v12547_v56 = vsub.f32 %v12469_v25, %v13498_v6  ;;  %v13499_v55 = vpack.c.bf16 %v12227_v29, %v12225_v31  ;;  %v13501_v25 = vand.u32 4294901760, %v12482_v34 }
 0x444   : > { %10224 = vmatpush3.bf16.msra.mxu0 %v13487_v20  ;;  %10264 = vmatpush3.bf16.msra.mxu1 %v12273_v37  ;;  %v12509_v20 = vsub.f32 %v12433_v10, %v13490_v16  ;;  %v12530_v16 = vld [vmem:[%s13335_s4 + $0x180] sm:$0xff]  ;;  %v13402_v51 = vand.u32 4294901760, %v12514_v47 }
 0x445   : > { %10226 = vmatprep.subr.bf16.mxu0 %v13488_v38  ;;  %10266 = vmatprep.subr.bf16.mxu1 %v12275_v9  ;;  %v12519_v38 = vsub.f32 %v12445_v43, %v13492_v63  ;;  %v13497_v43 = vand.u32 4294901760, %v12464_v36  ;;  %v13504_v63 = vand.u32 4294901760, %v12364_v1 }
 0x447   : > { %13493 = vst [vmem:[#allocation26_spill] sm:$0xff] %v12519_v38  ;;  %v12542_v10 = vsub.f32 %v12464_v36, %v13497_v43  ;;  %v12560_v43 = vld [vmem:[%s13335_s4 + $0x100] sm:$0xff] }
 0x448   : > { %10228 = vmatpush3.bf16.msra.mxu0 %v13499_v55  ;;  %10268 = vmatpush3.bf16.msra.mxu1 %v12287_v62  ;;  %v13502_v55 = vand.u32 4294901760, %v12487_v46 }
 0x449   : > { %10230 = vmatprep.subr.bf16.mxu0 %v13500_v26  ;;  %10302 = vmatprep.subr.bf16.mxu1 %v11986_v17  ;;  %v12575_v17 = vld [vmem:[%s13335_s4 + $0x108] sm:$0xff]  ;;  %v13506_v26 = vand.u32 4294901760, %v12509_v20  ;;  %v13514_v6 = vand.u32 4294901760, %v12542_v10 }
 0x44a   : > { %v12568_v36 = vpack.c.bf16 %v13502_v55, %v13501_v25  ;;  %v13505_v55 = vand.u32 4294901760, %v12504_v40 }
 0x44b   : > { %7860 = vmatmul.mubr.f32.vlgmr.msra.gmra.mrb[16].mxu1 %v13504_v63  ;;  %v13509_v63 = vand.u32 4294901760, %v12519_v38 }
 0x44c   : > { %13503 = vst [vmem:[#allocation28_spill] sm:$0xff] %v12568_v36  ;;  %v12587_v61 = vpack.c.bf16 %v13506_v26, %v13505_v55  ;;  %v13508_v36 = vpack.c.bf16 %v12279_v22, %v12277_v42  ;;  %10304 = vmatpush3.bf16.msra.mxu1 %v11995_v3  ;;  %8130 = vmatprep.mubr.f32.mxu1 %v12366_v60  ;;  %v13512_v55 = vand.u32 4294901760, %v11968_v13  ;;  %v13407_v3 = vand.u32 4294901760, %v12575_v17 }
 0x44d   : > { %v12598_v46 = vpack.c.bf16 %v13509_v63, %v13402_v51  ;;  %v13511_v26 = vpack.c.bf16 %v12284_v50, %v12282_v28  ;;  %10306 = vmatprep.subr.bf16.mxu1 %v12002_v2  ;;  %v13517_v63 = vand.u32 4294901760, %v12530_v16  ;;  %v13518_v13 = vand.u32 4294901760, %v12535_v32  ;;  %v12629_v28 = vld [vmem:[%s13335_s4 + $0x190] sm:$0xff] }
 0x44e   : > { %13507 = vst [vmem:[#allocation29_spill] sm:$0xff] %v12587_v61  ;;  %10232 = vmatpush3.bf16.msra.mxu0 %v13508_v36  ;;  %v13513_v36 = vand.u32 4294901760, %v11979_v57  ;;  %v13515_v61 = vand.u32 4294901760, %v12547_v56  ;;  %v13519_v2 = vpack.c.bf16 %v12307_v58, %v12305_v30  ;;  %v12664_v58 = vsub.f32 %v12575_v17, %v13407_v3 }
 0x44f   : > { %13510 = vst [vmem:[#allocation30_spill] sm:$0xff] %v12598_v46  ;;  %10234 = vmatprep.subr.bf16.mxu0 %v13511_v26  ;;  %v12619_v50 = vsub.f32 %v12530_v16, %v13517_v63  ;;  %v12624_v57 = vsub.f32 %v12535_v32, %v13518_v13  ;;  %v13521_v26 = vand.u32 4294901760, %v11990_v33  ;;  %v12652_v13 = vld [vmem:[%s13335_s4 + $0x110] sm:$0xff]  ;;  %v13524_v33 = vand.u32 4294901760, %v12016_v15 }
 0x450   : > { %v10269_v25 = vpack.c.bf16 %v13513_v36, %v13512_v55  ;;  %v12613_v38 = vpack.c.bf16 %v13515_v61, %v13514_v6  ;;  %v12634_v61 = vld [vmem:[%s13335_s4 + $0x198] sm:$0xff]  ;;  %10308 = vmatpush3.bf16.msra.mxu1 %v13456_v59  ;;  %v13520_v6 = vand.u32 4294901760, %v11981_v5  ;;  %v13522_v36 = vand.u32 4294901760, %v12560_v43 }
 0x451   : > { %v12654_v51 = vpop.f32.mrb[10].mxu1  ;;  %10310 = vmatprep.subr.bf16.mxu1 %v13457_v39  ;;  %v13523_v5 = vand.u32 4294901760, %v12008_v27  ;;  %v13406_v59 = vand.u32 4294901760, %v12629_v28  ;;  %v13408_v27 = vand.u32 4294901760, %v12652_v13  ;;  %v13525_v15 = vand.u32 4294901760, %v12018_v19 }
 0x452   : > { %13516 = vst [vmem:[#allocation31_spill] sm:$0xff] %v12613_v38  ;;  %10236 = vmatpush3.bf16.msra.mxu0 %v13519_v2  ;;  %v10271_v55 = vpack.c.bf16 %v13521_v26, %v13520_v6  ;;  %v12647_v63 = vsub.f32 %v12560_v43, %v13522_v36  ;;  %v13405_v2 = vand.u32 4294901760, %v12634_v61  ;;  %v9792_v6 = vpop.f32.mrb[11].mxu1  ;;  %v13404_v26 = vand.u32 4294901760, %v12619_v50 }
 0x453   : > { %10270 = vmatprep.subr.bf16.mxu0 %v10269_v25  ;;  %v10273_v30 = vpack.c.bf16 %v13524_v33, %v13523_v5  ;;  %v13403_v25 = vand.u32 4294901760, %v12624_v57  ;;  %v13526_v39 = vand.u32 4294901760, %v12026_v41  ;;  %v12681_v33 = vld [vmem:[%s13335_s4 + $0x118] sm:$0xff]  ;;  %v13527_v19 = vand.u32 4294901760, %v12064_v18 }
 0x454   : > { %v13409_v5 = vand.u32 4294901760, %v12647_v63  ;;  %10312 = vmatpush3.bf16.msra.mxu1 %v13458_v35  ;;  %v13528_v41 = vand.u32 4294901760, %v12066_v0  ;;  %v12697_v6 = vsub.f32 %v12629_v28, %v13406_v59  ;;  %v8365_v18 = vsub.f32 %v12619_v50, %v13404_v26  ;;  %v12714_v35 = vld [vmem:[%s13335_s4 + $0x1a8] sm:$0xff] }
 0x455   : > { %7752 = vmatmul.mubr.f32.vlgmr.msra.gmra.mrb[16].mxu0 %v12364_v1  ;;  %v10275_v36 = vpack.c.bf16 %v13526_v39, %v13525_v15  ;;  %v12686_v1 = vld [vmem:[%s13335_s4 + $0x1a0] sm:$0xff]  ;;  %v12702_v15 = vsub.f32 %v12634_v61, %v13405_v2  ;;  %10314 = vmatprep.subr.bf16.mxu1 %v13460_v48  ;;  %v8372_v0 = vsub.f32 %v12624_v57, %v13403_v25  ;;  %v13534_v26 = vand.u32 4294901760, %v12079_v11 }
 0x456   : > { %10272 = vmatpush3.bf16.msra.mxu0 %v10271_v55  ;;  %8026 = vmatprep.mubr.f32.mxu0 %v12366_v60  ;;  %v10277_v60 = vpack.c.bf16 %v13528_v41, %v13527_v19  ;;  %13529 = vst [vmem:[#allocation32_spill] sm:$0xff] %v12697_v6  ;;  %v12720_v39 = vsub.f32 %v12652_v13, %v13408_v27  ;;  %v13410_v48 = vand.u32 4294901760, %v12686_v1  ;;  %v13532_v19 = vand.u32 4294901760, %v12071_v21  ;;  %v12741_v21 = vld [vmem:[%s13335_s4 + $0x120] sm:$0xff] }
 0x457   : > { %10274 = vmatprep.subr.bf16.mxu0 %v10273_v30  ;;  %13530 = vst [vmem:[#allocation33_spill] sm:$0xff] %v12702_v15  ;;  %v13533_v41 = vand.u32 4294901760, %v12077_v7  ;;  %v13535_v2 = vand.u32 4294901760, %v12096_v54  ;;  %v13536_v3 = vand.u32 4294901760, %v12098_v44  ;;  %v13537_v30 = vand.u32 4294901760, %v12102_v23 }
 0x458   : > { %13531 = vst [vmem:[#allocation34_spill] sm:$0xff] %v12720_v39  ;;  %v8253_v27 = vsub.f32 %v12647_v63, %v13409_v5  ;;  %10316 = vmatpush3.bf16.msra.mxu1 %v13462_v52  ;;  %v13538_v7 = vand.u32 4294901760, %v12664_v58  ;;  %v13540_v52 = vand.u32 4294901760, %v12152_v24  ;;  %v8373_v5 = vand.u32 4294901760, %v8372_v0 }
 0x459   : > { %v10279_v25 = vpack.c.bf16 %v13533_v41, %v13532_v19  ;;  %v10281_v59 = vpack.c.bf16 %v13535_v2, %v13534_v26  ;;  %v10283_v55 = vpack.c.bf16 %v13537_v30, %v13536_v3  ;;  %v12753_v3 = vld [vmem:[%s13335_s4 + $0x128] sm:$0xff]  ;;  %v13539_v2 = vld [vmem:[#allocation10_spill] sm:$0xff]  ;;  %v13541_v26 = vld [vmem:[#allocation11_spill] sm:$0xff]  ;;  %v13543_v30 = vand.u32 4294901760, %v12177_v45 }
 0x45a   : > { %10276 = vmatpush3.bf16.msra.mxu0 %v10275_v36  ;;  %v8260_v11 = vsub.f32 %v12664_v58, %v13538_v7  ;;  %10318 = vmatprep.subr.bf16.mxu1 %v13539_v2  ;;  %v13542_v36 = vand.u32 4294901760, %v13541_v26  ;;  %v13544_v19 = vand.u32 4294901760, %v12194_v12  ;;  %v8366_v7 = vand.u32 4294901760, %v8365_v18  ;;  %v12779_v45 = vld [vmem:[%s13335_s4 + $0x1b0] sm:$0xff]  ;;  %v12784_v12 = vld [vmem:[%s13335_s4 + $0x1b8] sm:$0xff] }
 0x45b   : > { %10278 = vmatprep.subr.bf16.mxu0 %v10277_v60  ;;  %v13411_v23 = vand.u32 4294901760, %v12720_v39  ;;  %v13545_v44 = vand.u32 4294901760, %v12681_v33  ;;  %v12773_v24 = vsub.f32 %v12686_v1, %v13410_v48  ;;  %v13548_v18 = vand.u32 4294901760, %v12196_v14  ;;  %v13552_v48 = vld [vmem:[#allocation12_spill] sm:$0xff] }
 0x45c   : > { %v10285_v60 = vpack.c.bf16 %v13542_v36, %v13540_v52  ;;  %v10287_v41 = vpack.c.bf16 %v13544_v19, %v13543_v30  ;;  %v13549_v0 = vand.u32 4294901760, %v12198_v4  ;;  %v13550_v52 = vand.u32 4294901760, %v12225_v31  ;;  %10320 = vmatpush3.bf16.msra.mxu1 %v13552_v48  ;;  %v13557_v48 = vld [vmem:[#allocation13_spill] sm:$0xff] }
 0x45d   : > { %v12768_v54 = vsub.f32 %v12681_v33, %v13545_v44  ;;  %13547 = vst [vmem:[#allocation11_spill] sm:$0xff] %v12773_v24  ;;  %v13551_v26 = vand.u32 4294901760, %v12227_v29  ;;  %v8254_v30 = vand.u32 4294901760, %v8253_v27  ;;  %v8261_v2 = vand.u32 4294901760, %v8260_v11  ;;  %v12812_v27 = vld [vmem:[%s13335_s4 + $0x130] sm:$0xff]  ;;  %10322 = vmatprep.subr.bf16.mxu1 %v13557_v48 }
 0x45e   : > { %10280 = vmatpush3.bf16.msra.mxu0 %v10279_v25  ;;  %v10289_v44 = vpack.c.bf16 %v13549_v0, %v13548_v18  ;;  %v13553_v25 = vand.u32 4294901760, %v12697_v6  ;;  %v13554_v4 = vand.u32 4294901760, %v12702_v15  ;;  %v13555_v31 = vand.u32 4294901760, %v12714_v35 }
 0x45f   : > { %13546 = vst [vmem:[#allocation10_spill] sm:$0xff] %v12768_v54  ;;  %v12794_v36 = vpack.c.bf16 %v13551_v26, %v13550_v52  ;;  %10282 = vmatprep.subr.bf16.mxu0 %v10281_v59  ;;  %v12817_v59 = vld [vmem:[%s13335_s4 + $0x138] sm:$0xff]  ;;  %v13558_v11 = vand.u32 4294901760, %v12229_v53  ;;  %v13559_v0 = vand.u32 4294901760, %v12262_v8  ;;  %v12824_v26 = vpack.c.bf16 %v8373_v5, %v8366_v7  ;;  %v12843_v5 = vld [vmem:[%s13335_s4 + $0x1c0] sm:$0xff]  ;;  %v12848_v7 = vld [vmem:[%s13335_s4 + $0x1c8] sm:$0xff] }
 0x460   : > { %v8379_v14 = vsub.f32 %v12697_v6, %v13553_v25  ;;  %v8386_v18 = vsub.f32 %v12702_v15, %v13554_v4  ;;  %v12807_v29 = vsub.f32 %v12714_v35, %v13555_v31  ;;  %v12831_v31 = vsub.f32 %v12720_v39, %v13411_v23  ;;  %v13566_v25 = vld [vmem:[#allocation14_spill] sm:$0xff] }
 0x461   : > { %v10293_v52 = vpack.c.bf16 %v13559_v0, %v13558_v11  ;;  %v13560_v53 = vand.u32 4294901760, %v12741_v21  ;;  %v13562_v11 = vand.u32 4294901760, %v12277_v42  ;;  %v13563_v0 = vand.u32 4294901760, %v12279_v22  ;;  %10324 = vmatpush3.bf16.msra.mxu1 %v13566_v25  ;;  %v12866_v22 = vld [vmem:[%s13335_s4 + $0x140] sm:$0xff]  ;;  %v13587_v6 = vld [vmem:[#allocation18_spill] sm:$0xff] }
 0x462   : > { %13556 = vst [vmem:[#allocation12_spill] sm:$0xff] %v12807_v29  ;;  %10284 = vmatpush3.bf16.msra.mxu0 %v10283_v55  ;;  %v13564_v48 = vand.u32 4294901760, %v12753_v3  ;;  %v13416_v19 = vand.u32 4294901760, %v12812_v27  ;;  %v10367_v38 = vpack.c.bf16 %v8261_v2, %v8254_v30  ;;  %v8380_v46 = vand.u32 4294901760, %v8379_v14  ;;  %10326 = vmatprep.subr.bf16.mxu1 %v13483_v49  ;;  %v12884_v14 = vld [vmem:[%s13335_s4 + $0x148] sm:$0xff]  ;;  %v12889_v49 = vld [vmem:[%s13335_s4 + $0x1d0] sm:$0xff] }
 0x463   : > { %v12838_v8 = vsub.f32 %v12741_v21, %v13560_v53  ;;  %v10295_v23 = vpack.c.bf16 %v13563_v0, %v13562_v11  ;;  %10286 = vmatprep.subr.bf16.mxu0 %v10285_v60  ;;  %v8387_v55 = vand.u32 4294901760, %v8386_v18  ;;  %v13569_v25 = vand.u32 4294901760, %v12784_v12  ;;  %v12894_v18 = vld [vmem:[%s13335_s4 + $0x1d8] sm:$0xff] }
 0x464   : > { %v12857_v53 = vsub.f32 %v12753_v3, %v13564_v48  ;;  %v13567_v48 = vand.u32 4294901760, %v12779_v45  ;;  %v8268_v0 = vand.u32 4294901760, %v12831_v31  ;;  %v13571_v30 = vand.u32 4294901760, %v12773_v24 }
 0x465   : > { %13561 = vst [vmem:[#allocation13_spill] sm:$0xff] %v12838_v8  ;;  %v12877_v60 = vsub.f32 %v12784_v12, %v13569_v25  ;;  %v12908_v39 = vsub.f32 %v12812_v27, %v13416_v19  ;;  %v13572_v31 = vand.u32 4294901760, %v12817_v59  ;;  %10328 = vmatpush3.bf16.msra.mxu1 %v12273_v37  ;;  %v10369_v4 = vpack.c.bf16 %v8387_v55, %v8380_v46 }
 0x466   : > { %13565 = vst [vmem:[#allocation35_spill] sm:$0xff] %v12857_v53  ;;  %v12872_v11 = vsub.f32 %v12779_v45, %v13567_v48  ;;  %v13570_v48 = vand.u32 4294901760, %v12768_v54  ;;  %v8393_v2 = vsub.f32 %v12773_v24, %v13571_v30  ;;  %10288 = vmatpush3.bf16.msra.mxu0 %v10287_v41  ;;  %v13573_v30 = vand.u32 4294901760, %v12807_v29  ;;  %10330 = vmatprep.subr.bf16.mxu1 %v12275_v9 }
 0x467   : > { %v12913_v15 = vsub.f32 %v12817_v59, %v13572_v31  ;;  %10290 = vmatprep.subr.bf16.mxu0 %v10289_v44  ;;  %v13576_v44 = vand.u32 4294901760, %v12848_v7  ;;  %v13577_v19 = vand.u32 4294901760, %v12838_v8  ;;  %v13578_v24 = vand.u32 4294901760, %v12857_v53 }
 0x468   : > { %13568 = vst [vmem:[#allocation14_spill] sm:$0xff] %v12872_v11  ;;  %v8274_v25 = vsub.f32 %v12768_v54, %v13570_v48  ;;  %v8400_v41 = vsub.f32 %v12807_v29, %v13573_v30  ;;  %v13574_v48 = vand.u32 4294901760, %v12843_v5  ;;  %v8394_v29 = vand.u32 4294901760, %v8393_v2 }
 0x469   : > { %v12934_v30 = vsub.f32 %v12848_v7, %v13576_v44  ;;  %v8281_v9 = vsub.f32 %v12838_v8, %v13577_v19  ;;  %v8288_v31 = vsub.f32 %v12857_v53, %v13578_v24  ;;  %v13579_v44 = vand.u32 4294901760, %v12866_v22  ;;  %10332 = vmatpush3.bf16.msra.mxu1 %v12287_v62 }
 0x46a   : > { %v12929_v37 = vsub.f32 %v12843_v5, %v13574_v48  ;;  %v8275_v42 = vand.u32 4294901760, %v8274_v25  ;;  %10292 = vmatpush3.bf16.msra.mxu0 %v12794_v36  ;;  %v8401_v55 = vand.u32 4294901760, %v8400_v41  ;;  %v13580_v19 = vand.u32 4294901760, %v12884_v14  ;;  %10366 = vmatprep.subr.bf16.mxu1 %v12824_v26 }
 0x46b   : > { %v12948_v46 = vsub.f32 %v12866_v22, %v13579_v44  ;;  %10294 = vmatprep.subr.bf16.mxu0 %v10293_v52  ;;  %v13581_v24 = vand.u32 4294901760, %v12889_v49  ;;  %v13582_v25 = vand.u32 4294901760, %v12894_v18  ;;  %v13583_v62 = vand.u32 4294901760, %v12872_v11 }
 0x46c   : > { %13575 = vst [vmem:[#allocation36_spill] sm:$0xff] %v12929_v37  ;;  %v12954_v36 = vsub.f32 %v12884_v14, %v13580_v19  ;;  %v13584_v41 = vand.u32 4294901760, %v12877_v60  ;;  %v10371_v48 = vpack.c.bf16 %v8275_v42, %v8268_v0  ;;  %v13585_v53 = vand.u32 4294901760, %v12530_v16  ;;  %8132 = vmatmul.mubr.f32.vlgmr.msra.gmra.mrb[18].mxu1 %v13587_v6  ;;  %v13590_v16 = vld [vmem:[#allocation16_spill] sm:$0xff]  ;;  %v5911_v42 = vpop.xlane.xlu1 %5910  ;;  %v13597_v0 = vld [vmem:[#allocation17_spill] sm:$0xff] }
 0x46d   : > { %v12959_v2 = vsub.f32 %v12889_v49, %v13581_v24  ;;  %v12964_v54 = vsub.f32 %v12894_v18, %v13582_v25  ;;  %v8407_v52 = vsub.f32 %v12872_v11, %v13583_v62  ;;  %v13586_v25 = vand.u32 4294901760, %v12535_v32  ;;  %10368 = vmatpush3.bf16.msra.mxu1 %v10367_v38 }
 0x46e   : > { %v8414_v44 = vsub.f32 %v12877_v60, %v13584_v41  ;;  %v8282_v26 = vand.u32 4294901760, %v8281_v9  ;;  %10296 = vmatpush3.bf16.msra.mxu0 %v10295_v23  ;;  %v8289_v62 = vand.u32 4294901760, %v8288_v31  ;;  %v13588_v11 = vand.u32 4294901760, %v12908_v39  ;;  %10370 = vmatprep.subr.bf16.mxu1 %v10369_v4 }
 0x46f   : > { %v12979_v8 = vpack.c.bf16 %v13586_v25, %v13585_v53  ;;  %v13589_v19 = vand.u32 4294901760, %v12913_v15  ;;  %10298 = vmatprep.subr.bf16.mxu0 %v13590_v16  ;;  %v10373_v32 = vpack.c.bf16 %v8401_v55, %v8394_v29  ;;  %v8408_v31 = vand.u32 4294901760, %v8407_v52 }
 0x470   : > { %v8295_v41 = vsub.f32 %v12908_v39, %v13588_v11  ;;  %v8415_v9 = vand.u32 4294901760, %v8414_v44  ;;  %v13591_v11 = vand.u32 4294901760, %v12929_v37  ;;  %v13593_v29 = vand.u32 4294901760, %v12560_v43  ;;  %v6817_v44 = vpop.xlane.xlu0 %6816 }
 0x471   : > { %v8302_v24 = vsub.f32 %v12913_v15, %v13589_v19  ;;  %v13592_v19 = vand.u32 4294901760, %v12934_v30  ;;  %v13594_v55 = vand.u32 4294901760, %v12575_v17  ;;  %v13595_v23 = vand.u32 4294901760, %v12629_v28  ;;  %10372 = vmatpush3.bf16.msra.mxu1 %v10371_v48 }
 0x472   : > { %v8421_v25 = vsub.f32 %v12929_v37, %v13591_v11  ;;  %v13596_v4 = vand.u32 4294901760, %v12634_v61  ;;  %10300 = vmatpush3.bf16.msra.mxu0 %v13597_v0  ;;  %v10375_v11 = vpack.c.bf16 %v8289_v62, %v8282_v26  ;;  %v8296_v53 = vand.u32 4294901760, %v8295_v41  ;;  %10374 = vmatprep.subr.bf16.mxu1 %v10373_v32 }
 0x473   : > { %v8428_v38 = vsub.f32 %v12934_v30, %v13592_v19  ;;  %v13003_v16 = vpack.c.bf16 %v13594_v55, %v13593_v29  ;;  %v8303_v37 = vand.u32 4294901760, %v8302_v24  ;;  %v13598_v19 = vand.u32 4294901760, %v12948_v46  ;;  %10334 = vmatprep.subr.bf16.mxu0 %v12979_v8 }
 0x474   : > { %v13009_v52 = vpack.c.bf16 %v13596_v4, %v13595_v23  ;;  %v13599_v17 = vand.u32 4294901760, %v12954_v36  ;;  %v13600_v61 = vand.u32 4294901760, %v12959_v2  ;;  %v13601_v0 = vand.u32 4294901760, %v12964_v54 }
 0x475   : > { %v8309_v43 = vsub.f32 %v12948_v46, %v13598_v19  ;;  %10718 = vrcp.f32 %v5911_v42  ;;  %v10377_v24 = vpack.c.bf16 %v8415_v9, %v8408_v31  ;;  %v8422_v62 = vand.u32 4294901760, %v8421_v25  ;;  %8028 = vmatmul.mubr.f32.vlgmr.msra.gmra.mrb[18].mxu0 %v13587_v6  ;;  %v13606_v31 = vld [vmem:[#allocation22_spill] sm:$0xff]  ;;  %v13608_v6 = vld [vmem:[#allocation23_spill] sm:$0xff]  ;;  %10376 = vmatpush3.bf16.msra.mxu1 %v10375_v11 }
 0x476   : > { %v8316_v28 = vsub.f32 %v12954_v36, %v13599_v17  ;;  %v8435_v23 = vsub.f32 %v12959_v2, %v13600_v61  ;;  %v8442_v26 = vsub.f32 %v12964_v54, %v13601_v0  ;;  %v8429_v41 = vand.u32 4294901760, %v8428_v38  ;;  %10336 = vmatpush3.bf16.msra.mxu0 %v13003_v16  ;;  %v13611_v61 = vld [vmem:[#allocation15_spill] sm:$0xff] }
 0x477   : > { %10720 = vrcp.f32 %v6817_v44  ;;  %v13602_v48 = vand.u32 4294901760, %v12652_v13  ;;  %v13603_v29 = vand.u32 4294901760, %v12681_v33  ;;  %v10379_v4 = vpack.c.bf16 %v8303_v37, %v8296_v53  ;;  %10338 = vmatprep.subr.bf16.mxu0 %v13009_v52  ;;  %10378 = vmatprep.subr.bf16.mxu1 %v10377_v24 }
 0x478   : > { %v13604_v19 = vand.u32 4294901760, %v12686_v1  ;;  %v13605_v42 = vand.u32 4294901760, %v12714_v35  ;;  %v13607_v9 = vand.u32 4294901760, %v13606_v31  ;;  %v13609_v38 = vand.u32 4294901760, %v13608_v6 }
 0x479   : > { %v13030_v55 = vpack.c.bf16 %v13603_v29, %v13602_v48  ;;  %v8310_v33 = vand.u32 4294901760, %v8309_v43  ;;  %v8317_v44 = vand.u32 4294901760, %v8316_v28  ;;  %v8436_v37 = vand.u32 4294901760, %v8435_v23  ;;  %10380 = vmatpush3.bf16.msra.mxu1 %v10379_v4 }
 0x47a   : > { %v13037_v32 = vpack.c.bf16 %v13605_v42, %v13604_v19  ;;  %v8323_v25 = vsub.f32 %v13606_v31, %v13607_v9  ;;  %v8330_v13 = vsub.f32 %v13608_v6, %v13609_v38  ;;  %v8443_v53 = vand.u32 4294901760, %v8442_v26 }
 0x47b   : > { %v10381_v1 = vpack.c.bf16 %v8429_v41, %v8422_v62  ;;  %v13610_v35 = vand.u32 4294901760, %v12482_v34  ;;  %v13612_v0 = vand.u32 4294901760, %v13611_v61  ;;  %v13613_v29 = vand.u32 4294901760, %v12741_v21  ;;  %10340 = vmatpush3.bf16.msra.mxu0 %v13030_v55 }
 0x47c   : > { %v13614_v11 = vand.u32 4294901760, %v12753_v3  ;;  %v13615_v43 = vand.u32 4294901760, %v12779_v45  ;;  %v13616_v28 = vand.u32 4294901760, %v12784_v12  ;;  %v8324_v26 = vand.u32 4294901760, %v8323_v25  ;;  %10342 = vmatprep.subr.bf16.mxu0 %v13037_v32 }
 0x47d   : > { %v8449_v17 = vsub.f32 %v12482_v34, %v13610_v35  ;;  %v8456_v48 = vsub.f32 %v13611_v61, %v13612_v0  ;;  %v8331_v24 = vand.u32 4294901760, %v8330_v13  ;;  %v13617_v62 = vand.u32 4294901760, %v12504_v40  ;;  %10382 = vmatprep.subr.bf16.mxu1 %v10381_v1  ;;  %v13620_v13 = vld [vmem:[#allocation26_spill] sm:$0xff] }
 0x47e   : > { %v13056_v19 = vpack.c.bf16 %v13614_v11, %v13613_v29  ;;  %v13063_v23 = vpack.c.bf16 %v13616_v28, %v13615_v43  ;;  %v10383_v21 = vpack.c.bf16 %v8317_v44, %v8310_v33  ;;  %v10385_v3 = vpack.c.bf16 %v8443_v53, %v8436_v37  ;;  %v7263_v28 = vpop.f32.mrb[12].mxu1 }
 0x47f   : > { %v8337_v41 = vsub.f32 %v12504_v40, %v13617_v62  ;;  %v13618_v42 = vand.u32 4294901760, %v12509_v20  ;;  %v8450_v45 = vand.u32 4294901760, %v8449_v17  ;;  %v8457_v12 = vand.u32 4294901760, %v8456_v48  ;;  %v10719_v4 = vpop.eup %10718 }
 0x480   : > { %v13619_v38 = vand.u32 4294901760, %v12514_v47  ;;  %v13621_v35 = vand.u32 4294901760, %v13620_v13  ;;  %10344 = vmatpush3.bf16.msra.mxu0 %v13056_v19  ;;  %v13622_v33 = vand.u32 4294901760, %v12812_v27  ;;  %v13623_v44 = vand.u32 4294901760, %v12817_v59  ;;  %10384 = vmatpush3.bf16.msra.mxu1 %v10383_v21 }
 0x481   : > { %v8344_v9 = vsub.f32 %v12509_v20, %v13618_v42  ;;  %v10387_v53 = vpack.c.bf16 %v8331_v24, %v8324_v26  ;;  %v13624_v1 = vand.u32 4294901760, %v12843_v5  ;;  %v13625_v17 = vand.u32 4294901760, %v12848_v7  ;;  %v10721_v11 = vpop.eup %10720  ;;  %10346 = vmatprep.subr.bf16.mxu0 %v13063_v23  ;;  %v9852_v24 = vpop.f32.mrb[13].mxu1  ;;  %10386 = vmatprep.subr.bf16.mxu1 %v10385_v3 }
 0x482   : > { %v8463_v25 = vsub.f32 %v12514_v47, %v13619_v38  ;;  %v8470_v0 = vsub.f32 %v13620_v13, %v13621_v35  ;;  %v13083_v37 = vpack.c.bf16 %v13623_v44, %v13622_v33  ;;  %v8338_v29 = vand.u32 4294901760, %v8337_v41  ;;  %v13640_v24 = vld [vmem:[#allocation9_spill] sm:$0xff] }
 0x483   : > { %v13089_v48 = vpack.c.bf16 %v13625_v17, %v13624_v1  ;;  %v6362_v43 = vmul.f32 %v10719_v4, %v12654_v51  ;;  %v8345_v27 = vand.u32 4294901760, %v8344_v9  ;;  %v13626_v59 = vand.u32 4294901760, %v12542_v10 }
 0x484   : > { %v13627_v26 = vand.u32 4294901760, %v12547_v56  ;;  %v7268_v7 = vmul.f32 %v10721_v11, %v7263_v28  ;;  %v10389_v41 = vpack.c.bf16 %v8457_v12, %v8450_v45  ;;  %v8464_v42 = vand.u32 4294901760, %v8463_v25  ;;  %10348 = vmatpush3.bf16.msra.mxu0 %v13083_v37  ;;  %10388 = vmatpush3.bf16.msra.mxu1 %v10387_v53  ;;  %v13636_v28 = vld [vmem:[#allocation7_spill] sm:$0xff] }
 0x485   : > { %v8351_v62 = vsub.f32 %v12542_v10, %v13626_v59  ;;  %v8471_v38 = vand.u32 4294901760, %v8470_v0  ;;  %v13628_v21 = vand.u32 4294901760, %v12866_v22  ;;  %v13629_v9 = vand.u32 4294901760, %v12884_v14  ;;  %10350 = vmatprep.subr.bf16.mxu0 %v13089_v48  ;;  %v13634_v0 = vld [vmem:[#allocation6_spill] sm:$0xff]  ;;  %v13638_v59 = vld [vmem:[#allocation8_spill] sm:$0xff] }
 0x486   : > { %v8358_v5 = vsub.f32 %v12547_v56, %v13627_v26  ;;  %v13099_v51 = vand.u32 4294901760, %v7268_v7  ;;  %v13630_v4 = vand.u32 4294901760, %v12889_v49  ;;  %v13631_v33 = vand.u32 4294901760, %v12894_v18  ;;  %10390 = vmatprep.subr.bf16.mxu1 %v10389_v41  ;;  %v13632_v49 = vld [vmem:[#allocation5_spill] sm:$0xff] }
 0x487   : > { %v13106_v35 = vpack.c.bf16 %v13629_v9, %v13628_v21  ;;  %v13114_v3 = vand.u32 4294901760, %v6362_v43  ;;  %v10391_v45 = vpack.c.bf16 %v8345_v27, %v8338_v29  ;;  %v8352_v12 = vand.u32 4294901760, %v8351_v62  ;;  %v13644_v9 = vld [vmem:[#allocation20_spill] sm:$0xff] }
 0x488   : > { %v13112_v44 = vpack.c.bf16 %v13631_v33, %v13630_v4  ;;  %v8359_v25 = vand.u32 4294901760, %v8358_v5  ;;  %v8234_v22 = vsub.f32 %v7268_v7, %v13099_v51  ;;  %8474 = vmatprep.mubr.f32.mxu1 %v13099_v51  ;;  %v10393_v14 = vpack.c.bf16 %v8471_v38, %v8464_v42  ;;  %v13642_v42 = vld [vmem:[#allocation19_spill] sm:$0xff]  ;;  %v13646_v33 = vld [vmem:[#allocation21_spill] sm:$0xff] }
 0x489   : > { %10352 = vmatpush3.bf16.msra.mxu0 %v13106_v35  ;;  %v13633_v18 = vand.u32 4294901760, %v13632_v49  ;;  %v13635_v1 = vand.u32 4294901760, %v13634_v0  ;;  %v13127_v11 = vsub.f32 %v6362_v43, %v13114_v3  ;;  %10392 = vmatpush3.bf16.msra.mxu1 %v10391_v45  ;;  %v13637_v27 = vand.u32 4294901760, %v13636_v28  ;;  %v13650_v49 = vld [vmem:[#allocation25_spill] sm:$0xff] }
 0x48a   : > { %v8235_v53 = vand.u32 4294901760, %v8234_v22  ;;  %10354 = vmatprep.subr.bf16.mxu0 %v13112_v44  ;;  %v10395_v29 = vpack.c.bf16 %v8359_v25, %v8352_v12  ;;  %v13639_v62 = vand.u32 4294901760, %v13638_v59  ;;  %10394 = vmatprep.subr.bf16.mxu1 %v10393_v14  ;;  %v13641_v41 = vand.u32 4294901760, %v13640_v24  ;;  %v13648_v25 = vld [vmem:[#allocation24_spill] sm:$0xff] }
 0x48b   : > { %v13124_v17 = vpack.c.bf16 %v13635_v1, %v13633_v18  ;;  %v13643_v43 = vand.u32 4294901760, %v13642_v42  ;;  %v8241_v21 = vand.u32 4294901760, %v13127_v11  ;;  %v13645_v4 = vand.u32 4294901760, %v13644_v9  ;;  %v13652_v59 = vld [vmem:[#allocation32_spill] sm:$0xff]  ;;  %v13658_v9 = vld [vmem:[#allocation13_spill] sm:$0xff] }
 0x48c   : > { %v13134_v26 = vpack.c.bf16 %v13639_v62, %v13637_v27  ;;  %v8236_v5 = vsub.f32 %v8234_v22, %v8235_v53  ;;  %v13647_v45 = vand.u32 4294901760, %v13646_v33  ;;  %v13649_v14 = vand.u32 4294901760, %v13648_v25  ;;  %v13653_v62 = vld [vmem:[#allocation33_spill] sm:$0xff]  ;;  %v13657_v42 = vld [vmem:[#allocation12_spill] sm:$0xff] }
 0x48d   : > { %10356 = vmatpush3.bf16.msra.mxu0 %v13124_v17  ;;  %v13141_v38 = vpack.c.bf16 %v13643_v43, %v13641_v41  ;;  %10396 = vmatpush3.bf16.msra.mxu1 %v10395_v29  ;;  %v13651_v18 = vand.u32 4294901760, %v13650_v49  ;;  %v8242_v1 = vsub.f32 %v13127_v11, %v8241_v21  ;;  %v10397_v29 = vpack.c.bf16 %v12624_v57, %v12619_v50  ;;  %v13656_v41 = vld [vmem:[#allocation11_spill] sm:$0xff] }
 0x48e   : > { %v8237_v7 = vand.u32 4294901760, %v8236_v5  ;;  %10358 = vmatprep.subr.bf16.mxu0 %v13134_v26  ;;  %10430 = vmatprep.subr.bf16.mxu1 %v12979_v8  ;;  %v13150_v12 = vpack.c.bf16 %v13647_v45, %v13645_v4  ;;  %v10399_v28 = vpack.c.bf16 %v12664_v58, %v12647_v63  ;;  %v10401_v5 = vpack.c.bf16 %v13653_v62, %v13652_v59  ;;  %v13659_v4 = vld [vmem:[#allocation35_spill] sm:$0xff]  ;;  %v13660_v45 = vld [vmem:[#allocation14_spill] sm:$0xff] }
 0x48f   : > { %v13158_v0 = vpack.c.bf16 %v13651_v18, %v13649_v14  ;;  %v8243_v27 = vand.u32 4294901760, %v8242_v1  ;;  %v10405_v43 = vpack.c.bf16 %v13657_v42, %v13656_v41  ;;  %v10407_v33 = vpack.c.bf16 %v13659_v4, %v13658_v9  ;;  %v13661_v14 = vld [vmem:[#allocation36_spill] sm:$0xff] }
 0x490   : > { %8238 = vmatprep.mubr.f32.mxu0 %v8237_v7  ;;  %8476 = vmatmul.mubr.f32.vlgmr.msra.gmra.mrb[20].mxu1 %v13114_v3  ;;  %v13655_v7 = vld [vmem:[#allocation10_spill] sm:$0xff]  ;;  %v10411_v25 = vpack.c.bf16 %v12913_v15, %v12908_v39  ;;  %v10413_v49 = vpack.c.bf16 %v12934_v30, %v13661_v14  ;;  %v10415_v18 = vpack.c.bf16 %v12954_v36, %v12948_v46 }
 0x491   : > { %10360 = vmatpush3.bf16.msra.mxu0 %v13141_v38  ;;  %10432 = vmatpush3.bf16.msra.mxu1 %v13003_v16  ;;  %v10417_v1 = vpack.c.bf16 %v12964_v54, %v12959_v2 }
 0x492   : > { %8718 = vmatprep.mubr.f32.mxu1 %v8235_v53  ;;  %10362 = vmatprep.subr.bf16.mxu0 %v13150_v12  ;;  %v13654_v53 = vld [vmem:[#allocation34_spill] sm:$0xff] }
 0x493   : > { %10434 = vmatprep.subr.bf16.mxu1 %v13009_v52  ;;  %v10403_v24 = vpack.c.bf16 %v13655_v7, %v13654_v53 }
 0x495   : > { %10364 = vmatpush3.bf16.msra.mxu0 %v13158_v0  ;;  %10436 = vmatpush3.bf16.msra.mxu1 %v13030_v55 }
 0x496   : > { %10398 = vmatprep.subr.bf16.mxu0 %v10397_v29  ;;  %10438 = vmatprep.subr.bf16.mxu1 %v13037_v32  ;;  %v10419_v29 = vpack.c.bf16 %v13608_v6, %v13606_v31  ;;  %v10425_v31 = vpack.c.bf16 %v13620_v13, %v12514_v47  ;;  %v10427_v6 = vpack.c.bf16 %v12547_v56, %v12542_v10  ;;  %v13664_v47 = vand.u32 4294901760, %v12647_v63 }
 0x497   : > { %v13666_v10 = vand.u32 4294901760, %v13652_v59  ;;  %v13667_v56 = vand.u32 4294901760, %v13653_v62  ;;  %v13669_v63 = vand.u32 4294901760, %v13655_v7  ;;  %v13673_v13 = vand.u32 4294901760, %v13659_v4 }
 0x498   : > { %8244 = vmatmul.mubr.f32.vlgmr.msra.gmra.mrb[20].mxu0 %v8243_v27  ;;  %v10423_v27 = vpack.c.bf16 %v12509_v20, %v12504_v40  ;;  %v13663_v40 = vand.u32 4294901760, %v12624_v57  ;;  %v13668_v57 = vand.u32 4294901760, %v13654_v53  ;;  %v13676_v59 = vand.u32 4294901760, %v12908_v39 }
 0x499   : > { %10400 = vmatpush3.bf16.msra.mxu0 %v10399_v28  ;;  %8611 = vmatprep.mubr.f32.mxu0 %v8234_v22  ;;  %v10409_v22 = vpack.c.bf16 %v12877_v60, %v13660_v45  ;;  %v10421_v28 = vpack.c.bf16 %v13611_v61, %v12482_v34  ;;  %v13662_v34 = vand.u32 4294901760, %v12619_v50  ;;  %v10465_v50 = vpack.c.bf16 %v13667_v56, %v13666_v10 }
 0x49a   : > { %10440 = vmatpush3.bf16.msra.mxu1 %v13056_v19  ;;  %10402 = vmatprep.subr.bf16.mxu0 %v10401_v5  ;;  %v13678_v5 = vand.u32 4294901760, %v13661_v14  ;;  %v13683_v39 = vand.u32 4294901760, %v12964_v54  ;;  %v13687_v54 = vld [vmem:[#allocation30_spill] sm:$0xff] }
 0x49b   : > { %10442 = vmatprep.subr.bf16.mxu1 %v13063_v23  ;;  %v10461_v20 = vpack.c.bf16 %v13663_v40, %v13662_v34 }
 0x49d   : > { %10404 = vmatpush3.bf16.msra.mxu0 %v10403_v24 }
 0x49e   : > { %10444 = vmatpush3.bf16.msra.mxu1 %v13083_v37  ;;  %10406 = vmatprep.subr.bf16.mxu0 %v10405_v43 }
 0x49f   : > { %10446 = vmatprep.subr.bf16.mxu1 %v13089_v48 }
 0x4a1   : > { %10408 = vmatpush3.bf16.msra.mxu0 %v10407_v33 }
 0x4a2   : > { %10448 = vmatpush3.bf16.msra.mxu1 %v13106_v35  ;;  %10410 = vmatprep.subr.bf16.mxu0 %v10409_v22 }
 0x4a3   : > { %10450 = vmatprep.subr.bf16.mxu1 %v13112_v44 }
 0x4a5   : > { %10412 = vmatpush3.bf16.msra.mxu0 %v10411_v25 }
 0x4a6   : > { %10452 = vmatpush3.bf16.msra.mxu1 %v13124_v17  ;;  %10414 = vmatprep.subr.bf16.mxu0 %v10413_v49 }
 0x4a7   : > { %10454 = vmatprep.subr.bf16.mxu1 %v13134_v26 }
 0x4a9   : > { %10416 = vmatpush3.bf16.msra.mxu0 %v10415_v18 }
 0x4aa   : > { %10456 = vmatpush3.bf16.msra.mxu1 %v13141_v38  ;;  %10418 = vmatprep.subr.bf16.mxu0 %v10417_v1 }
 0x4ab   : > { %10458 = vmatprep.subr.bf16.mxu1 %v13150_v12 }
 0x4ad   : > { %10420 = vmatpush3.bf16.msra.mxu0 %v10419_v29 }
 0x4ae   : > { %10460 = vmatpush3.bf16.msra.mxu1 %v13158_v0  ;;  %10422 = vmatprep.subr.bf16.mxu0 %v10421_v28 }
 0x4af   : > { %10494 = vmatprep.subr.bf16.mxu1 %v12979_v8  ;;  %v13665_v8 = vand.u32 4294901760, %v12664_v58  ;;  %v10467_v58 = vpack.c.bf16 %v13669_v63, %v13668_v57 }
 0x4b1   : > { %8722 = vmatmul.mubr.f32.vlgmr.msra.gmra.mrb[22].mxu1 %v8241_v21  ;;  %10424 = vmatpush3.bf16.msra.mxu0 %v10423_v27  ;;  %v10463_v61 = vpack.c.bf16 %v13665_v8, %v13664_v47 }
 0x4b2   : > { %10496 = vmatpush3.bf16.msra.mxu1 %v13003_v16  ;;  %8992 = vmatprep.mubr.f32.mxu1 %v13099_v51  ;;  %v13670_v16 = vand.u32 4294901760, %v13656_v41 }
 0x4b3   : > { %10426 = vmatprep.subr.bf16.mxu0 %v10425_v31  ;;  %10498 = vmatprep.subr.bf16.mxu1 %v13009_v52  ;;  %v13671_v52 = vand.u32 4294901760, %v13657_v42 }
 0x4b5   : > { %10428 = vmatpush3.bf16.msra.mxu0 %v10427_v6 }
 0x4b6   : > { %10500 = vmatpush3.bf16.msra.mxu1 %v13030_v55  ;;  %10462 = vmatprep.subr.bf16.mxu0 %v10461_v20  ;;  %v10469_v55 = vpack.c.bf16 %v13671_v52, %v13670_v16 }
 0x4b7   : > { %10502 = vmatprep.subr.bf16.mxu1 %v13037_v32  ;;  %v13672_v32 = vand.u32 4294901760, %v13658_v9 }
 0x4b8   : > { %8614 = vmatmul.mubr.f32.vlgmr.msra.gmra.mrb[22].mxu0 %v13127_v11  ;;  %v13674_v11 = vand.u32 4294901760, %v13660_v45 }
 0x4b9   : > { %10464 = vmatpush3.bf16.msra.mxu0 %v10463_v61  ;;  %8888 = vmatprep.mubr.f32.mxu0 %v13099_v51  ;;  %v10471_v51 = vpack.c.bf16 %v13673_v13, %v13672_v32 }
 0x4ba   : > { %10504 = vmatpush3.bf16.msra.mxu1 %v13056_v19  ;;  %10466 = vmatprep.subr.bf16.mxu0 %v10465_v50  ;;  %v13675_v19 = vand.u32 4294901760, %v12877_v60  ;;  %v13680_v60 = vand.u32 4294901760, %v12948_v46  ;;  %v13685_v46 = vld [vmem:[#allocation28_spill] sm:$0xff] }
 0x4bb   : > { %10506 = vmatprep.subr.bf16.mxu1 %v13063_v23  ;;  %v13677_v23 = vand.u32 4294901760, %v12913_v15  ;;  %v13682_v15 = vand.u32 4294901760, %v12959_v2  ;;  %v13688_v2 = vld [vmem:[#allocation31_spill] sm:$0xff] }
 0x4bc   : > { %v10473_v21 = vpack.c.bf16 %v13675_v19, %v13674_v11 }
 0x4bd   : > { %10468 = vmatpush3.bf16.msra.mxu0 %v10467_v58  ;;  %v10475_v62 = vpack.c.bf16 %v13677_v23, %v13676_v59 }
 0x4be   : > { %10508 = vmatpush3.bf16.msra.mxu1 %v13083_v37  ;;  %10470 = vmatprep.subr.bf16.mxu0 %v10469_v55  ;;  %v13679_v37 = vand.u32 4294901760, %v12934_v30  ;;  %v13684_v30 = vld [vmem:[#allocation27_spill] sm:$0xff] }
 0x4bf   : > { %10510 = vmatprep.subr.bf16.mxu1 %v13089_v48  ;;  %v13681_v48 = vand.u32 4294901760, %v12954_v36  ;;  %v13686_v36 = vld [vmem:[#allocation29_spill] sm:$0xff] }
 0x4c0   : > { %v10477_v53 = vpack.c.bf16 %v13679_v37, %v13678_v5 }
 0x4c1   : > { %10472 = vmatpush3.bf16.msra.mxu0 %v10471_v51  ;;  %v10479_v7 = vpack.c.bf16 %v13681_v48, %v13680_v60 }
 0x4c2   : > { %10512 = vmatpush3.bf16.msra.mxu1 %v13106_v35  ;;  %10474 = vmatprep.subr.bf16.mxu0 %v10473_v21  ;;  %v10481_v35 = vpack.c.bf16 %v13683_v39, %v13682_v15 }
 0x4c3   : > { %10514 = vmatprep.subr.bf16.mxu1 %v13112_v44 }
 0x4c5   : > { %10476 = vmatpush3.bf16.msra.mxu0 %v10475_v62 }
 0x4c6   : > { %10516 = vmatpush3.bf16.msra.mxu1 %v13124_v17  ;;  %10478 = vmatprep.subr.bf16.mxu0 %v10477_v53 }
 0x4c7   : > { %10518 = vmatprep.subr.bf16.mxu1 %v13134_v26 }
 0x4c9   : > { %10480 = vmatpush3.bf16.msra.mxu0 %v10479_v7 }
 0x4ca   : > { %10520 = vmatpush3.bf16.msra.mxu1 %v13141_v38  ;;  %10482 = vmatprep.subr.bf16.mxu0 %v10481_v35 }
 0x4cb   : > { %10522 = vmatprep.subr.bf16.mxu1 %v13150_v12  ;;  %v9092_v12 = vld [vmem:[%s13336_s5] ss:$0 sm:$0xff] }
 0x4cd   : > { %10484 = vmatpush3.bf16.msra.mxu0 %v13684_v30 }
 0x4ce   : > { %10524 = vmatpush3.bf16.msra.mxu1 %v13158_v0  ;;  %10486 = vmatprep.subr.bf16.mxu0 %v13685_v46 }
 0x4d1   : > { %8994 = vmatmul.mubr.f32.vlgmr.msra.gmra.mrb[24].mxu1 %v13114_v3  ;;  %10488 = vmatpush3.bf16.msra.mxu0 %v13686_v36 }
 0x4d2   : > { %10490 = vmatprep.subr.bf16.mxu0 %v13687_v54 }
 0x4d5   : > { %10492 = vmatpush3.bf16.msra.mxu0 %v13688_v2 }
 0x4d8   : > { %8890 = vmatmul.mubr.f32.vlgmr.msra.gmra.mrb[24].mxu0 %v13114_v3 }
 0x4fe   : > { %v9260_v44 = vpop.f32.mrb[14].mxu1 }
 0x4ff   : > { %v9261_v17 = vpop.f32.mrb[15].mxu1 }
 0x500   : > { %v9262_v26 = vadd.f32 %v9261_v17, %v9260_v44 }
 0x506   : > { %v9225_v38 = vpop.f32.mrb[14].mxu0 }
 0x507   : > { %v9226_v0 = vpop.f32.mrb[15].mxu0 }
 0x508   : > { %v9227_v24 = vadd.f32 %v9226_v0, %v9225_v38 }
 0x50a   : > { %v7384_v41 = vadd.f32 %v9227_v24, %v9092_v12 }
 0x50c   : > { %v7616_v42 = vadd.f32 %v9262_v26, %v7384_v41 }
 0x51e   : > { %v9330_v43 = vpop.f32.mrb[16].mxu1 }
 0x51f   : > { %v9331_v9 = vpop.f32.mrb[17].mxu1 }
 0x520   : > { %v9332_v4 = vadd.f32 %v9331_v9, %v9330_v43 }
 0x528   : > { %v9295_v33 = vpop.f32.mrb[16].mxu0 }
 0x529   : > { %v9296_v45 = vpop.f32.mrb[17].mxu0 }
 0x52a   : > { %v9297_v22 = vadd.f32 %v9296_v45, %v9295_v33 }
 0x52c   : > { %v7754_v25 = vadd.f32 %v9297_v22, %v7616_v42 }
 0x52e   : > { %v7862_v3 = vadd.f32 %v9332_v4, %v7754_v25 }
 0x53f   : > { %v9400_v14 = vpop.f32.mrb[18].mxu1 }
 0x540   : > { %v9401_v49 = vpop.f32.mrb[19].mxu1 }
 0x541   : > { %v9402_v18 = vadd.f32 %v9401_v49, %v9400_v14 }
 0x548   : > { %v9365_v1 = vpop.f32.mrb[18].mxu0 }
 0x549   : > { %v9366_v29 = vpop.f32.mrb[19].mxu0 }
 0x54a   : > { %v9367_v28 = vadd.f32 %v9366_v29, %v9365_v1 }
 0x54c   : > { %v8030_v27 = vadd.f32 %v9367_v28, %v7862_v3 }
 0x54e   : > { %v8134_v31 = vadd.f32 %v9402_v18, %v8030_v27 }
 0x563   : > { %v9470_v6 = vpop.f32.mrb[20].mxu1 }
 0x564   : > { %v9471_v34 = vpop.f32.mrb[21].mxu1 }
 0x565   : > { %v9472_v40 = vadd.f32 %v9471_v34, %v9470_v6 }
 0x56b   : > { %v9435_v20 = vpop.f32.mrb[20].mxu0 }
 0x56c   : > { %v9436_v47 = vpop.f32.mrb[21].mxu0 }
 0x56d   : > { %v9437_v8 = vadd.f32 %v9436_v47, %v9435_v20 }
 0x56f   : > { %v8246_v61 = vadd.f32 %v9437_v8, %v8134_v31 }
 0x571   : > { %v8478_v10 = vadd.f32 %v9472_v40, %v8246_v61 }
 0x584   : > { %v9540_v56 = vpop.f32.mrb[22].mxu1 }
 0x585   : > { %v9541_v50 = vpop.f32.mrb[23].mxu1 }
 0x586   : > { %v9542_v57 = vadd.f32 %v9541_v50, %v9540_v56 }
 0x58b   : > { %v9505_v63 = vpop.f32.mrb[22].mxu0 }
 0x58c   : > { %v9506_v58 = vpop.f32.mrb[23].mxu0 }
 0x58d   : > { %v9507_v16 = vadd.f32 %v9506_v58, %v9505_v63 }
 0x58f   : > { %v8616_v52 = vadd.f32 %v9507_v16, %v8478_v10 }
 0x591   : > { %v8724_v55 = vadd.f32 %v9542_v57, %v8616_v52 }
 0x5a4   : > { %v9610_v32 = vpop.f32.mrb[24].mxu1 }
 0x5a5   : > { %v9611_v13 = vpop.f32.mrb[25].mxu1 }
 0x5a6   : > { %v9612_v51 = vadd.f32 %v9611_v13, %v9610_v32 }
 0x5ab   : > { %v9575_v11 = vpop.f32.mrb[24].mxu0 }
 0x5ac   : > { %v9576_v19 = vpop.f32.mrb[25].mxu0 }
 0x5ad   : > { %v9577_v21 = vadd.f32 %v9576_v19, %v9575_v11 }
 0x5af   : > { %v8892_v59 = vadd.f32 %v9577_v21, %v8724_v55 }
 0x5b1   : > { %v8996_v23 = vadd.f32 %v9612_v51, %v8892_v59 }
 0x5b3   : > { %8999 = vst.msk [vmem:[%s255_s29] sm:$0xff] %vm282_vm0, %v8996_v23 }
 0x5b4   : > { %10735 = shalt.err (!%p10732_p3)
}
 0x5b5   : > { %s10736_s17 = scalar_lea.hbm %s13288_s12, 128  ;;  %s10740_s20 = scalar_lea.hbm %s13337_s6, 256 }
 0x5b6   : > { %p10737_p4 = scmp.ne.s32.totalorder %s13288_s12, %s10736_s17  ;;  %p10741_p9 = scmp.lt.u32.totalorder %s13288_s12, %s13337_s6 }
 0x5b7   : > { %p10742_p10 = scmp.lt.u32.totalorder %s10740_s20, %s10736_s17  ;;  %p10744_p12 = scmp.lt.u32.totalorder %s10736_s17, %s13288_s12 }
 0x5b8   : > { %p10738_p7 = pnand %p10737_p4, %p10862_p5 }
 0x5b9   : > { %p10743_p11 = por %p10742_p10, %p10741_p9 }
 0x5ba   : > { %p10739_p8 = pneg %p10738_p7 }
 0x5bb   : > { %p10745_p13 = por %p10744_p12, %p10743_p11 }
 0x5bd   : > { %p10746_p0 = pnand %p10745_p13, %p10739_p8 }
 0x5bf   : > { %10749 = shalt.err (!%p10746_p0)
}
 0x5c0   : > { %10665 = dma.vmem_to_hbm [thread:$0]  (%p10862_p5), %s13290_s9, 128, %s13288_s12, %s9001_s13  }
 0x5c1 PF: > { %p10671_p1 = scmp.ge.s32.totalorder %s10784_s24, 2  ;;  %s9026_s29 = sand.u32 1, %s10772_s21  }
 0x5c2   : > { %s9027_s10 = scalar_lea.sflag [#allocation3], %s9026_s29 }
 0x5c3   : > { %p10668_p2 = pnand %p10671_p1, %p10866_p6 }
 0x5c5   : > { %10767 = dma.done.wait (!%p10668_p2), %s9027_s10, 128  }
 0x5c6   : > { %10769 = vsyncadd (!%p10668_p2), %s9027_s10, 4294967168  ;;  %p16_p3 = scmp.ge.s32.totalorder %s10849_s27, 4   ;;  %s13689_s21 = smov %s10776_s22 }
 0x5c7   : > { %s13690_s22 = smov %s10780_s23  ;;  %s13691_s23 = smov %s10860_s30 }
 0x5c8   : > { %s13692_s24 = smov %s10849_s27  ;;  %18 = sbr.rel (!%p16_p3) target bundleno = 3 (0x3), region = 82 }
 0x5cf   :  { %9032 = vsyncpa [#allocation3], 1 }
 0x5d0   :  { %9034 = vsyncpa [#allocation3 + $0x1], 1 }

</bundles_post_ra>
